<compile_context>
chip_gen: v5e
topology: v5e:2x2
jax: 0.10.0
libtpu: 0.0.40
codegen_flags: <defaults>
</compile_context>

<pallas_src>
import math
import numpy as np
import jax
import jax.numpy as jnp
from jax import lax
from jax.experimental import pallas as pl
from jax.experimental.pallas import tpu as pltpu

# ----------------------------- small synthetic config ------------------------
BATCH = 2
SEQ = 16
DIM = 32                  # d_model seen by this block
HEADS = 4
K_DIM = 128
NUM_EXPERTS = 64          # n_keys
KNN = 8
EXPERT_DIM = DIM          # see semantics note above
N_SHARED = 4              # n_shared_experts (small)
MULTIPLE_OF = 4
BN_EPS = 1e-5
TOKEN_BLOCK = 16          # tokens per grid step (multiple of 8); raise at scale


def _swiglu_hidden(dim, multiple_of=MULTIPLE_OF):
    hidden = 4 * dim
    hidden = int(2 * hidden / 3)
    return multiple_of * ((hidden + multiple_of - 1) // multiple_of)


HID_ACT = _swiglu_hidden(KNN)        # SwiGLU applied over the knn axis -> 24
HID_SHARED = EXPERT_DIM * N_SHARED   # shared_experts hidden dim        -> 128


def get_uniform_keys(n_keys, dim, seed):
    """Same key init as the PyTorch module (nn.Linear-style uniform)."""
    rng = np.random.RandomState(seed)
    bound = 1 / math.sqrt(dim)
    return rng.uniform(-bound, bound, (n_keys, dim)).astype(np.float32)


# ----------------------------- the single fused kernel -----------------------
def _all_moe_fused_kernel(x_ref, wq_ref, bq_ref, keys_ref, wdt_ref, wu_ref,
                          w13a_ref, w2a_ref, w13s_ref, w2s_ref, o_ref,
                          s_scr, sd_scr):
    bt = x_ref.shape[0]                      # tokens in this grid step
    rows = HEADS * bt                        # head-major stacked rows
    mix_dt = w13a_ref.dtype                  # bf16 production path / f32 check path
    perf = jnp.dtype(mix_dt) == jnp.dtype(jnp.bfloat16)

    x = x_ref[...]                                            # (bt, D) f32

    # --- 1) query projection (eval-mode BatchNorm folded into W, b) ----------
    q = jnp.dot(x, wq_ref[...], preferred_element_type=jnp.float32) + bq_ref[...]

    # --- 2) per-head key scores written straight into the head-stacked scratch
    #        slab (no sublane concatenate); keys pre-transposed to (H, K, N) so
    #        this is a standard contraction (no transposed-RHS / XLU transpose).
    # --- 3) product-key "down" scores s_down = x . w_down^T, computed ONCE per
    #        token block and replicated over head blocks via slice stores.
    s_down = jnp.dot(x, wdt_ref[...], preferred_element_type=jnp.float32)  # (bt, N)
    for h in range(HEADS):
        qh = q[:, h * K_DIM:(h + 1) * K_DIM]                  # (bt, k_dim)
        s_scr[h * bt:(h + 1) * bt, :] = jnp.dot(
            qh, keys_ref[h], preferred_element_type=jnp.float32)
        sd_scr[h * bt:(h + 1) * bt, :] = s_down

    work = s_scr[...]                                         # (rows, N)
    sdt = sd_scr[...]                                         # (rows, N)

    # --- 4) exact sorted top-k with fused in-VMEM gather of the down-proj.
    #        2 XLU reductions per step (max + one-hot gather); the max mask is
    #        reused for the gather, the slot map and the -inf masking.  No
    #        explicit argmax: the scatter in step 6 uses the slot map.
    out_lane = lax.broadcasted_iota(jnp.int32, (rows, KNN), 1)
    vals = jnp.zeros((rows, KNN), jnp.float32)
    hv = jnp.zeros((rows, KNN), jnp.float32)
    slot = jnp.zeros((rows, NUM_EXPERTS), jnp.int32)   # slot j+1 at chosen lane
    for j in range(KNN):                                      # largest first, sorted
        m = jnp.max(work, axis=-1, keepdims=True)                           # XLU
        onehot = work == m                                                  # VPU
        sel = jnp.sum(jnp.where(onehot, sdt, 0.0), axis=-1, keepdims=True)  # XLU
        hit = out_lane == j
        vals = jnp.where(hit, m, vals)
        hv = jnp.where(hit, sel, hv)
        slot = jnp.where(onehot, j + 1, slot)
        work = jnp.where(onehot, -jnp.inf, work)

    # softmax over the knn retrieved scores (per token, per head)
    e = jnp.exp(vals - jnp.max(vals, axis=-1, keepdims=True))
    denom = jnp.sum(e, axis=-1, keepdims=True)
    if perf:
        sc = e * pl.reciprocal(denom, approx=True)            # EUP slot, ~free
    else:
        sc = e / denom                                        # exact check path

    # --- 5) SwiGLU over the knn axis (gate|up fused) * softmax(topk scores) --
    ag = jnp.dot(hv.astype(mix_dt), w13a_ref[...],
                 preferred_element_type=jnp.float32)          # (rows, 2*HID_ACT)
    a, g = ag[:, :HID_ACT], ag[:, HID_ACT:]
    act = (a * jax.nn.sigmoid(a)) * g                         # silu(w1 h) * (w3 h)
    y = jnp.dot(act.astype(mix_dt), w2a_ref[...],
                preferred_element_type=jnp.float32) * sc      # (rows, KNN)

    # --- 6) scatter y onto expert lanes, pre-sum heads, then ONE matmul ------
    z = jnp.zeros((rows, NUM_EXPERTS), jnp.float32)
    for j in range(KNN):
        z = z + jnp.where(slot == j + 1, y[:, j:j + 1], 0.0)
    zt = z[0:bt]
    for h in range(1, HEADS):                                 # head pre-sum
        zt = zt + z[h * bt:(h + 1) * bt]                      # (bt, N)
    moe = jnp.dot(zt.astype(mix_dt), wu_ref[...],
                  preferred_element_type=jnp.float32)         # (bt, D)

    # --- 7) shared-experts SwiGLU (gate|up fused) + add to the MoE path ------
    ag_s = jnp.dot(x.astype(mix_dt), w13s_ref[...],
                   preferred_element_type=jnp.float32)        # (bt, 2*HID_SHARED)
    a_s, g_s = ag_s[:, :HID_SHARED], ag_s[:, HID_SHARED:]
    act_s = (a_s * jax.nn.sigmoid(a_s)) * g_s
    shared = jnp.dot(act_s.astype(mix_dt), w2s_ref[...],
                     preferred_element_type=jnp.float32)      # (bt, D)

    o_ref[...] = moe + shared


def all_moe_forward(x, fp, *, token_block=TOKEN_BLOCK):
    """x: (B, T, D); fp: fused/folded params (see fuse_params)."""
    B_, T_, D = x.shape
    assert D == DIM
    bs = B_ * T_
    bt = min(token_block, bs)
    assert bs % bt == 0 and bt % 8 == 0
    xf = x.reshape(bs, D)
    n_q = HEADS * K_DIM
    rows = HEADS * bt

    # advisory cost estimate for XLA's scheduler
    flops = 2 * bs * (D * n_q + HEADS * K_DIM * NUM_EXPERTS + D * NUM_EXPERTS
                      + HEADS * KNN * 2 * HID_ACT + HEADS * HID_ACT * KNN
                      + NUM_EXPERTS * D + D * 2 * HID_SHARED + HID_SHARED * D)
    transcendentals = bs * (HEADS * KNN + HEADS * HID_ACT + HID_SHARED + HEADS)
    weights = (fp['wq_fold_t'], fp['bq_fold'], fp['keys_t'], fp['w_down_t'],
               fp['w_up'], fp['w13a_t'], fp['w2a_t'], fp['w13s_t'], fp['w2s_t'])
    bytes_accessed = 2 * xf.size * 4 + sum(int(w.size) * w.dtype.itemsize
                                           for w in weights)

    def const_spec(shape):
        nd = len(shape)
        return pl.BlockSpec(shape, lambda i, nd=nd: (0,) * nd)

    out = pl.pallas_call(
        _all_moe_fused_kernel,
        out_shape=jax.ShapeDtypeStruct((bs, D), jnp.float32),
        grid=(bs // bt,),
        in_specs=[
            pl.BlockSpec((bt, D), lambda i: (i, 0)),                 # x (token tiles)
            const_spec((D, n_q)),                                    # wq (BN folded)
            const_spec((1, n_q)),                                    # bq (BN folded)
            const_spec((HEADS, K_DIM, NUM_EXPERTS)),                 # keys^T per head
            const_spec((D, NUM_EXPERTS)),                            # w_down^T
            const_spec((NUM_EXPERTS, D)),                            # w_up
            const_spec((KNN, 2 * HID_ACT)),                          # w1a|w3a
            const_spec((HID_ACT, KNN)),                              # w2a
            const_spec((D, 2 * HID_SHARED)),                         # w1s|w3s
            const_spec((HID_SHARED, D)),                             # w2s
        ],
        out_specs=pl.BlockSpec((bt, D), lambda i: (i, 0)),
        scratch_shapes=[pltpu.VMEM((rows, NUM_EXPERTS), jnp.float32),   # scores
                        pltpu.VMEM((rows, NUM_EXPERTS), jnp.float32)],  # s_down rep
        compiler_params=pltpu.CompilerParams(dimension_semantics=("parallel",)),
        cost_estimate=pl.CostEstimate(flops=int(flops),
                                      transcendentals=int(transcendentals),
                                      bytes_accessed=int(bytes_accessed)),
    )(xf, fp['wq_fold_t'], fp['bq_fold'], fp['keys_t'], fp['w_down_t'], fp['w_up'],
      fp['w13a_t'], fp['w2a_t'], fp['w13s_t'], fp['w2s_t'])
    return out.reshape(B_, T_, D)


# ----------------------------- parameters ------------------------------------
def make_params():
    keyit = iter(jax.random.split(jax.random.PRNGKey(42), 16))

    def lin(out_f, in_f):
        bound = 1.0 / math.sqrt(in_f)
        return jax.random.uniform(next(keyit), (out_f, in_f), jnp.float32, -bound, bound)

    n_q = HEADS * K_DIM
    wq = lin(n_q, DIM)
    bq = jax.random.uniform(next(keyit), (1, n_q), jnp.float32,
                            -1.0 / math.sqrt(DIM), 1.0 / math.sqrt(DIM))
    keys = jnp.asarray(np.stack([get_uniform_keys(NUM_EXPERTS, K_DIM, seed=2 * i)
                                 for i in range(HEADS)]))        # (H, n_keys, k_dim)
    w_down = jax.random.normal(next(keyit), (NUM_EXPERTS, EXPERT_DIM), jnp.float32)
    w_up = jax.random.normal(next(keyit), (NUM_EXPERTS, EXPERT_DIM), jnp.float32)
    w1a = lin(HID_ACT, KNN); w3a = lin(HID_ACT, KNN); w2a = lin(KNN, HID_ACT)
    w1s = lin(HID_SHARED, DIM); w3s = lin(HID_SHARED, DIM); w2s = lin(DIM, HID_SHARED)
    return dict(
        wq_t=wq.T, bq=bq,
        bn_gamma=jnp.ones((1, n_q), jnp.float32),
        bn_beta=jnp.zeros((1, n_q), jnp.float32),
        bn_mean=jnp.zeros((1, n_q), jnp.float32),
        bn_var=jnp.ones((1, n_q), jnp.float32),
        keys=keys, w_down=w_down, w_up=w_up,
        w1a_t=w1a.T, w3a_t=w3a.T, w2a_t=w2a.T,
        w1s_t=w1s.T, w3s_t=w3s.T, w2s_t=w2s.T,
    )


def fuse_params(p, mixer_dtype=jnp.bfloat16):
    """One-time prep: fold eval-mode BN into the query Linear, concat SwiGLU
    gate/up weights, pre-transpose keys/w_down, and cast the non-selection
    ("mixer") weights to `mixer_dtype` (bf16 for the production path)."""
    scale = p['bn_gamma'] * lax.rsqrt(p['bn_var'] + BN_EPS)        # (1, n_q)
    return dict(
        wq_fold_t=p['wq_t'] * scale,                               # (D, n_q)
        bq_fold=(p['bq'] - p['bn_mean']) * scale + p['bn_beta'],   # (1, n_q)
        keys_t=jnp.transpose(p['keys'], (0, 2, 1)),                # (H, k_dim, n_keys)
        w_down_t=p['w_down'].T,                                    # (D, n_keys)
        w_up=p['w_up'].astype(mixer_dtype),                        # (n_keys, D)
        w13a_t=jnp.concatenate([p['w1a_t'], p['w3a_t']], axis=1).astype(mixer_dtype),
        w2a_t=p['w2a_t'].astype(mixer_dtype),                      # (HID_ACT, KNN)
        w13s_t=jnp.concatenate([p['w1s_t'], p['w3s_t']], axis=1).astype(mixer_dtype),
        w2s_t=p['w2s_t'].astype(mixer_dtype),                      # (HID_SHARED, D)
    )


# ----------------------------- pure-JAX reference ----------------------------
def reference(x, p):
    hp = lax.Precision.HIGHEST
    B_, T_, D = x.shape
    xf = x.reshape(-1, D)
    q = jnp.dot(xf, p['wq_t'], precision=hp) + p['bq'][0]
    q = (q - p['bn_mean'][0]) * lax.rsqrt(p['bn_var'][0] + BN_EPS) * p['bn_gamma'][0] \
        + p['bn_beta'][0]
    q = q.reshape(-1, HEADS, K_DIM)
    s = jnp.einsum('bhd,hnd->bhn', q, p['keys'], precision=hp)
    vals, idx = lax.top_k(s, KNN)
    sc = jax.nn.softmax(vals, axis=-1)
    wd = p['w_down'][idx]
    wu = p['w_up'][idx]
    h = jnp.einsum('bd,bhkd->bhk', xf, wd, precision=hp)
    a = jnp.einsum('bhk,kf->bhf', h, p['w1a_t'], precision=hp)
    g = jnp.einsum('bhk,kf->bhf', h, p['w3a_t'], precision=hp)
    act = jnp.einsum('bhf,fk->bhk', jax.nn.silu(a) * g, p['w2a_t'], precision=hp)
    act = act * sc
    moe = jnp.einsum('bhk,bhkd->bd', act, wu, precision=hp)
    sa = jnp.dot(xf, p['w1s_t'], precision=hp)
    sg = jnp.dot(xf, p['w3s_t'], precision=hp)
    shared = jnp.dot(jax.nn.silu(sa) * sg, p['w2s_t'], precision=hp)
    return (moe + shared).reshape(B_, T_, D)


if __name__ == "__main__":
    x = jax.random.normal(jax.random.PRNGKey(0), (BATCH, SEQ, DIM), jnp.float32)
    params = make_params()
    ref = jax.block_until_ready(reference(x, params))
    ref_np = np.asarray(ref)

    # (a) strict structural check: f32 mixer weights -> same math as reference
    out_f32 = jax.block_until_ready(all_moe_forward(x, fuse_params(params, jnp.float32)))
    assert out_f32.shape == (BATCH, SEQ, DIM) and out_f32.dtype == jnp.float32
    assert bool(jnp.all(jnp.isfinite(out_f32)))
    np.testing.assert_allclose(np.asarray(out_f32), ref_np, rtol=2e-2, atol=2e-2)

    # (b) production path: bf16 mixer matmuls (v6e/v7x bf16-native MXU);
    #     relative-L2 check (elementwise structure already proven in (a)).
    out_bf16 = jax.block_until_ready(all_moe_forward(x, fuse_params(params, jnp.bfloat16)))
    assert bool(jnp.all(jnp.isfinite(out_bf16)))
    rel_err = (np.linalg.norm(np.asarray(out_bf16) - ref_np)
               / max(np.linalg.norm(ref_np), 1e-12))
    assert rel_err < 2e-2, f"bf16 mixer relative L2 error too large: {rel_err}"

    print("KERNEL_OK")
</pallas_src>

<mosaic_0001>
module attributes {stable_mosaic.version = 11 : i64} {
  func.func @_all_moe_fused_kernel(%arg0: i32, %arg1: memref<16x32xf32, #tpu.memory_space<vmem>>, %arg2: memref<32x512xf32, #tpu.memory_space<vmem>>, %arg3: memref<1x512xf32, #tpu.memory_space<vmem>>, %arg4: memref<4x128x64xf32, #tpu.memory_space<vmem>>, %arg5: memref<32x64xf32, #tpu.memory_space<vmem>>, %arg6: memref<64x32xf32, #tpu.memory_space<vmem>>, %arg7: memref<8x48xf32, #tpu.memory_space<vmem>>, %arg8: memref<24x8xf32, #tpu.memory_space<vmem>>, %arg9: memref<32x256xf32, #tpu.memory_space<vmem>>, %arg10: memref<128x32xf32, #tpu.memory_space<vmem>>, %arg11: memref<16x32xf32, #tpu.memory_space<vmem>>, %arg12: memref<64x64xf32, #tpu.memory_space<vmem>>, %arg13: memref<64x64xf32, #tpu.memory_space<vmem>>) attributes {dimension_semantics = [#tpu.dimension_semantics<parallel>], iteration_bounds = array<i64: 2>, scalar_prefetch = 0 : i64, scratch_operands = 2 : i64, tpu.core_type = #tpu.core_type<tc>, window_params = [{transform_indices = @transform_0, window_bounds = array<i64: 16, 32>}, {pipeline_mode = #tpu.pipeline_mode<synchronous>, transform_indices = @transform_1, window_bounds = array<i64: 32, 512>}, {pipeline_mode = #tpu.pipeline_mode<synchronous>, transform_indices = @transform_2, window_bounds = array<i64: 1, 512>}, {pipeline_mode = #tpu.pipeline_mode<synchronous>, transform_indices = @transform_3, window_bounds = array<i64: 4, 128, 64>}, {pipeline_mode = #tpu.pipeline_mode<synchronous>, transform_indices = @transform_4, window_bounds = array<i64: 32, 64>}, {pipeline_mode = #tpu.pipeline_mode<synchronous>, transform_indices = @transform_5, window_bounds = array<i64: 64, 32>}, {pipeline_mode = #tpu.pipeline_mode<synchronous>, transform_indices = @transform_6, window_bounds = array<i64: 8, 48>}, {pipeline_mode = #tpu.pipeline_mode<synchronous>, transform_indices = @transform_7, window_bounds = array<i64: 24, 8>}, {pipeline_mode = #tpu.pipeline_mode<synchronous>, transform_indices = @transform_8, window_bounds = array<i64: 32, 256>}, {pipeline_mode = #tpu.pipeline_mode<synchronous>, transform_indices = @transform_9, window_bounds = array<i64: 128, 32>}, {transform_indices = @transform_10, window_bounds = array<i64: 16, 32>}]} {
    %c0 = arith.constant 0 : index
    %c0_0 = arith.constant 0 : index
    %0 = vector.load %arg1[%c0, %c0_0] : memref<16x32xf32, #tpu.memory_space<vmem>>, vector<16x32xf32>
    %c0_1 = arith.constant 0 : index
    %c0_2 = arith.constant 0 : index
    %1 = vector.load %arg2[%c0_1, %c0_2] : memref<32x512xf32, #tpu.memory_space<vmem>>, vector<32x512xf32>
    %cst = arith.constant dense<0.000000e+00> : vector<16x512xf32>
    %2 = tpu.matmul %0, %1, %cst {dimension_numbers = #tpu.dot_dimension_numbers<[1], [0], [0], [1], [0, 0, 1, 1], [], []>} : vector<16x32xf32>, vector<32x512xf32>, vector<16x512xf32> -> vector<16x512xf32>
    %c0_3 = arith.constant 0 : index
    %c0_4 = arith.constant 0 : index
    %3 = vector.load %arg3[%c0_3, %c0_4] : memref<1x512xf32, #tpu.memory_space<vmem>>, vector<1x512xf32>
    %4 = vector.broadcast %3 : vector<1x512xf32> to vector<16x512xf32>
    %5 = arith.addf %2, %4 : vector<16x512xf32>
    %c0_5 = arith.constant 0 : index
    %c0_6 = arith.constant 0 : index
    %6 = vector.load %arg5[%c0_5, %c0_6] : memref<32x64xf32, #tpu.memory_space<vmem>>, vector<32x64xf32>
    %cst_7 = arith.constant dense<0.000000e+00> : vector<16x64xf32>
    %7 = tpu.matmul %0, %6, %cst_7 {dimension_numbers = #tpu.dot_dimension_numbers<[1], [0], [0], [1], [0, 0, 1, 1], [], []>} : vector<16x32xf32>, vector<32x64xf32>, vector<16x64xf32> -> vector<16x64xf32>
    %8 = vector.extract_strided_slice %5 {offsets = [0, 0], sizes = [16, 128], strides = [1, 1]} : vector<16x512xf32> to vector<16x128xf32>
    %c0_8 = arith.constant 0 : index
    %c0_9 = arith.constant 0 : index
    %c0_10 = arith.constant 0 : index
    %9 = vector.load %arg4[%c0_8, %c0_9, %c0_10] : memref<4x128x64xf32, #tpu.memory_space<vmem>>, vector<1x128x64xf32>
    %10 = vector.shape_cast %9 : vector<1x128x64xf32> to vector<128x64xf32>
    %cst_11 = arith.constant dense<0.000000e+00> : vector<16x64xf32>
    %11 = tpu.matmul %8, %10, %cst_11 {dimension_numbers = #tpu.dot_dimension_numbers<[1], [0], [0], [1], [0, 0, 1, 1], [], []>} : vector<16x128xf32>, vector<128x64xf32>, vector<16x64xf32> -> vector<16x64xf32>
    %c0_12 = arith.constant 0 : index
    %c0_13 = arith.constant 0 : index
    %12 = vector.load %arg12[%c0_12, %c0_13] : memref<64x64xf32, #tpu.memory_space<vmem>>, vector<16x64xf32>
    tpu.vector_store %arg12[%c0_12, %c0_13], %11 {strides = array<i32>} : memref<64x64xf32, #tpu.memory_space<vmem>>, vector<16x64xf32>,
    %c0_14 = arith.constant 0 : index
    %c0_15 = arith.constant 0 : index
    %13 = vector.load %arg13[%c0_14, %c0_15] : memref<64x64xf32, #tpu.memory_space<vmem>>, vector<16x64xf32>
    tpu.vector_store %arg13[%c0_14, %c0_15], %7 {strides = array<i32>} : memref<64x64xf32, #tpu.memory_space<vmem>>, vector<16x64xf32>,
    %14 = vector.extract_strided_slice %5 {offsets = [0, 128], sizes = [16, 128], strides = [1, 1]} : vector<16x512xf32> to vector<16x128xf32>
    %c1 = arith.constant 1 : index
    %c0_16 = arith.constant 0 : index
    %c0_17 = arith.constant 0 : index
    %15 = vector.load %arg4[%c1, %c0_16, %c0_17] : memref<4x128x64xf32, #tpu.memory_space<vmem>>, vector<1x128x64xf32>
    %16 = vector.shape_cast %15 : vector<1x128x64xf32> to vector<128x64xf32>
    %cst_18 = arith.constant dense<0.000000e+00> : vector<16x64xf32>
    %17 = tpu.matmul %14, %16, %cst_18 {dimension_numbers = #tpu.dot_dimension_numbers<[1], [0], [0], [1], [0, 0, 1, 1], [], []>} : vector<16x128xf32>, vector<128x64xf32>, vector<16x64xf32> -> vector<16x64xf32>
    %c16 = arith.constant 16 : index
    %c0_19 = arith.constant 0 : index
    %18 = vector.load %arg12[%c16, %c0_19] : memref<64x64xf32, #tpu.memory_space<vmem>>, vector<16x64xf32>
    tpu.vector_store %arg12[%c16, %c0_19], %17 {strides = array<i32>} : memref<64x64xf32, #tpu.memory_space<vmem>>, vector<16x64xf32>,
    %c16_20 = arith.constant 16 : index
    %c0_21 = arith.constant 0 : index
    %19 = vector.load %arg13[%c16_20, %c0_21] : memref<64x64xf32, #tpu.memory_space<vmem>>, vector<16x64xf32>
    tpu.vector_store %arg13[%c16_20, %c0_21], %7 {strides = array<i32>} : memref<64x64xf32, #tpu.memory_space<vmem>>, vector<16x64xf32>,
    %20 = vector.extract_strided_slice %5 {offsets = [0, 256], sizes = [16, 128], strides = [1, 1]} : vector<16x512xf32> to vector<16x128xf32>
    %c2 = arith.constant 2 : index
    %c0_22 = arith.constant 0 : index
    %c0_23 = arith.constant 0 : index
    %21 = vector.load %arg4[%c2, %c0_22, %c0_23] : memref<4x128x64xf32, #tpu.memory_space<vmem>>, vector<1x128x64xf32>
    %22 = vector.shape_cast %21 : vector<1x128x64xf32> to vector<128x64xf32>
    %cst_24 = arith.constant dense<0.000000e+00> : vector<16x64xf32>
    %23 = tpu.matmul %20, %22, %cst_24 {dimension_numbers = #tpu.dot_dimension_numbers<[1], [0], [0], [1], [0, 0, 1, 1], [], []>} : vector<16x128xf32>, vector<128x64xf32>, vector<16x64xf32> -> vector<16x64xf32>
    %c32 = arith.constant 32 : index
    %c0_25 = arith.constant 0 : index
    %24 = vector.load %arg12[%c32, %c0_25] : memref<64x64xf32, #tpu.memory_space<vmem>>, vector<16x64xf32>
    tpu.vector_store %arg12[%c32, %c0_25], %23 {strides = array<i32>} : memref<64x64xf32, #tpu.memory_space<vmem>>, vector<16x64xf32>,
    %c32_26 = arith.constant 32 : index
    %c0_27 = arith.constant 0 : index
    %25 = vector.load %arg13[%c32_26, %c0_27] : memref<64x64xf32, #tpu.memory_space<vmem>>, vector<16x64xf32>
    tpu.vector_store %arg13[%c32_26, %c0_27], %7 {strides = array<i32>} : memref<64x64xf32, #tpu.memory_space<vmem>>, vector<16x64xf32>,
    %26 = vector.extract_strided_slice %5 {offsets = [0, 384], sizes = [16, 128], strides = [1, 1]} : vector<16x512xf32> to vector<16x128xf32>
    %c3 = arith.constant 3 : index
    %c0_28 = arith.constant 0 : index
    %c0_29 = arith.constant 0 : index
    %27 = vector.load %arg4[%c3, %c0_28, %c0_29] : memref<4x128x64xf32, #tpu.memory_space<vmem>>, vector<1x128x64xf32>
    %28 = vector.shape_cast %27 : vector<1x128x64xf32> to vector<128x64xf32>
    %cst_30 = arith.constant dense<0.000000e+00> : vector<16x64xf32>
    %29 = tpu.matmul %26, %28, %cst_30 {dimension_numbers = #tpu.dot_dimension_numbers<[1], [0], [0], [1], [0, 0, 1, 1], [], []>} : vector<16x128xf32>, vector<128x64xf32>, vector<16x64xf32> -> vector<16x64xf32>
    %c48 = arith.constant 48 : index
    %c0_31 = arith.constant 0 : index
    %30 = vector.load %arg12[%c48, %c0_31] : memref<64x64xf32, #tpu.memory_space<vmem>>, vector<16x64xf32>
    tpu.vector_store %arg12[%c48, %c0_31], %29 {strides = array<i32>} : memref<64x64xf32, #tpu.memory_space<vmem>>, vector<16x64xf32>,
    %c48_32 = arith.constant 48 : index
    %c0_33 = arith.constant 0 : index
    %31 = vector.load %arg13[%c48_32, %c0_33] : memref<64x64xf32, #tpu.memory_space<vmem>>, vector<16x64xf32>
    tpu.vector_store %arg13[%c48_32, %c0_33], %7 {strides = array<i32>} : memref<64x64xf32, #tpu.memory_space<vmem>>, vector<16x64xf32>,
    %c0_34 = arith.constant 0 : index
    %c0_35 = arith.constant 0 : index
    %32 = vector.load %arg12[%c0_34, %c0_35] : memref<64x64xf32, #tpu.memory_space<vmem>>, vector<64x64xf32>
    %c0_36 = arith.constant 0 : index
    %c0_37 = arith.constant 0 : index
    %33 = vector.load %arg13[%c0_36, %c0_37] : memref<64x64xf32, #tpu.memory_space<vmem>>, vector<64x64xf32>
    %34 = tpu.iota {dimensions = array<i32: 1>} : vector<64x8xi32>
    %cst_38 = arith.constant 0.000000e+00 : f32
    %35 = vector.broadcast %cst_38 : f32 to vector<64x8xf32>
    %cst_39 = arith.constant 0.000000e+00 : f32
    %36 = vector.broadcast %cst_39 : f32 to vector<64x8xf32>
    %c0_i32 = arith.constant 0 : i32
    %37 = vector.broadcast %c0_i32 : i32 to vector<64x64xi32>
    %cst_40 = arith.constant dense<0xFF800000> : vector<64xf32>
    %38 = vector.multi_reduction <maximumf>, %32, %cst_40 [1] : vector<64x64xf32> to vector<64xf32>
    %39 = vector.shape_cast %38 : vector<64xf32> to vector<64x1xf32>
    %40 = vector.broadcast %39 : vector<64x1xf32> to vector<64x64xf32>
    %41 = arith.cmpf oeq, %32, %40 : vector<64x64xf32>
    %cst_41 = arith.constant 0.000000e+00 : f32
    %42 = vector.broadcast %cst_41 : f32 to vector<64x64xf32>
    %43 = arith.select %41, %33, %42 : vector<64x64xi1>, vector<64x64xf32>
    %cst_42 = arith.constant dense<0.000000e+00> : vector<64xf32>
    %44 = vector.multi_reduction <add>, %43, %cst_42 [1] : vector<64x64xf32> to vector<64xf32>
    %45 = vector.shape_cast %44 : vector<64xf32> to vector<64x1xf32>
    %c0_i32_43 = arith.constant 0 : i32
    %46 = vector.broadcast %c0_i32_43 : i32 to vector<64x8xi32>
    %47 = arith.cmpi eq, %34, %46 : vector<64x8xi32>
    %48 = vector.shape_cast %39 : vector<64x1xf32> to vector<64x1xf32>
    %49 = vector.broadcast %48 : vector<64x1xf32> to vector<64x8xf32>
    %50 = arith.select %47, %49, %35 : vector<64x8xi1>, vector<64x8xf32>
    %51 = vector.shape_cast %45 : vector<64x1xf32> to vector<64x1xf32>
    %52 = vector.broadcast %51 : vector<64x1xf32> to vector<64x8xf32>
    %53 = arith.select %47, %52, %36 : vector<64x8xi1>, vector<64x8xf32>
    %c1_i32 = arith.constant 1 : i32
    %54 = vector.broadcast %c1_i32 : i32 to vector<64x64xi32>
    %55 = arith.select %41, %54, %37 : vector<64x64xi1>, vector<64x64xi32>
    %cst_44 = arith.constant 0xFF800000 : f32
    %56 = vector.broadcast %cst_44 : f32 to vector<64x64xf32>
    %57 = arith.select %41, %56, %32 : vector<64x64xi1>, vector<64x64xf32>
    %cst_45 = arith.constant dense<0xFF800000> : vector<64xf32>
    %58 = vector.multi_reduction <maximumf>, %57, %cst_45 [1] : vector<64x64xf32> to vector<64xf32>
    %59 = vector.shape_cast %58 : vector<64xf32> to vector<64x1xf32>
    %60 = vector.broadcast %59 : vector<64x1xf32> to vector<64x64xf32>
    %61 = arith.cmpf oeq, %57, %60 : vector<64x64xf32>
    %cst_46 = arith.constant 0.000000e+00 : f32
    %62 = vector.broadcast %cst_46 : f32 to vector<64x64xf32>
    %63 = arith.select %61, %33, %62 : vector<64x64xi1>, vector<64x64xf32>
    %cst_47 = arith.constant dense<0.000000e+00> : vector<64xf32>
    %64 = vector.multi_reduction <add>, %63, %cst_47 [1] : vector<64x64xf32> to vector<64xf32>
    %65 = vector.shape_cast %64 : vector<64xf32> to vector<64x1xf32>
    %c1_i32_48 = arith.constant 1 : i32
    %66 = vector.broadcast %c1_i32_48 : i32 to vector<64x8xi32>
    %67 = arith.cmpi eq, %34, %66 : vector<64x8xi32>
    %68 = vector.shape_cast %59 : vector<64x1xf32> to vector<64x1xf32>
    %69 = vector.broadcast %68 : vector<64x1xf32> to vector<64x8xf32>
    %70 = arith.select %67, %69, %50 : vector<64x8xi1>, vector<64x8xf32>
    %71 = vector.shape_cast %65 : vector<64x1xf32> to vector<64x1xf32>
    %72 = vector.broadcast %71 : vector<64x1xf32> to vector<64x8xf32>
    %73 = arith.select %67, %72, %53 : vector<64x8xi1>, vector<64x8xf32>
    %c2_i32 = arith.constant 2 : i32
    %74 = vector.broadcast %c2_i32 : i32 to vector<64x64xi32>
    %75 = arith.select %61, %74, %55 : vector<64x64xi1>, vector<64x64xi32>
    %cst_49 = arith.constant 0xFF800000 : f32
    %76 = vector.broadcast %cst_49 : f32 to vector<64x64xf32>
    %77 = arith.select %61, %76, %57 : vector<64x64xi1>, vector<64x64xf32>
    %cst_50 = arith.constant dense<0xFF800000> : vector<64xf32>
    %78 = vector.multi_reduction <maximumf>, %77, %cst_50 [1] : vector<64x64xf32> to vector<64xf32>
    %79 = vector.shape_cast %78 : vector<64xf32> to vector<64x1xf32>
    %80 = vector.broadcast %79 : vector<64x1xf32> to vector<64x64xf32>
    %81 = arith.cmpf oeq, %77, %80 : vector<64x64xf32>
    %cst_51 = arith.constant 0.000000e+00 : f32
    %82 = vector.broadcast %cst_51 : f32 to vector<64x64xf32>
    %83 = arith.select %81, %33, %82 : vector<64x64xi1>, vector<64x64xf32>
    %cst_52 = arith.constant dense<0.000000e+00> : vector<64xf32>
    %84 = vector.multi_reduction <add>, %83, %cst_52 [1] : vector<64x64xf32> to vector<64xf32>
    %85 = vector.shape_cast %84 : vector<64xf32> to vector<64x1xf32>
    %c2_i32_53 = arith.constant 2 : i32
    %86 = vector.broadcast %c2_i32_53 : i32 to vector<64x8xi32>
    %87 = arith.cmpi eq, %34, %86 : vector<64x8xi32>
    %88 = vector.shape_cast %79 : vector<64x1xf32> to vector<64x1xf32>
    %89 = vector.broadcast %88 : vector<64x1xf32> to vector<64x8xf32>
    %90 = arith.select %87, %89, %70 : vector<64x8xi1>, vector<64x8xf32>
    %91 = vector.shape_cast %85 : vector<64x1xf32> to vector<64x1xf32>
    %92 = vector.broadcast %91 : vector<64x1xf32> to vector<64x8xf32>
    %93 = arith.select %87, %92, %73 : vector<64x8xi1>, vector<64x8xf32>
    %c3_i32 = arith.constant 3 : i32
    %94 = vector.broadcast %c3_i32 : i32 to vector<64x64xi32>
    %95 = arith.select %81, %94, %75 : vector<64x64xi1>, vector<64x64xi32>
    %cst_54 = arith.constant 0xFF800000 : f32
    %96 = vector.broadcast %cst_54 : f32 to vector<64x64xf32>
    %97 = arith.select %81, %96, %77 : vector<64x64xi1>, vector<64x64xf32>
    %cst_55 = arith.constant dense<0xFF800000> : vector<64xf32>
    %98 = vector.multi_reduction <maximumf>, %97, %cst_55 [1] : vector<64x64xf32> to vector<64xf32>
    %99 = vector.shape_cast %98 : vector<64xf32> to vector<64x1xf32>
    %100 = vector.broadcast %99 : vector<64x1xf32> to vector<64x64xf32>
    %101 = arith.cmpf oeq, %97, %100 : vector<64x64xf32>
    %cst_56 = arith.constant 0.000000e+00 : f32
    %102 = vector.broadcast %cst_56 : f32 to vector<64x64xf32>
    %103 = arith.select %101, %33, %102 : vector<64x64xi1>, vector<64x64xf32>
    %cst_57 = arith.constant dense<0.000000e+00> : vector<64xf32>
    %104 = vector.multi_reduction <add>, %103, %cst_57 [1] : vector<64x64xf32> to vector<64xf32>
    %105 = vector.shape_cast %104 : vector<64xf32> to vector<64x1xf32>
    %c3_i32_58 = arith.constant 3 : i32
    %106 = vector.broadcast %c3_i32_58 : i32 to vector<64x8xi32>
    %107 = arith.cmpi eq, %34, %106 : vector<64x8xi32>
    %108 = vector.shape_cast %99 : vector<64x1xf32> to vector<64x1xf32>
    %109 = vector.broadcast %108 : vector<64x1xf32> to vector<64x8xf32>
    %110 = arith.select %107, %109, %90 : vector<64x8xi1>, vector<64x8xf32>
    %111 = vector.shape_cast %105 : vector<64x1xf32> to vector<64x1xf32>
    %112 = vector.broadcast %111 : vector<64x1xf32> to vector<64x8xf32>
    %113 = arith.select %107, %112, %93 : vector<64x8xi1>, vector<64x8xf32>
    %c4_i32 = arith.constant 4 : i32
    %114 = vector.broadcast %c4_i32 : i32 to vector<64x64xi32>
    %115 = arith.select %101, %114, %95 : vector<64x64xi1>, vector<64x64xi32>
    %cst_59 = arith.constant 0xFF800000 : f32
    %116 = vector.broadcast %cst_59 : f32 to vector<64x64xf32>
    %117 = arith.select %101, %116, %97 : vector<64x64xi1>, vector<64x64xf32>
    %cst_60 = arith.constant dense<0xFF800000> : vector<64xf32>
    %118 = vector.multi_reduction <maximumf>, %117, %cst_60 [1] : vector<64x64xf32> to vector<64xf32>
    %119 = vector.shape_cast %118 : vector<64xf32> to vector<64x1xf32>
    %120 = vector.broadcast %119 : vector<64x1xf32> to vector<64x64xf32>
    %121 = arith.cmpf oeq, %117, %120 : vector<64x64xf32>
    %cst_61 = arith.constant 0.000000e+00 : f32
    %122 = vector.broadcast %cst_61 : f32 to vector<64x64xf32>
    %123 = arith.select %121, %33, %122 : vector<64x64xi1>, vector<64x64xf32>
    %cst_62 = arith.constant dense<0.000000e+00> : vector<64xf32>
    %124 = vector.multi_reduction <add>, %123, %cst_62 [1] : vector<64x64xf32> to vector<64xf32>
    %125 = vector.shape_cast %124 : vector<64xf32> to vector<64x1xf32>
    %c4_i32_63 = arith.constant 4 : i32
    %126 = vector.broadcast %c4_i32_63 : i32 to vector<64x8xi32>
    %127 = arith.cmpi eq, %34, %126 : vector<64x8xi32>
    %128 = vector.shape_cast %119 : vector<64x1xf32> to vector<64x1xf32>
    %129 = vector.broadcast %128 : vector<64x1xf32> to vector<64x8xf32>
    %130 = arith.select %127, %129, %110 : vector<64x8xi1>, vector<64x8xf32>
    %131 = vector.shape_cast %125 : vector<64x1xf32> to vector<64x1xf32>
    %132 = vector.broadcast %131 : vector<64x1xf32> to vector<64x8xf32>
    %133 = arith.select %127, %132, %113 : vector<64x8xi1>, vector<64x8xf32>
    %c5_i32 = arith.constant 5 : i32
    %134 = vector.broadcast %c5_i32 : i32 to vector<64x64xi32>
    %135 = arith.select %121, %134, %115 : vector<64x64xi1>, vector<64x64xi32>
    %cst_64 = arith.constant 0xFF800000 : f32
    %136 = vector.broadcast %cst_64 : f32 to vector<64x64xf32>
    %137 = arith.select %121, %136, %117 : vector<64x64xi1>, vector<64x64xf32>
    %cst_65 = arith.constant dense<0xFF800000> : vector<64xf32>
    %138 = vector.multi_reduction <maximumf>, %137, %cst_65 [1] : vector<64x64xf32> to vector<64xf32>
    %139 = vector.shape_cast %138 : vector<64xf32> to vector<64x1xf32>
    %140 = vector.broadcast %139 : vector<64x1xf32> to vector<64x64xf32>
    %141 = arith.cmpf oeq, %137, %140 : vector<64x64xf32>
    %cst_66 = arith.constant 0.000000e+00 : f32
    %142 = vector.broadcast %cst_66 : f32 to vector<64x64xf32>
    %143 = arith.select %141, %33, %142 : vector<64x64xi1>, vector<64x64xf32>
    %cst_67 = arith.constant dense<0.000000e+00> : vector<64xf32>
    %144 = vector.multi_reduction <add>, %143, %cst_67 [1] : vector<64x64xf32> to vector<64xf32>
    %145 = vector.shape_cast %144 : vector<64xf32> to vector<64x1xf32>
    %c5_i32_68 = arith.constant 5 : i32
    %146 = vector.broadcast %c5_i32_68 : i32 to vector<64x8xi32>
    %147 = arith.cmpi eq, %34, %146 : vector<64x8xi32>
    %148 = vector.shape_cast %139 : vector<64x1xf32> to vector<64x1xf32>
    %149 = vector.broadcast %148 : vector<64x1xf32> to vector<64x8xf32>
    %150 = arith.select %147, %149, %130 : vector<64x8xi1>, vector<64x8xf32>
    %151 = vector.shape_cast %145 : vector<64x1xf32> to vector<64x1xf32>
    %152 = vector.broadcast %151 : vector<64x1xf32> to vector<64x8xf32>
    %153 = arith.select %147, %152, %133 : vector<64x8xi1>, vector<64x8xf32>
    %c6_i32 = arith.constant 6 : i32
    %154 = vector.broadcast %c6_i32 : i32 to vector<64x64xi32>
    %155 = arith.select %141, %154, %135 : vector<64x64xi1>, vector<64x64xi32>
    %cst_69 = arith.constant 0xFF800000 : f32
    %156 = vector.broadcast %cst_69 : f32 to vector<64x64xf32>
    %157 = arith.select %141, %156, %137 : vector<64x64xi1>, vector<64x64xf32>
    %cst_70 = arith.constant dense<0xFF800000> : vector<64xf32>
    %158 = vector.multi_reduction <maximumf>, %157, %cst_70 [1] : vector<64x64xf32> to vector<64xf32>
    %159 = vector.shape_cast %158 : vector<64xf32> to vector<64x1xf32>
    %160 = vector.broadcast %159 : vector<64x1xf32> to vector<64x64xf32>
    %161 = arith.cmpf oeq, %157, %160 : vector<64x64xf32>
    %cst_71 = arith.constant 0.000000e+00 : f32
    %162 = vector.broadcast %cst_71 : f32 to vector<64x64xf32>
    %163 = arith.select %161, %33, %162 : vector<64x64xi1>, vector<64x64xf32>
    %cst_72 = arith.constant dense<0.000000e+00> : vector<64xf32>
    %164 = vector.multi_reduction <add>, %163, %cst_72 [1] : vector<64x64xf32> to vector<64xf32>
    %165 = vector.shape_cast %164 : vector<64xf32> to vector<64x1xf32>
    %c6_i32_73 = arith.constant 6 : i32
    %166 = vector.broadcast %c6_i32_73 : i32 to vector<64x8xi32>
    %167 = arith.cmpi eq, %34, %166 : vector<64x8xi32>
    %168 = vector.shape_cast %159 : vector<64x1xf32> to vector<64x1xf32>
    %169 = vector.broadcast %168 : vector<64x1xf32> to vector<64x8xf32>
    %170 = arith.select %167, %169, %150 : vector<64x8xi1>, vector<64x8xf32>
    %171 = vector.shape_cast %165 : vector<64x1xf32> to vector<64x1xf32>
    %172 = vector.broadcast %171 : vector<64x1xf32> to vector<64x8xf32>
    %173 = arith.select %167, %172, %153 : vector<64x8xi1>, vector<64x8xf32>
    %c7_i32 = arith.constant 7 : i32
    %174 = vector.broadcast %c7_i32 : i32 to vector<64x64xi32>
    %175 = arith.select %161, %174, %155 : vector<64x64xi1>, vector<64x64xi32>
    %cst_74 = arith.constant 0xFF800000 : f32
    %176 = vector.broadcast %cst_74 : f32 to vector<64x64xf32>
    %177 = arith.select %161, %176, %157 : vector<64x64xi1>, vector<64x64xf32>
    %cst_75 = arith.constant dense<0xFF800000> : vector<64xf32>
    %178 = vector.multi_reduction <maximumf>, %177, %cst_75 [1] : vector<64x64xf32> to vector<64xf32>
    %179 = vector.shape_cast %178 : vector<64xf32> to vector<64x1xf32>
    %180 = vector.broadcast %179 : vector<64x1xf32> to vector<64x64xf32>
    %181 = arith.cmpf oeq, %177, %180 : vector<64x64xf32>
    %cst_76 = arith.constant 0.000000e+00 : f32
    %182 = vector.broadcast %cst_76 : f32 to vector<64x64xf32>
    %183 = arith.select %181, %33, %182 : vector<64x64xi1>, vector<64x64xf32>
    %cst_77 = arith.constant dense<0.000000e+00> : vector<64xf32>
    %184 = vector.multi_reduction <add>, %183, %cst_77 [1] : vector<64x64xf32> to vector<64xf32>
    %185 = vector.shape_cast %184 : vector<64xf32> to vector<64x1xf32>
    %c7_i32_78 = arith.constant 7 : i32
    %186 = vector.broadcast %c7_i32_78 : i32 to vector<64x8xi32>
    %187 = arith.cmpi eq, %34, %186 : vector<64x8xi32>
    %188 = vector.shape_cast %179 : vector<64x1xf32> to vector<64x1xf32>
    %189 = vector.broadcast %188 : vector<64x1xf32> to vector<64x8xf32>
    %190 = arith.select %187, %189, %170 : vector<64x8xi1>, vector<64x8xf32>
    %191 = vector.shape_cast %185 : vector<64x1xf32> to vector<64x1xf32>
    %192 = vector.broadcast %191 : vector<64x1xf32> to vector<64x8xf32>
    %193 = arith.select %187, %192, %173 : vector<64x8xi1>, vector<64x8xf32>
    %c8_i32 = arith.constant 8 : i32
    %194 = vector.broadcast %c8_i32 : i32 to vector<64x64xi32>
    %195 = arith.select %181, %194, %175 : vector<64x64xi1>, vector<64x64xi32>
    %cst_79 = arith.constant dense<0xFF800000> : vector<64xf32>
    %196 = vector.multi_reduction <maximumf>, %190, %cst_79 [1] : vector<64x8xf32> to vector<64xf32>
    %197 = vector.shape_cast %196 : vector<64xf32> to vector<64x1xf32>
    %198 = vector.broadcast %197 : vector<64x1xf32> to vector<64x8xf32>
    %199 = arith.subf %190, %198 : vector<64x8xf32>
    %200 = math.exp %199 : vector<64x8xf32>
    %cst_80 = arith.constant dense<0.000000e+00> : vector<64xf32>
    %201 = vector.multi_reduction <add>, %200, %cst_80 [1] : vector<64x8xf32> to vector<64xf32>
    %202 = vector.shape_cast %201 : vector<64xf32> to vector<64x1xf32>
    %203 = vector.broadcast %202 : vector<64x1xf32> to vector<64x8xf32>
    %204 = arith.divf %200, %203 : vector<64x8xf32>
    %c0_81 = arith.constant 0 : index
    %c0_82 = arith.constant 0 : index
    %205 = vector.load %arg7[%c0_81, %c0_82] : memref<8x48xf32, #tpu.memory_space<vmem>>, vector<8x48xf32>
    %cst_83 = arith.constant dense<0.000000e+00> : vector<64x48xf32>
    %206 = tpu.matmul %193, %205, %cst_83 {dimension_numbers = #tpu.dot_dimension_numbers<[1], [0], [0], [1], [0, 0, 1, 1], [], []>} : vector<64x8xf32>, vector<8x48xf32>, vector<64x48xf32> -> vector<64x48xf32>
    %207 = vector.extract_strided_slice %206 {offsets = [0, 0], sizes = [64, 24], strides = [1, 1]} : vector<64x48xf32> to vector<64x24xf32>
    %208 = vector.extract_strided_slice %206 {offsets = [0, 24], sizes = [64, 24], strides = [1, 1]} : vector<64x48xf32> to vector<64x24xf32>
    %209 = arith.negf %207 : vector<64x24xf32>
    %210 = math.exp %209 : vector<64x24xf32>
    %cst_84 = arith.constant 1.000000e+00 : f32
    %211 = vector.broadcast %cst_84 : f32 to vector<64x24xf32>
    %212 = arith.addf %211, %210 : vector<64x24xf32>
    %213 = arith.divf %211, %212 : vector<64x24xf32>
    %214 = arith.mulf %207, %213 : vector<64x24xf32>
    %215 = arith.mulf %214, %208 : vector<64x24xf32>
    %c0_85 = arith.constant 0 : index
    %c0_86 = arith.constant 0 : index
    %216 = vector.load %arg8[%c0_85, %c0_86] : memref<24x8xf32, #tpu.memory_space<vmem>>, vector<24x8xf32>
    %cst_87 = arith.constant dense<0.000000e+00> : vector<64x8xf32>
    %217 = tpu.matmul %215, %216, %cst_87 {dimension_numbers = #tpu.dot_dimension_numbers<[1], [0], [0], [1], [0, 0, 1, 1], [], []>} : vector<64x24xf32>, vector<24x8xf32>, vector<64x8xf32> -> vector<64x8xf32>
    %218 = arith.mulf %217, %204 : vector<64x8xf32>
    %cst_88 = arith.constant 0.000000e+00 : f32
    %219 = vector.broadcast %cst_88 : f32 to vector<64x64xf32>
    %c1_i32_89 = arith.constant 1 : i32
    %220 = vector.broadcast %c1_i32_89 : i32 to vector<64x64xi32>
    %221 = arith.cmpi eq, %195, %220 : vector<64x64xi32>
    %222 = vector.extract_strided_slice %218 {offsets = [0, 0], sizes = [64, 1], strides = [1, 1]} : vector<64x8xf32> to vector<64x1xf32>
    %cst_90 = arith.constant 0.000000e+00 : f32
    %223 = vector.shape_cast %222 : vector<64x1xf32> to vector<64x1xf32>
    %224 = vector.broadcast %223 : vector<64x1xf32> to vector<64x64xf32>
    %225 = vector.broadcast %cst_90 : f32 to vector<64x64xf32>
    %226 = arith.select %221, %224, %225 : vector<64x64xi1>, vector<64x64xf32>
    %227 = arith.addf %219, %226 : vector<64x64xf32>
    %c2_i32_91 = arith.constant 2 : i32
    %228 = vector.broadcast %c2_i32_91 : i32 to vector<64x64xi32>
    %229 = arith.cmpi eq, %195, %228 : vector<64x64xi32>
    %230 = vector.extract_strided_slice %218 {offsets = [0, 1], sizes = [64, 1], strides = [1, 1]} : vector<64x8xf32> to vector<64x1xf32>
    %cst_92 = arith.constant 0.000000e+00 : f32
    %231 = vector.shape_cast %230 : vector<64x1xf32> to vector<64x1xf32>
    %232 = vector.broadcast %231 : vector<64x1xf32> to vector<64x64xf32>
    %233 = vector.broadcast %cst_92 : f32 to vector<64x64xf32>
    %234 = arith.select %229, %232, %233 : vector<64x64xi1>, vector<64x64xf32>
    %235 = arith.addf %227, %234 : vector<64x64xf32>
    %c3_i32_93 = arith.constant 3 : i32
    %236 = vector.broadcast %c3_i32_93 : i32 to vector<64x64xi32>
    %237 = arith.cmpi eq, %195, %236 : vector<64x64xi32>
    %238 = vector.extract_strided_slice %218 {offsets = [0, 2], sizes = [64, 1], strides = [1, 1]} : vector<64x8xf32> to vector<64x1xf32>
    %cst_94 = arith.constant 0.000000e+00 : f32
    %239 = vector.shape_cast %238 : vector<64x1xf32> to vector<64x1xf32>
    %240 = vector.broadcast %239 : vector<64x1xf32> to vector<64x64xf32>
    %241 = vector.broadcast %cst_94 : f32 to vector<64x64xf32>
    %242 = arith.select %237, %240, %241 : vector<64x64xi1>, vector<64x64xf32>
    %243 = arith.addf %235, %242 : vector<64x64xf32>
    %c4_i32_95 = arith.constant 4 : i32
    %244 = vector.broadcast %c4_i32_95 : i32 to vector<64x64xi32>
    %245 = arith.cmpi eq, %195, %244 : vector<64x64xi32>
    %246 = vector.extract_strided_slice %218 {offsets = [0, 3], sizes = [64, 1], strides = [1, 1]} : vector<64x8xf32> to vector<64x1xf32>
    %cst_96 = arith.constant 0.000000e+00 : f32
    %247 = vector.shape_cast %246 : vector<64x1xf32> to vector<64x1xf32>
    %248 = vector.broadcast %247 : vector<64x1xf32> to vector<64x64xf32>
    %249 = vector.broadcast %cst_96 : f32 to vector<64x64xf32>
    %250 = arith.select %245, %248, %249 : vector<64x64xi1>, vector<64x64xf32>
    %251 = arith.addf %243, %250 : vector<64x64xf32>
    %c5_i32_97 = arith.constant 5 : i32
    %252 = vector.broadcast %c5_i32_97 : i32 to vector<64x64xi32>
    %253 = arith.cmpi eq, %195, %252 : vector<64x64xi32>
    %254 = vector.extract_strided_slice %218 {offsets = [0, 4], sizes = [64, 1], strides = [1, 1]} : vector<64x8xf32> to vector<64x1xf32>
    %cst_98 = arith.constant 0.000000e+00 : f32
    %255 = vector.shape_cast %254 : vector<64x1xf32> to vector<64x1xf32>
    %256 = vector.broadcast %255 : vector<64x1xf32> to vector<64x64xf32>
    %257 = vector.broadcast %cst_98 : f32 to vector<64x64xf32>
    %258 = arith.select %253, %256, %257 : vector<64x64xi1>, vector<64x64xf32>
    %259 = arith.addf %251, %258 : vector<64x64xf32>
    %c6_i32_99 = arith.constant 6 : i32
    %260 = vector.broadcast %c6_i32_99 : i32 to vector<64x64xi32>
    %261 = arith.cmpi eq, %195, %260 : vector<64x64xi32>
    %262 = vector.extract_strided_slice %218 {offsets = [0, 5], sizes = [64, 1], strides = [1, 1]} : vector<64x8xf32> to vector<64x1xf32>
    %cst_100 = arith.constant 0.000000e+00 : f32
    %263 = vector.shape_cast %262 : vector<64x1xf32> to vector<64x1xf32>
    %264 = vector.broadcast %263 : vector<64x1xf32> to vector<64x64xf32>
    %265 = vector.broadcast %cst_100 : f32 to vector<64x64xf32>
    %266 = arith.select %261, %264, %265 : vector<64x64xi1>, vector<64x64xf32>
    %267 = arith.addf %259, %266 : vector<64x64xf32>
    %c7_i32_101 = arith.constant 7 : i32
    %268 = vector.broadcast %c7_i32_101 : i32 to vector<64x64xi32>
    %269 = arith.cmpi eq, %195, %268 : vector<64x64xi32>
    %270 = vector.extract_strided_slice %218 {offsets = [0, 6], sizes = [64, 1], strides = [1, 1]} : vector<64x8xf32> to vector<64x1xf32>
    %cst_102 = arith.constant 0.000000e+00 : f32
    %271 = vector.shape_cast %270 : vector<64x1xf32> to vector<64x1xf32>
    %272 = vector.broadcast %271 : vector<64x1xf32> to vector<64x64xf32>
    %273 = vector.broadcast %cst_102 : f32 to vector<64x64xf32>
    %274 = arith.select %269, %272, %273 : vector<64x64xi1>, vector<64x64xf32>
    %275 = arith.addf %267, %274 : vector<64x64xf32>
    %c8_i32_103 = arith.constant 8 : i32
    %276 = vector.broadcast %c8_i32_103 : i32 to vector<64x64xi32>
    %277 = arith.cmpi eq, %195, %276 : vector<64x64xi32>
    %278 = vector.extract_strided_slice %218 {offsets = [0, 7], sizes = [64, 1], strides = [1, 1]} : vector<64x8xf32> to vector<64x1xf32>
    %cst_104 = arith.constant 0.000000e+00 : f32
    %279 = vector.shape_cast %278 : vector<64x1xf32> to vector<64x1xf32>
    %280 = vector.broadcast %279 : vector<64x1xf32> to vector<64x64xf32>
    %281 = vector.broadcast %cst_104 : f32 to vector<64x64xf32>
    %282 = arith.select %277, %280, %281 : vector<64x64xi1>, vector<64x64xf32>
    %283 = arith.addf %275, %282 : vector<64x64xf32>
    %284 = vector.extract_strided_slice %283 {offsets = [0, 0], sizes = [16, 64], strides = [1, 1]} : vector<64x64xf32> to vector<16x64xf32>
    %285 = vector.extract_strided_slice %283 {offsets = [16, 0], sizes = [16, 64], strides = [1, 1]} : vector<64x64xf32> to vector<16x64xf32>
    %286 = arith.addf %284, %285 : vector<16x64xf32>
    %287 = vector.extract_strided_slice %283 {offsets = [32, 0], sizes = [16, 64], strides = [1, 1]} : vector<64x64xf32> to vector<16x64xf32>
    %288 = arith.addf %286, %287 : vector<16x64xf32>
    %289 = vector.extract_strided_slice %283 {offsets = [48, 0], sizes = [16, 64], strides = [1, 1]} : vector<64x64xf32> to vector<16x64xf32>
    %290 = arith.addf %288, %289 : vector<16x64xf32>
    %c0_105 = arith.constant 0 : index
    %c0_106 = arith.constant 0 : index
    %291 = vector.load %arg6[%c0_105, %c0_106] : memref<64x32xf32, #tpu.memory_space<vmem>>, vector<64x32xf32>
    %cst_107 = arith.constant dense<0.000000e+00> : vector<16x32xf32>
    %292 = tpu.matmul %290, %291, %cst_107 {dimension_numbers = #tpu.dot_dimension_numbers<[1], [0], [0], [1], [0, 0, 1, 1], [], []>} : vector<16x64xf32>, vector<64x32xf32>, vector<16x32xf32> -> vector<16x32xf32>
    %c0_108 = arith.constant 0 : index
    %c0_109 = arith.constant 0 : index
    %293 = vector.load %arg9[%c0_108, %c0_109] : memref<32x256xf32, #tpu.memory_space<vmem>>, vector<32x256xf32>
    %cst_110 = arith.constant dense<0.000000e+00> : vector<16x256xf32>
    %294 = tpu.matmul %0, %293, %cst_110 {dimension_numbers = #tpu.dot_dimension_numbers<[1], [0], [0], [1], [0, 0, 1, 1], [], []>} : vector<16x32xf32>, vector<32x256xf32>, vector<16x256xf32> -> vector<16x256xf32>
    %295 = vector.extract_strided_slice %294 {offsets = [0, 0], sizes = [16, 128], strides = [1, 1]} : vector<16x256xf32> to vector<16x128xf32>
    %296 = vector.extract_strided_slice %294 {offsets = [0, 128], sizes = [16, 128], strides = [1, 1]} : vector<16x256xf32> to vector<16x128xf32>
    %297 = arith.negf %295 : vector<16x128xf32>
    %298 = math.exp %297 : vector<16x128xf32>
    %cst_111 = arith.constant 1.000000e+00 : f32
    %299 = vector.broadcast %cst_111 : f32 to vector<16x128xf32>
    %300 = arith.addf %299, %298 : vector<16x128xf32>
    %301 = arith.divf %299, %300 : vector<16x128xf32>
    %302 = arith.mulf %295, %301 : vector<16x128xf32>
    %303 = arith.mulf %302, %296 : vector<16x128xf32>
    %c0_112 = arith.constant 0 : index
    %c0_113 = arith.constant 0 : index
    %304 = vector.load %arg10[%c0_112, %c0_113] : memref<128x32xf32, #tpu.memory_space<vmem>>, vector<128x32xf32>
    %cst_114 = arith.constant dense<0.000000e+00> : vector<16x32xf32>
    %305 = tpu.matmul %303, %304, %cst_114 {dimension_numbers = #tpu.dot_dimension_numbers<[1], [0], [0], [1], [0, 0, 1, 1], [], []>} : vector<16x128xf32>, vector<128x32xf32>, vector<16x32xf32> -> vector<16x32xf32>
    %306 = arith.addf %292, %305 : vector<16x32xf32>
    %c0_115 = arith.constant 0 : index
    %c0_116 = arith.constant 0 : index
    %307 = vector.load %arg11[%c0_115, %c0_116] : memref<16x32xf32, #tpu.memory_space<vmem>>, vector<16x32xf32>
    tpu.vector_store %arg11[%c0_115, %c0_116], %306 {strides = array<i32>} : memref<16x32xf32, #tpu.memory_space<vmem>>, vector<16x32xf32>,
    return
  }
  func.func @transform_0(%arg0: i32) -> (i32, i32) {
    %c0_i32 = arith.constant 0 : i32
    %c0_i32_0 = arith.constant 0 : i32
    return %arg0, %c0_i32 : i32, i32
  }
  func.func @transform_1(%arg0: i32) -> (i32, i32) {
    %c0_i32 = arith.constant 0 : i32
    %c0_i32_0 = arith.constant 0 : i32
    %c0_i32_1 = arith.constant 0 : i32
    return %c0_i32, %c0_i32_0 : i32, i32
  }
  func.func @transform_2(%arg0: i32) -> (i32, i32) {
    %c0_i32 = arith.constant 0 : i32
    %c0_i32_0 = arith.constant 0 : i32
    %c0_i32_1 = arith.constant 0 : i32
    return %c0_i32, %c0_i32_0 : i32, i32
  }
  func.func @transform_3(%arg0: i32) -> (i32, i32, i32) {
    %c0_i32 = arith.constant 0 : i32
    %c0_i32_0 = arith.constant 0 : i32
    %c0_i32_1 = arith.constant 0 : i32
    %c0_i32_2 = arith.constant 0 : i32
    return %c0_i32, %c0_i32_0, %c0_i32_1 : i32, i32, i32
  }
  func.func @transform_4(%arg0: i32) -> (i32, i32) {
    %c0_i32 = arith.constant 0 : i32
    %c0_i32_0 = arith.constant 0 : i32
    %c0_i32_1 = arith.constant 0 : i32
    return %c0_i32, %c0_i32_0 : i32, i32
  }
  func.func @transform_5(%arg0: i32) -> (i32, i32) {
    %c0_i32 = arith.constant 0 : i32
    %c0_i32_0 = arith.constant 0 : i32
    %c0_i32_1 = arith.constant 0 : i32
    return %c0_i32, %c0_i32_0 : i32, i32
  }
  func.func @transform_6(%arg0: i32) -> (i32, i32) {
    %c0_i32 = arith.constant 0 : i32
    %c0_i32_0 = arith.constant 0 : i32
    %c0_i32_1 = arith.constant 0 : i32
    return %c0_i32, %c0_i32_0 : i32, i32
  }
  func.func @transform_7(%arg0: i32) -> (i32, i32) {
    %c0_i32 = arith.constant 0 : i32
    %c0_i32_0 = arith.constant 0 : i32
    %c0_i32_1 = arith.constant 0 : i32
    return %c0_i32, %c0_i32_0 : i32, i32
  }
  func.func @transform_8(%arg0: i32) -> (i32, i32) {
    %c0_i32 = arith.constant 0 : i32
    %c0_i32_0 = arith.constant 0 : i32
    %c0_i32_1 = arith.constant 0 : i32
    return %c0_i32, %c0_i32_0 : i32, i32
  }
  func.func @transform_9(%arg0: i32) -> (i32, i32) {
    %c0_i32 = arith.constant 0 : i32
    %c0_i32_0 = arith.constant 0 : i32
    %c0_i32_1 = arith.constant 0 : i32
    return %c0_i32, %c0_i32_0 : i32, i32
  }
  func.func @transform_10(%arg0: i32) -> (i32, i32) {
    %c0_i32 = arith.constant 0 : i32
    %c0_i32_0 = arith.constant 0 : i32
    return %arg0, %c0_i32 : i32, i32
  }
}

</mosaic_0001>

<bundles_post_ra>
// kernel: tpu_custom_call.1
= control target key start
LH: loop header
LB: loop body
LE: loop exit
PB: predicated region body
PF: predicated region fallthrough
CT: control target
= control target key end

     0   :  { %15 = vsyncpa [#allocation5], 0  ;;  %s5907_s0 = inlined_call_operand.vmem [shape: f32[32,32], index: 0, kind: input, shape index: {}]   ;;  %s5908_s1 = inlined_call_operand.vmem [shape: f32[32,512], index: 1, kind: input, shape index: {}]   ;;  %s5909_s2 = inlined_call_operand.vmem [shape: f32[1,512], index: 2, kind: input, shape index: {}]   ;;  %s5910_s3 = inlined_call_operand.vmem [shape: f32[4,128,64], index: 3, kind: input, shape index: {}]   ;;  %s5911_s4 = inlined_call_operand.vmem [shape: f32[32,64], index: 4, kind: input, shape index: {}]   ;;  %s5912_s5 = inlined_call_operand.vmem [shape: f32[64,32], index: 5, kind: input, shape index: {}]   ;;  %s5913_s6 = inlined_call_operand.vmem [shape: f32[8,48], index: 6, kind: input, shape index: {}]   ;;  %s5914_s7 = inlined_call_operand.vmem [shape: f32[24,8], index: 7, kind: input, shape index: {}]   ;;  %s5915_s8 = inlined_call_operand.vmem [shape: f32[32,256], index: 8, kind: input, shape index: {}]   ;;  %s5916_s9 = inlined_call_operand.vmem [shape: f32[128,32], index: 9, kind: input, shape index: {}]   ;;  %s5917_s10 = inlined_call_operand.hbm [shape: f32[32,32], index: 10, kind: output, shape index: {}]  }
   0x1   :  { %17 = vsyncpa [#allocation5 + $0x1], 0  ;;  %s3150_s13 = smov 0   ;;  %s3152_s14 = smov 0  }
   0x2   :  { %s3154_s15 = smov 0   ;;  %s3156_s16 = smov 0  }
   0x3 LB: > { %s3171_s17 = sadd.s32 4294967295, %s3082_s16   ;;  %s2727_s18 = sadd.s32 4294967294, %s3082_s16   ;;  %s3082_s16 = sphi %s3156_s16, %s6172_s16   ;;  %s3078_s15 = sphi %s3154_s15, %s6171_s15   ;;  %s3074_s14 = sphi %s3152_s14, %s6170_s14   ;;  %s3070_s13 = sphi %s3150_s13, %s6169_s13  }
   0x4   : > { %s3175_s19 = sadd.s32 1, %s3082_s16   ;;  %s245_s20 = sadd.s32 1, %s3078_s15 }
   0x5   : > { %s242_s21 = ssub.s32 %s3082_s16, %s3175_s19  ;;  %p255_p0 = scmp.ne.s32.totalorder %s3078_s15, %s3074_s14 }
   0x6   : > { %p243_p1 = scmp.eq.s32.totalorder %s242_s21, 0  ;;  %p256_p2 = scmp.eq.s32.totalorder %s3171_s17, 1 }
   0x7   : > { %p261_p3 = scmp.ne.s32.totalorder %s3074_s14, %s3070_s13  ;;  %p262_p4 = scmp.eq.s32.totalorder %s2727_s18, 1 }
   0x8   : > { %s3186_s22 = scalar_select %p243_p1, %s3078_s15, %s245_s20  }
   0x9   : > { %p3188_p5 = por %p256_p2, %p255_p0  ;;  %p3192_p6 = por %p262_p4, %p261_p3 }
   0xa   : > { %p2730_p7 = scmp.ge.s32.totalorder %s3082_s16, 1  ;;  %p316_p8 = scmp.lt.s32.totalorder %s3082_s16, 3 }
   0xc   : > { %p317_p9 = pnand %p2730_p7, %p316_p8 }
   0xe   : > { %320 = sbr.rel (%p317_p9) target bundleno = 2269 (0x8dd), region = 60 }
  0x13   : > { %v375_v0 = vld [vmem:[%s5908_s1 + $0x60] sm:$0xff]  ;;  %v376_v1 = vld [vmem:[%s5908_s1 + $0x68] sm:$0xff]  ;;  %v377_v2 = vld [vmem:[%s5908_s1 + $0x70] sm:$0xff]  ;;  %s2732_s11 = sshll.u32 %s3171_s17, 1  ;;  %vm5918_vm0 = vcmask 261120   ;;  %vm554_vm1 = vcmask 523264  }
  0x14   : > { %408 = vmatpush.msra.mxu0 %v375_v0  ;;  %431 = vmatpush.msra.mxu1 %v376_v1  ;;  %v371_v3 = vld [vmem:[%s5908_s1 + $0x40] sm:$0xff]  ;;  %v372_v4 = vld [vmem:[%s5908_s1 + $0x48] sm:$0xff]  ;;  %v373_v5 = vld [vmem:[%s5908_s1 + $0x50] sm:$0xff]  ;;  %p355_p10 = scmp.lt.s32.totalorder %s2732_s11, 3  ;;  %s3085_s30 = smov 104  }
  0x15   : > { %454 = vmatpush.msra.mxu2 %v377_v2  ;;  %v367_v6 = vld [vmem:[%s5908_s1 + $0x20] sm:$0xff]  ;;  %v368_v7 = vld [vmem:[%s5908_s1 + $0x28] sm:$0xff]  ;;  %v369_v8 = vld [vmem:[%s5908_s1 + $0x30] sm:$0xff]  ;;  %s351_s26 = sand.u32 1, %s3074_s14  }
  0x16   : > { %409 = vmatpush.msra.mxu0 %v371_v3  ;;  %432 = vmatpush.msra.mxu1 %v372_v4  ;;  %s6174_s11 = smov (!%p355_p10, %s2732_s11), 3  ;;  %v363_v9 = vld [vmem:[%s5908_s1] sm:$0xff]  ;;  %v364_v10 = vld [vmem:[%s5908_s1 + $0x8] sm:$0xff]  ;;  %v378_v11 = vld [vmem:[%s5908_s1 + $0x78] sm:$0xff]  ;;  %s2731_s27 = sshll.u32 %s351_s26, 4 }
  0x17   : > { %455 = vmatpush.msra.mxu2 %v373_v5  ;;  %v365_v12 = vld [vmem:[%s5908_s1 + $0x10] sm:$0xff]  ;;  %s2733_s12 = sshll.u32 %s6174_s11, 3  ;;  %477 = vmatpush.msra.mxu3 %v378_v11  ;;  %v374_v14 = vld [vmem:[%s5908_s1 + $0x58] sm:$0xff]  ;;  %v528_v21 = vld [vmem:[%s5910_s3 + $0x68] sm:$0xff]  ;;  %s353_s28 = scalar_lea.vmem [#allocation4], %s2731_s27 }
  0x18   : > { %410 = vmatpush.msra.mxu0 %v367_v6  ;;  %433 = vmatpush.msra.mxu1 %v368_v7  ;;  %s3241_s21 = scalar_lea.vmem %s5907_s0, %s2733_s12  ;;  %v530_v15 = vld [vmem:[%s5910_s3 + $0x78] sm:$0xff]  ;;  %v529_v18 = vld [vmem:[%s5910_s3 + $0x70] sm:$0xff]  ;;  %v2757_v22 = vld [vmem:[%s5910_s3 + $0xe8] sm:$0xff]  ;;  %s2829_s11 = sshll.u32 %s3171_s17, 4 }
  0x19   : > { %456 = vmatpush.msra.mxu2 %v369_v8  ;;  %v3244_v13 = vld [vmem:[%s3241_s21] sm:$0xff]  ;;  %v2759_v16 = vld [vmem:[%s5910_s3 + $0xf8] sm:$0xff]  ;;  %478 = vmatpush.msra.mxu3 %v374_v14  ;;  %v2758_v19 = vld [vmem:[%s5910_s3 + $0xf0] sm:$0xff]  ;;  %s2661_s12 = scalar_lea.hbm %s5917_s10, %s2829_s11  ;;  %s2662_s18 = sshll.u32 %s353_s28, 4  ;;  %s2663_s18 = int_to_ptr.vmem [resolvable:$true] %s2662_s18 }
  0x1a   : > { %411 = vmatpush.msra.mxu0 %v363_v9  ;;  %434 = vmatpush.msra.mxu1 %v364_v10  ;;  %v370_v17 = vld [vmem:[%s5908_s1 + $0x38] sm:$0xff]  ;;  %v3280_v23 = vld [vmem:[%s3241_s21 + $0x8] sm:$0xff]  ;;  %v527_v24 = vld [vmem:[%s5910_s3 + $0x60] sm:$0xff]  ;;  %s2664_s20 = sshll.u32 %s2661_s12, 4  ;;  %s2650_s25 = scalar_lea.sflag [#allocation5], %s351_s26  ;;  %s2665_s20 = int_to_ptr.hbm [resolvable:$true] %s2664_s20 }
  0x1b   : > { %457 = vmatpush.msra.mxu2 %v365_v12  ;;  %2734 = vmatmul.msk.f32.vlgmr.msra.gmra.mxu0 %vm5918_vm0, %v3244_v13  ;;  %v366_v20 = vld [vmem:[%s5908_s1 + $0x18] sm:$0xff]  ;;  %v2756_v25 = vld [vmem:[%s5910_s3 + $0xe0] sm:$0xff]  ;;  %v2774_v30 = vld [vmem:[%s5910_s3 + $0x170] sm:$0xff]  ;;  %s3040_s11 = scalar_lea.hbm %s5917_s10, 32 }
  0x1c   : > { %2736 = vmatmul.msk.f32.vlgmr.msra.gmra.mxu1 %vm5918_vm0, %v3244_v13  ;;  %2738 = vmatmul.msk.f32.vlgmr.msra.gmra.mxu2 %vm5918_vm0, %v3244_v13  ;;  %v2775_v26 = vld [vmem:[%s5910_s3 + $0x178] sm:$0xff]  ;;  %v525_v31 = vld [vmem:[%s5910_s3 + $0x50] sm:$0xff]  ;;  %v2773_v34 = vld [vmem:[%s5910_s3 + $0x168] sm:$0xff] }
  0x1d   : > { %531 = vmatpush.msrb.mxu1 %v530_v15  ;;  %576 = vmatpush.msrb.mxu2 %v2759_v16  ;;  %v526_v27 = vld [vmem:[%s5910_s3 + $0x58] sm:$0xff]  ;;  %v490_v32 = vld [vmem:[%s5911_s4 + $0x10] sm:$0xff]  ;;  %v524_v35 = vld [vmem:[%s5910_s3 + $0x48] sm:$0xff] }
  0x1e   : > { %479 = vmatpush.msra.mxu3 %v370_v17  ;;  %v491_v28 = vld [vmem:[%s5911_s4 + $0x18] sm:$0xff]  ;;  %v2754_v33 = vld [vmem:[%s5910_s3 + $0xd0] sm:$0xff]  ;;  %v489_v36 = vld [vmem:[%s5911_s4 + $0x8] sm:$0xff] }
  0x1f   : > { %532 = vmatpush.msrb.mxu1 %v529_v18  ;;  %577 = vmatpush.msrb.mxu2 %v2758_v19  ;;  %v2755_v29 = vld [vmem:[%s5910_s3 + $0xd8] sm:$0xff]  ;;  %v2753_v37 = vld [vmem:[%s5910_s3 + $0xc8] sm:$0xff]  ;;  %v2772_v38 = vld [vmem:[%s5910_s3 + $0x160] sm:$0xff] }
  0x20   : > { %480 = vmatpush.msra.mxu3 %v366_v20  ;;  %504 = vmatpush.msrb.mxu0 %v491_v28  ;;  %v523_v39 = vld [vmem:[%s5910_s3 + $0x40] sm:$0xff]  ;;  %v2771_v42 = vld [vmem:[%s5910_s3 + $0x158] sm:$0xff]  ;;  %v2770_v46 = vld [vmem:[%s5910_s3 + $0x150] sm:$0xff] }
  0x21   : > { %533 = vmatpush.msrb.mxu1 %v528_v21  ;;  %2740 = vmatmul.msk.f32.vlgmr.msra.gmra.mxu3 %vm5918_vm0, %v3244_v13  ;;  %v488_v40 = vld [vmem:[%s5911_s4] sm:$0xff]  ;;  %v522_v43 = vld [vmem:[%s5910_s3 + $0x38] sm:$0xff]  ;;  %v521_v47 = vld [vmem:[%s5910_s3 + $0x30] sm:$0xff] }
  0x22   : > { %578 = vmatpush.msrb.mxu2 %v2757_v22  ;;  %620 = vmatpush.msrb.mxu3 %v2775_v26  ;;  %v2752_v41 = vld [vmem:[%s5910_s3 + $0xc0] sm:$0xff]  ;;  %v2791_v44 = vld [vmem:[%s5910_s3 + $0x1f8] sm:$0xff]  ;;  %v2750_v48 = vld [vmem:[%s5910_s3 + $0xb0] sm:$0xff] }
  0x23   : > { %2735 = vmatmul.msk.f32.gmra.mxu0 %vm5918_vm0, %v3280_v23  ;;  %534 = vmatpush.msrb.mxu1 %v527_v24  ;;  %v2751_v45 = vld [vmem:[%s5910_s3 + $0xb8] sm:$0xff]  ;;  %v2769_v49 = vld [vmem:[%s5910_s3 + $0x148] sm:$0xff]  ;;  %v2790_v51 = vld [vmem:[%s5910_s3 + $0x1f0] sm:$0xff] }
  0x24   : > { %2737 = vmatmul.msk.f32.gmra.mxu1 %vm5918_vm0, %v3280_v23  ;;  %2739 = vmatmul.msk.f32.gmra.mxu2 %vm5918_vm0, %v3280_v23  ;;  %v520_v50 = vld [vmem:[%s5910_s3 + $0x28] sm:$0xff]  ;;  %v2768_v53 = vld [vmem:[%s5910_s3 + $0x140] sm:$0xff]  ;;  %v2767_v57 = vld [vmem:[%s5910_s3 + $0x138] sm:$0xff] }
  0x25   : > { %579 = vmatpush.msrb.mxu2 %v2756_v25  ;;  %535 = vmatpush.msrb.mxu1 %v526_v27  ;;  %v2749_v52 = vld [vmem:[%s5910_s3 + $0xa8] sm:$0xff]  ;;  %v519_v54 = vld [vmem:[%s5910_s3 + $0x20] sm:$0xff]  ;;  %v518_v58 = vld [vmem:[%s5910_s3 + $0x18] sm:$0xff] }
  0x26   : > { %621 = vmatpush.msrb.mxu3 %v2774_v30  ;;  %505 = vmatpush.msrb.mxu0 %v490_v32  ;;  %v2789_v55 = vld [vmem:[%s5910_s3 + $0x1e8] sm:$0xff]  ;;  %v2748_v56 = vld [vmem:[%s5910_s3 + $0xa0] sm:$0xff]  ;;  %v2747_v59 = vld [vmem:[%s5910_s3 + $0x98] sm:$0xff] }
  0x27   : > { %580 = vmatpush.msrb.mxu2 %v2755_v29  ;;  %536 = vmatpush.msrb.mxu1 %v525_v31  ;;  %v2766_v60 = vld [vmem:[%s5910_s3 + $0x130] sm:$0xff]  ;;  %v2765_v63 = vld [vmem:[%s5910_s3 + $0x128] sm:$0xff]  ;;  %v2764_v2 = vld [vmem:[%s5910_s3 + $0x120] sm:$0xff] }
  0x28   : > { %622 = vmatpush.msrb.mxu3 %v2773_v34  ;;  %506 = vmatpush.msrb.mxu0 %v489_v36  ;;  %v517_v61 = vld [vmem:[%s5910_s3 + $0x10] sm:$0xff]  ;;  %v516_v0 = vld [vmem:[%s5910_s3 + $0x8] sm:$0xff]  ;;  %v2788_v3 = vld [vmem:[%s5910_s3 + $0x1e0] sm:$0xff] }
  0x29   : > { %581 = vmatpush.msrb.mxu2 %v2754_v33  ;;  %537 = vmatpush.msrb.mxu1 %v524_v35  ;;  %v2746_v62 = vld [vmem:[%s5910_s3 + $0x90] sm:$0xff]  ;;  %v2745_v1 = vld [vmem:[%s5910_s3 + $0x88] sm:$0xff]  ;;  %v515_v4 = vld [vmem:[%s5910_s3] sm:$0xff] }
  0x2a   : > { %623 = vmatpush.msrb.mxu3 %v2772_v38  ;;  %507 = vmatpush.msrb.mxu0 %v488_v40  ;;  %v2744_v5 = vld [vmem:[%s5910_s3 + $0x80] sm:$0xff]  ;;  %v2763_v6 = vld [vmem:[%s5910_s3 + $0x118] sm:$0xff]  ;;  %v2762_v8 = vld [vmem:[%s5910_s3 + $0x110] sm:$0xff] }
  0x2b   : > { %582 = vmatpush.msrb.mxu2 %v2753_v37  ;;  %538 = vmatpush.msrb.mxu1 %v523_v39  ;;  %v2787_v7 = vld [vmem:[%s5910_s3 + $0x1d8] sm:$0xff]  ;;  %v2786_v9 = vld [vmem:[%s5910_s3 + $0x1d0] sm:$0xff]  ;;  %v2761_v10 = vld [vmem:[%s5910_s3 + $0x108] sm:$0xff] }
  0x2c   : > { %624 = vmatpush.msrb.mxu3 %v2771_v42  ;;  %664 = vmatpush.msra.mxu0 %v2791_v44  ;;  %v2785_v11 = vld [vmem:[%s5910_s3 + $0x1c8] sm:$0xff]  ;;  %v2760_v12 = vld [vmem:[%s5910_s3 + $0x100] sm:$0xff]  ;;  %v2783_v14 = vld [vmem:[%s5910_s3 + $0x1b8] sm:$0xff] }
  0x2d   : > { %583 = vmatpush.msrb.mxu2 %v2752_v41  ;;  %539 = vmatpush.msrb.mxu1 %v522_v43  ;;  %v2782_v15 = vld [vmem:[%s5910_s3 + $0x1b0] sm:$0xff]  ;;  %v2781_v16 = vld [vmem:[%s5910_s3 + $0x1a8] sm:$0xff]  ;;  %v2780_v17 = vld [vmem:[%s5910_s3 + $0x1a0] sm:$0xff] }
  0x2e   : > { %625 = vmatpush.msrb.mxu3 %v2770_v46  ;;  %665 = vmatpush.msra.mxu0 %v2790_v51  ;;  %v2779_v18 = vld [vmem:[%s5910_s3 + $0x198] sm:$0xff]  ;;  %v2778_v19 = vld [vmem:[%s5910_s3 + $0x190] sm:$0xff]  ;;  %v2777_v20 = vld [vmem:[%s5910_s3 + $0x188] sm:$0xff]  ;;  %v5925_v46 = vmov 0  }
  0x2f   : > { %584 = vmatpush.msrb.mxu2 %v2751_v45  ;;  %540 = vmatpush.msrb.mxu1 %v521_v47  ;;  %v2776_v21 = vld [vmem:[%s5910_s3 + $0x180] sm:$0xff] }
  0x30   : > { %2741 = vmatmul.msk.f32.gmra.mxu3 %vm5918_vm0, %v3280_v23  ;;  %666 = vmatpush.msra.mxu0 %v2789_v55  ;;  %v379_v22 = vld [vmem:[%s5909_s2] sm:$0xf] }
  0x31   : > { %585 = vmatpush.msrb.mxu2 %v2750_v48  ;;  %626 = vmatpush.msrb.mxu3 %v2769_v49  ;;  %v382_v24 = vperm.slane %v379_v22, 1  ;;  %v383_v29 = vperm.slane %v379_v22, 2  ;;  %v384_v36 = vperm.slane %v379_v22, 3 }
  0x32   : > { %541 = vmatpush.msrb.mxu1 %v520_v50  ;;  %2742 = vmatmul.msk.f32.vlgmr.msrb.gmra.mxu0 %vm5918_vm0, %v3244_v13  ;;  %v2784_v13 = vld [vmem:[%s5910_s3 + $0x1c0] sm:$0xff] }
  0x33   : > { %586 = vmatpush.msrb.mxu2 %v2749_v52  ;;  %627 = vmatpush.msrb.mxu3 %v2768_v53 }
  0x34   : > { %542 = vmatpush.msrb.mxu1 %v519_v54  ;;  %667 = vmatpush.msra.mxu0 %v2788_v3 }
  0x35   : > { %587 = vmatpush.msrb.mxu2 %v2748_v56  ;;  %628 = vmatpush.msrb.mxu3 %v2767_v57 }
  0x36   : > { %543 = vmatpush.msrb.mxu1 %v518_v58  ;;  %668 = vmatpush.msra.mxu0 %v2787_v7 }
  0x37   : > { %588 = vmatpush.msrb.mxu2 %v2747_v59  ;;  %629 = vmatpush.msrb.mxu3 %v2766_v60 }
  0x38   : > { %544 = vmatpush.msrb.mxu1 %v517_v61  ;;  %669 = vmatpush.msra.mxu0 %v2786_v9 }
  0x39   : > { %589 = vmatpush.msrb.mxu2 %v2746_v62  ;;  %630 = vmatpush.msrb.mxu3 %v2765_v63 }
  0x3a   : > { %2743 = vmatmul.msk.f32.gmra.mxu0 %vm5918_vm0, %v3280_v23  ;;  %545 = vmatpush.msrb.mxu1 %v516_v0  ;;  %v381_v23 = vperm.slane %v379_v22, 0 }
  0x3b   : > { %590 = vmatpush.msrb.mxu2 %v2745_v1  ;;  %631 = vmatpush.msrb.mxu3 %v2764_v2 }
  0x3c   : > { %546 = vmatpush.msrb.mxu1 %v515_v4  ;;  %670 = vmatpush.msra.mxu0 %v2785_v11 }
  0x3d   : > { %591 = vmatpush.msrb.mxu2 %v2744_v5  ;;  %632 = vmatpush.msrb.mxu3 %v2763_v6 }
  0x3e   : > { %671 = vmatpush.msra.mxu0 %v2784_v13  ;;  %2884 = vset.pattern.permute.xlu1 %v5925_v46 }
  0x3f   : > { %633 = vmatpush.msrb.mxu3 %v2762_v8 }
  0x40   : > { %672 = vmatpush.msra.mxu0 %v2783_v14 }
  0x41   : > { %634 = vmatpush.msrb.mxu3 %v2761_v10 }
  0x42   : > { %673 = vmatpush.msra.mxu0 %v2782_v15 }
  0x43   : > { %635 = vmatpush.msrb.mxu3 %v2760_v12 }
  0x44   : > { %674 = vmatpush.msra.mxu0 %v2781_v16 }
  0x46   : > { %675 = vmatpush.msra.mxu0 %v2780_v17 }
  0x48   : > { %676 = vmatpush.msra.mxu0 %v2779_v18 }
  0x4a   : > { %677 = vmatpush.msra.mxu0 %v2778_v19 }
  0x4c   : > { %678 = vmatpush.msra.mxu0 %v2777_v20 }
  0x4e   : > { %679 = vmatpush.msra.mxu0 %v2776_v21 }
  0x98   : > { %v413_v25 = vpop.f32.mrf.mxu0 }
  0x99   : > { %v414_v26 = vadd.f32 %v413_v25, %v381_v23  ;;  %v436_v27 = vpop.f32.mrf.mxu1 }
  0x9a   : > { %v437_v28 = vadd.f32 %v436_v27, %v382_v24 }
  0x9b   : > { %547 = vmatmul.f32.vlgmr.msrb.gmra.mxu1 %v414_v26 }
  0x9c   : > { %592 = vmatmul.f32.vlgmr.msrb.gmra.mxu2 %v437_v28 }
  0x9f   : > { %v459_v30 = vpop.f32.mrf.mxu2 }
  0xa0   : > { %v460_v31 = vadd.f32 %v459_v30, %v383_v29  ;;  %v416_v32 = vpop.f32.mrf.mxu0 }
  0xa1   : > { %v417_v33 = vadd.f32 %v416_v32, %v381_v23  ;;  %v439_v34 = vpop.f32.mrf.mxu1 }
  0xa2   : > { %v440_v35 = vadd.f32 %v439_v34, %v382_v24  ;;  %636 = vmatmul.f32.vlgmr.msrb.gmra.mxu3 %v460_v31 }
  0xa3   : > { %550 = vmatmul.f32.gmra.mxu1 %v417_v33 }
  0xa4   : > { %595 = vmatmul.f32.gmra.mxu2 %v440_v35  ;;  %v482_v37 = vpop.f32.mrf.mxu3 }
  0xa5   : > { %v483_v38 = vadd.f32 %v482_v37, %v384_v36 }
  0xa7   : > { %v462_v39 = vpop.f32.mrf.mxu2  ;;  %680 = vmatmul.f32.vlgmr.msra.gmra.mxu0 %v483_v38 }
  0xa8   : > { %v463_v40 = vadd.f32 %v462_v39, %v383_v29 }
  0xaa   : > { %639 = vmatmul.f32.gmra.mxu3 %v463_v40 }
  0xaf   : > { %v509_v43 = vpop.f32.mrf.mxu0 }
  0xb0   : > { %557 = vst.msk [vmem:[#allocation3] sm:$0xff] %vm554_vm1, %v509_v43 }
  0xb1   : > { %601 = vst.msk [vmem:[#allocation3 + $0x10] sm:$0xff] %vm554_vm1, %v509_v43 }
  0xb2   : > { %645 = vst.msk [vmem:[#allocation3 + $0x20] sm:$0xff] %vm554_vm1, %v509_v43 }
  0xb3   : > { %v485_v41 = vpop.f32.mrf.mxu3  ;;  %689 = vst.msk [vmem:[#allocation3 + $0x30] sm:$0xff] %vm554_vm1, %v509_v43 }
  0xb4   : > { %v486_v42 = vadd.f32 %v485_v41, %v384_v36 }
  0xb6   : > { %683 = vmatmul.f32.gmra.mxu0 %v486_v42 }
  0xb7   : > { %v512_v44 = vpop.f32.mrf.mxu0 }
  0xb8   : > { %558 = vst.msk [vmem:[#allocation3 + $0x8] sm:$0xff] %vm554_vm1, %v512_v44 }
  0xb9   : > { %602 = vst.msk [vmem:[#allocation3 + $0x18] sm:$0xff] %vm554_vm1, %v512_v44 }
  0xba   : > { %646 = vst.msk [vmem:[#allocation3 + $0x28] sm:$0xff] %vm554_vm1, %v512_v44 }
  0xbb   : > { %690 = vst.msk [vmem:[#allocation3 + $0x38] sm:$0xff] %vm554_vm1, %v512_v44 }
 0x118   : > { %v548_v45 = vpop.f32.mrf.mxu1 }
 0x119   : > { %555 = vst.msk [vmem:[#allocation2] sm:$0xff] %vm554_vm1, %v548_v45 }
 0x11f   : > { %v593_v47 = vpop.f32.mrf.mxu2 }
 0x120   : > { %599 = vst.msk [vmem:[#allocation2 + $0x10] sm:$0xff] %vm554_vm1, %v593_v47  ;;  %v551_v48 = vpop.f32.mrf.mxu1  ;;  %v3496_v49 = vld [vmem:[#allocation2] sm:$0xff] }
 0x121   : > { %556 = vst.msk [vmem:[#allocation2 + $0x8] sm:$0xff] %vm554_vm1, %v551_v48  ;;  %v709_v50 = vsel %vm554_vm1, %v3496_v49, -inf }
 0x122   : > { %710 = vmax.xlane.f32.xlu0 %v709_v50 }
 0x124   : > { %v681_v52 = vpop.f32.mrf.mxu0 }
 0x125   : > { %v637_v51 = vpop.f32.mrf.mxu3  ;;  %687 = vst.msk [vmem:[#allocation2 + $0x30] sm:$0xff] %vm554_vm1, %v681_v52 }
 0x126   : > { %643 = vst.msk [vmem:[#allocation2 + $0x20] sm:$0xff] %vm554_vm1, %v637_v51 }
 0x127   : > { %v596_v53 = vpop.f32.mrf.mxu2  ;;  %v3502_v54 = vld [vmem:[#allocation2 + $0x10] sm:$0xff] }
 0x128   : > { %600 = vst.msk [vmem:[#allocation2 + $0x18] sm:$0xff] %vm554_vm1, %v596_v53  ;;  %v715_v55 = vsel %vm554_vm1, %v3502_v54, -inf  ;;  %v3508_v56 = vld [vmem:[#allocation2 + $0x8] sm:$0xff] }
 0x129   : > { %716 = vmax.xlane.f32.xlu1 %v715_v55  ;;  %v712_v57 = vsel %vm554_vm1, %v3508_v56, -inf }
 0x12a   : > { %713 = vmax.xlane.f32.xlu0 %v712_v57 }
 0x12c   : > { %v3521_v63 = vld [vmem:[#allocation2 + $0x30] sm:$0xff] }
 0x12d   : > { %v640_v58 = vpop.f32.mrf.mxu3  ;;  %v3512_v59 = vld [vmem:[#allocation2 + $0x20] sm:$0xff]  ;;  %v727_v2 = vsel %vm554_vm1, %v3521_v63, -inf }
 0x12e   : > { %644 = vst.msk [vmem:[#allocation2 + $0x28] sm:$0xff] %vm554_vm1, %v640_v58  ;;  %v721_v60 = vsel %vm554_vm1, %v3512_v59, -inf }
 0x12f   : > { %722 = vmax.xlane.f32.xlu2 %v721_v60  ;;  %v3517_v61 = vld [vmem:[#allocation2 + $0x18] sm:$0xff] }
 0x130   : > { %v718_v62 = vsel %vm554_vm1, %v3517_v61, -inf }
 0x131   : > { %719 = vmax.xlane.f32.xlu1 %v718_v62 }
 0x133   : > { %v684_v3 = vpop.f32.mrf.mxu0 }
 0x134   : > { %688 = vst.msk [vmem:[#allocation2 + $0x38] sm:$0xff] %vm554_vm1, %v684_v3 }
 0x135   : > { %v3523_v0 = vld [vmem:[#allocation2 + $0x28] sm:$0xff] }
 0x136   : > { %v724_v1 = vsel %vm554_vm1, %v3523_v0, -inf }
 0x137   : > { %725 = vmax.xlane.f32.xlu2 %v724_v1 }
 0x139   : > { %728 = vmax.xlane.f32.xlu1 %v727_v2 }
 0x13b   : > { %v3542_v7 = vld [vmem:[#allocation2 + $0x38] sm:$0xff] }
 0x13c   : > { %v730_v11 = vsel %vm554_vm1, %v3542_v7, -inf }
 0x195   : > { %v3530_v4 = vpop.xlane.xlu0 %710 }
 0x196   : > { %5997 = vst [vmem:[#allocation7_spill] sm:$0xff] %v3530_v4  ;;  %vm733_vm2 = vcmp.eq.f32.partialorder %v3496_v49, %v3530_v4 }
 0x197   : > { %v3538_v5 = vsel %vm733_vm2, -inf, %v3496_v49  ;;  %v790_v28 = vsel %vm733_vm2, 1, %v5925_v46  ;;  %v3906_v49 = vld [vmem:[#allocation3 + $0x28] sm:$0xff] }
 0x198   : > { %v806_v6 = vsel %vm554_vm1, %v3538_v5, -inf }
 0x199   : > { %807 = vmax.xlane.f32.xlu0 %v806_v6 }
 0x19c   : > { %v3544_v8 = vpop.xlane.xlu1 %716 }
 0x19d   : > { %5998 = vst [vmem:[#allocation8_spill] sm:$0xff] %v3544_v8  ;;  %vm735_vm3 = vcmp.eq.f32.partialorder %v3502_v54, %v3544_v8  ;;  %v3548_v9 = vpop.xlane.xlu0 %713 }
 0x19e   : > { %5999 = vst [vmem:[#allocation9_spill] sm:$0xff] %v3548_v9  ;;  %vm734_vm4 = vcmp.eq.f32.partialorder %v3508_v56, %v3548_v9  ;;  %v3556_v10 = vsel %vm735_vm3, -inf, %v3502_v54  ;;  %v792_v33 = vsel %vm735_vm3, 1, %v5925_v46 }
 0x19f   : > { %v812_v12 = vsel %vm554_vm1, %v3556_v10, -inf  ;;  %v3566_v13 = vsel %vm734_vm4, -inf, %v3508_v56  ;;  %v791_v36 = vsel %vm734_vm4, 1, %v5925_v46 }
 0x1a0   : > { %813 = vmax.xlane.f32.xlu1 %v812_v12  ;;  %v809_v14 = vsel %vm554_vm1, %v3566_v13, -inf }
 0x1a1   : > { %731 = vmax.xlane.f32.xlu0 %v730_v11  ;;  %810 = vmax.xlane.f32.xlu2 %v809_v14 }
 0x1a2   : > { %v3570_v15 = vpop.xlane.xlu2 %722 }
 0x1a3   : > { %6000 = vst [vmem:[#allocation10_spill] sm:$0xff] %v3570_v15  ;;  %vm737_vm5 = vcmp.eq.f32.partialorder %v3512_v59, %v3570_v15 }
 0x1a4   : > { %v3574_v16 = vpop.xlane.xlu1 %719  ;;  %v3582_v17 = vsel %vm737_vm5, -inf, %v3512_v59  ;;  %v794_v48 = vsel %vm737_vm5, 1, %v5925_v46 }
 0x1a5   : > { %6001 = vst [vmem:[#allocation11_spill] sm:$0xff] %v3574_v16  ;;  %vm736_vm6 = vcmp.eq.f32.partialorder %v3517_v61, %v3574_v16  ;;  %v818_v19 = vsel %vm554_vm1, %v3582_v17, -inf }
 0x1a6   : > { %v3588_v18 = vsel %vm736_vm6, -inf, %v3517_v61  ;;  %v793_v50 = vsel %vm736_vm6, 1, %v5925_v46 }
 0x1a7   : > { %v815_v20 = vsel %vm554_vm1, %v3588_v18, -inf }
 0x1a9   : > { %819 = vmax.xlane.f32.xlu0 %v818_v19  ;;  %816 = vmax.xlane.f32.xlu2 %v815_v20  ;;  %v3763_v20 = vld [vmem:[#allocation3 + $0x8] sm:$0xff] }
 0x1aa   : > { %v3594_v21 = vpop.xlane.xlu2 %725 }
 0x1ab   : > { %6002 = vst [vmem:[#allocation12_spill] sm:$0xff] %v3594_v21  ;;  %vm738_vm7 = vcmp.eq.f32.partialorder %v3523_v0, %v3594_v21 }
 0x1ac   : > { %v3598_v22 = vpop.xlane.xlu1 %728  ;;  %v3604_v23 = vsel %vm738_vm7, -inf, %v3523_v0  ;;  %v795_v62 = vsel %vm738_vm7, 1, %v5925_v46 }
 0x1ad   : > { %vm739_vm8 = vcmp.eq.f32.partialorder %v3521_v63, %v3598_v22  ;;  %v821_v24 = vsel %vm554_vm1, %v3604_v23, -inf }
 0x1ae   : > { %822 = vmax.xlane.f32.xlu1 %v821_v24  ;;  %v3614_v25 = vsel %vm739_vm8, -inf, %v3521_v63  ;;  %v796_v11 = vsel %vm739_vm8, 1, %v5925_v46  ;;  %v742_v24 = vsel %vm734_vm4, %v3763_v20, 0.0 }
 0x1af   : > { %v824_v26 = vsel %vm554_vm1, %v3614_v25, -inf }
 0x1b1   : > { %825 = vmax.xlane.f32.xlu0 %v824_v26  ;;  %v752_v26 = vsel %vm554_vm1, %v742_v24, 0.0 }
 0x20c   : > { %v3618_v27 = vpop.xlane.xlu0 %807 }
 0x20d   : > { %6003 = vst [vmem:[#allocation13_spill] sm:$0xff] %v3618_v27  ;;  %vm830_vm9 = vcmp.eq.f32.partialorder %v3538_v5, %v3618_v27 }
 0x20e   : > { %v887_v29 = vsel %vm830_vm9, 2, %v790_v28  ;;  %v3633_v30 = vsel %vm830_vm9, -inf, %v3538_v5 }
 0x20f   : > { %v903_v31 = vsel %vm554_vm1, %v3633_v30, -inf }
 0x210   : > { %904 = vmax.xlane.f32.xlu2 %v903_v31 }
 0x213   : > { %v3637_v32 = vpop.xlane.xlu1 %813 }
 0x214   : > { %6004 = vst [vmem:[#allocation14_spill] sm:$0xff] %v3637_v32  ;;  %vm832_vm10 = vcmp.eq.f32.partialorder %v3556_v10, %v3637_v32  ;;  %v3645_v34 = vpop.xlane.xlu2 %810  ;;  %v3647_v35 = vpop.xlane.xlu0 %731 }
 0x215   : > { %6005 = vst [vmem:[#allocation15_spill] sm:$0xff] %v3645_v34  ;;  %v889_v37 = vsel %vm832_vm10, 2, %v792_v33  ;;  %vm831_vm11 = vcmp.eq.f32.partialorder %v3566_v13, %v3645_v34  ;;  %vm740_vm12 = vcmp.eq.f32.partialorder %v3542_v7, %v3647_v35  ;;  %v3667_v39 = vsel %vm832_vm10, -inf, %v3556_v10 }
 0x216   : > { %6006 = vst [vmem:[#allocation16_spill] sm:$0xff] %v3647_v35  ;;  %v888_v38 = vsel %vm831_vm11, 2, %v791_v36  ;;  %v909_v40 = vsel %vm554_vm1, %v3667_v39, -inf  ;;  %v3675_v41 = vsel %vm831_vm11, -inf, %v3566_v13  ;;  %v3681_v42 = vsel %vm740_vm12, -inf, %v3542_v7 }
 0x217   : > { %910 = vmax.xlane.f32.xlu0 %v909_v40  ;;  %v906_v43 = vsel %vm554_vm1, %v3675_v41, -inf  ;;  %v827_v44 = vsel %vm554_vm1, %v3681_v42, -inf  ;;  %v797_v40 = vsel %vm740_vm12, 1, %v5925_v46 }
 0x218   : > { %907 = vmax.xlane.f32.xlu1 %v906_v43  ;;  %828 = vmax.xlane.f32.xlu2 %v827_v44 }
 0x21c   : > { %v3687_v45 = vpop.xlane.xlu2 %816  ;;  %v3689_v47 = vpop.xlane.xlu0 %819 }
 0x21d   : > { %6007 = vst [vmem:[#allocation17_spill] sm:$0xff] %v3687_v45  ;;  %vm833_vm13 = vcmp.eq.f32.partialorder %v3588_v18, %v3687_v45  ;;  %vm5920_vm14 = vcmp.eq.f32.partialorder %v3582_v17, %v3689_v47 }
 0x21e   : > { %6008 = vst [vmem:[#allocation18_spill] sm:$0xff] %v3689_v47  ;;  %v890_v51 = vsel %vm833_vm13, 2, %v793_v50  ;;  %v891_v52 = vsel %vm5920_vm14, 2, %v794_v48  ;;  %v3713_v53 = vsel %vm833_vm13, -inf, %v3588_v18  ;;  %v3719_v55 = vsel %vm5920_vm14, -inf, %v3582_v17 }
 0x21f   : > { %v912_v57 = vsel %vm554_vm1, %v3713_v53, -inf  ;;  %v915_v58 = vsel %vm554_vm1, %v3719_v55, -inf }
 0x220   : > { %913 = vmax.xlane.f32.xlu1 %v912_v57  ;;  %916 = vmax.xlane.f32.xlu2 %v915_v58 }
 0x221   : > { %v3725_v60 = vpop.xlane.xlu1 %822 }
 0x222   : > { %6009 = vst [vmem:[#allocation19_spill] sm:$0xff] %v3725_v60  ;;  %vm5921_vm15 = vcmp.eq.f32.partialorder %v3604_v23, %v3725_v60 }
 0x223   : > { %v892_v1 = vsel %vm5921_vm15, 2, %v795_v62  ;;  %v3740_v2 = vsel %vm5921_vm15, -inf, %v3604_v23 }
 0x224   : > { %v918_v3 = vsel %vm554_vm1, %v3740_v2, -inf  ;;  %v3744_v6 = vpop.xlane.xlu0 %825 }
 0x225   : > { %919 = vmax.xlane.f32.xlu0 %v918_v3  ;;  %vm5919_vm0 = vcmp.eq.f32.partialorder %v3614_v25, %v3744_v6 }
 0x226   : > { %v893_v12 = vsel %vm5919_vm0, 2, %v796_v11  ;;  %v3759_v14 = vsel %vm5919_vm0, -inf, %v3614_v25  ;;  %v3838_v11 = vld [vmem:[#allocation3 + $0x18] sm:$0xff] }
 0x227   : > { %6010 = vst [vmem:[#allocation20_spill] sm:$0xff] %v3759_v14  ;;  %v921_v19 = vsel %vm554_vm1, %v3759_v14, -inf }
 0x228   : > { %922 = vmax.xlane.f32.xlu2 %v921_v19  ;;  %v744_v19 = vsel %vm736_vm6, %v3838_v11, 0.0 }
 0x22d   : > { %753 = vadd.xlane.f32.xlu0 %v752_v26 }
 0x283   : > { %v3770_v28 = vpop.xlane.xlu2 %904 }
 0x284   : > { %6011 = vst [vmem:[#allocation21_spill] sm:$0xff] %v3770_v28  ;;  %vm5924_vm0 = vcmp.eq.f32.partialorder %v3633_v30, %v3770_v28 }
 0x285   : > { %v3777_v31 = vsel %vm5924_vm0, 3, %v887_v29  ;;  %v3852_v24 = vsel %vm5924_vm0, -inf, %v3633_v30 }
 0x286   : > { %v1000_v61 = vsel %vm554_vm1, %v3852_v24, -inf }
 0x28a   : > { %v3779_v33 = vpop.xlane.xlu0 %910 }
 0x28b   : > { %6012 = vst [vmem:[#allocation22_spill] sm:$0xff] %v3779_v33  ;;  %vm5922_vm14 = vcmp.eq.f32.partialorder %v3667_v39, %v3779_v33  ;;  %v3783_v56 = vpop.xlane.xlu1 %907  ;;  %v3785_v36 = vpop.xlane.xlu2 %828 }
 0x28c   : > { %6013 = vst [vmem:[#allocation23_spill] sm:$0xff] %v3783_v56  ;;  %v3794_v43 = vsel %vm5922_vm14, 3, %v889_v37  ;;  %vm928_vm4 = vcmp.eq.f32.partialorder %v3675_v41, %v3783_v56  ;;  %vm5923_vm15 = vcmp.eq.f32.partialorder %v3681_v42, %v3785_v36  ;;  %v3814_v37 = vsel %vm5922_vm14, -inf, %v3667_v39 }
 0x28d   : > { %6014 = vst [vmem:[#allocation24_spill] sm:$0xff] %v3785_v36  ;;  %v3803_v29 = vsel %vm928_vm4, 3, %v888_v38  ;;  %v3808_v44 = vsel %vm5923_vm15, 2, %v797_v40  ;;  %v1006_v48 = vsel %vm554_vm1, %v3814_v37, -inf  ;;  %v3822_v38 = vsel %vm928_vm4, -inf, %v3675_v41 }
 0x28e   : > { %6015 = vst [vmem:[#allocation25_spill] sm:$0xff] %v3814_v37  ;;  %v3828_v50 = vsel %vm5923_vm15, -inf, %v3681_v42  ;;  %1007 = vmax.xlane.f32.xlu2 %v1006_v48  ;;  %v1003_v57 = vsel %vm554_vm1, %v3822_v38, -inf  ;;  %v758_v48 = vsel %vm554_vm1, %v744_v19, 0.0 }
 0x28f   : > { %6016 = vst [vmem:[#allocation26_spill] sm:$0xff] %v3822_v38  ;;  %v924_v58 = vsel %vm554_vm1, %v3828_v50, -inf  ;;  %1004 = vmax.xlane.f32.xlu0 %v1003_v57 }
 0x290   : > { %925 = vmax.xlane.f32.xlu1 %v924_v58 }
 0x293   : > { %v3834_v62 = vpop.xlane.xlu1 %913  ;;  %v3836_v3 = vpop.xlane.xlu2 %916 }
 0x294   : > { %6017 = vst [vmem:[#allocation27_spill] sm:$0xff] %v3834_v62  ;;  %vm930_vm14 = vcmp.eq.f32.partialorder %v3713_v53, %v3834_v62  ;;  %vm931_vm15 = vcmp.eq.f32.partialorder %v3719_v55, %v3836_v3 }
 0x295   : > { %6018 = vst [vmem:[#allocation28_spill] sm:$0xff] %v3836_v3  ;;  %v3857_v26 = vsel %vm930_vm14, 3, %v890_v51  ;;  %v3862_v40 = vsel %vm931_vm15, 3, %v891_v52  ;;  %v3878_v52 = vld [vmem:[#allocation3] sm:$0xff]  ;;  %v3886_v19 = vsel %vm930_vm14, -inf, %v3713_v53 }
 0x296   : > { %v1009_v9 = vsel %vm554_vm1, %v3886_v19, -inf  ;;  %v838_v63 = vsel %vm830_vm9, %v3878_v52, 0.0  ;;  %vm6034_vm9 = vcmp.eq.f32.partialorder %v3604_v23, %v3725_v60 }
 0x297   : > { %759 = vadd.xlane.f32.xlu0 %v758_v48  ;;  %v741_v48 = vsel %vm733_vm2, %v3878_v52, 0.0 }
 0x298   : > { %v3867_v57 = vpop.xlane.xlu0 %919  ;;  %1001 = vmax.xlane.f32.xlu1 %v1000_v61  ;;  %v749_v16 = vsel %vm554_vm1, %v741_v48, 0.0 }
 0x299   : > { %6019 = vst [vmem:[#allocation29_spill] sm:$0xff] %v3867_v57  ;;  %vm932_vm6 = vcmp.eq.f32.partialorder %v3740_v2, %v3867_v57 }
 0x29a   : > { %v3874_v51 = vsel %vm932_vm6, 3, %v892_v1  ;;  %v3914_v4 = vsel %vm932_vm6, -inf, %v3740_v2 }
 0x29b   : > { %v3876_v58 = vpop.xlane.xlu2 %922 }
 0x29c   : > { %6020 = vst [vmem:[#allocation30_spill] sm:$0xff] %v3876_v58  ;;  %vm933_vm0 = vcmp.eq.f32.partialorder %v3759_v14, %v3876_v58  ;;  %v746_v58 = vsel %vm738_vm7, %v3906_v49, 0.0 }
 0x29d   : > { %v990_v1 = vsel %vm933_vm0, 3, %v893_v12  ;;  %v3899_v61 = vsel %vm933_vm0, -inf, %v3759_v14  ;;  %v3908_v12 = vld [vmem:[#allocation3 + $0x10] sm:$0xff]  ;;  %v3928_v14 = vld [vmem:[#allocation3 + $0x20] sm:$0xff] }
 0x29e   : > { %6021 = vst [vmem:[#allocation31_spill] sm:$0xff] %v3899_v61  ;;  %v1018_v46 = vsel %vm554_vm1, %v3899_v61, -inf  ;;  %v745_v0 = vsel %vm737_vm5, %v3928_v14, 0.0 }
 0x29f   : > { %1019 = vmax.xlane.f32.xlu2 %v1018_v46  ;;  %1010 = vmax.xlane.f32.xlu0 %v1009_v9  ;;  %v743_v46 = vsel %vm735_vm3, %v3908_v12, 0.0  ;;  %v1015_v9 = vsel %vm554_vm1, %v3914_v4, -inf  ;;  %v761_v54 = vsel %vm554_vm1, %v745_v0, 0.0 }
 0x2a0   : > { %750 = vadd.xlane.f32.xlu1 %v749_v16  ;;  %v764_v16 = vsel %vm554_vm1, %v746_v58, 0.0  ;;  %v755_v48 = vsel %vm554_vm1, %v743_v46, 0.0  ;;  %v3939_v58 = vsel %vm931_vm15, -inf, %v3719_v55 }
 0x2a1   : > { %v1012_v46 = vsel %vm554_vm1, %v3939_v58, -inf }
 0x2a7   : > { %1016 = vmax.xlane.f32.xlu2 %v1015_v9  ;;  %765 = vadd.xlane.f32.xlu0 %v764_v16  ;;  %v3943_v9 = vpop.xlane.xlu0 %753 }
 0x2a8   : > { %756 = vadd.xlane.f32.xlu1 %v755_v48  ;;  %6022 = vst [vmem:[#allocation32_spill] sm:$0xff] %v3943_v9  ;;  %v839_v9 = vsel %vm831_vm11, %v3763_v20, 0.0 }
 0x2b0   : > { %762 = vadd.xlane.f32.xlu1 %v761_v54 }
 0x2b8   : > { %1013 = vmax.xlane.f32.xlu1 %v1012_v46 }
 0x301   : > { %v3945_v16 = vpop.xlane.xlu2 %1007 }
 0x302   : > { %6023 = vst [vmem:[#allocation33_spill] sm:$0xff] %v3945_v16  ;;  %vm5940_vm2 = vcmp.eq.f32.partialorder %v3814_v37, %v3945_v16  ;;  %v3951_v48 = vpop.xlane.xlu0 %1004 }
 0x303   : > { %v3949_v59 = vpop.xlane.xlu1 %925  ;;  %6024 = vst [vmem:[#allocation34_spill] sm:$0xff] %v3951_v48  ;;  %v3957_v0 = vsel %vm5940_vm2, 4, %v3794_v43  ;;  %vm1025_vm5 = vcmp.eq.f32.partialorder %v3822_v38, %v3951_v48  ;;  %v3979_v43 = vsel %vm5940_vm2, -inf, %v3814_v37  ;;  %v841_v37 = vsel %vm833_vm13, %v3838_v11, 0.0 }
 0x304   : > { %vm934_vm3 = vcmp.eq.f32.partialorder %v3828_v50, %v3949_v59  ;;  %v3973_v46 = vsel %vm1025_vm5, 4, %v3803_v29  ;;  %v1103_v15 = vsel %vm554_vm1, %v3979_v43, -inf }
 0x305   : > { %v3967_v54 = vsel %vm934_vm3, 3, %v3808_v44  ;;  %v3987_v44 = vsel %vm934_vm3, -inf, %v3828_v50  ;;  %1104 = vmax.xlane.f32.xlu2 %v1103_v15 }
 0x306   : > { %6025 = vst [vmem:[#allocation35_spill] sm:$0xff] %v3987_v44  ;;  %v1021_v29 = vsel %vm554_vm1, %v3987_v44, -inf }
 0x307   : > { %1022 = vmax.xlane.f32.xlu1 %v1021_v29 }
 0x30a   : > { %v3993_v8 = vpop.xlane.xlu0 %759 }
 0x30b   : > { %v3991_v21 = vpop.xlane.xlu1 %1001  ;;  %6027 = vst [vmem:[#allocation37_spill] sm:$0xff] %v3993_v8  ;;  %v849_v8 = vsel %vm554_vm1, %v839_v9, 0.0 }
 0x30c   : > { %6026 = vst [vmem:[#allocation36_spill] sm:$0xff] %v3991_v21  ;;  %vm1024_vm7 = vcmp.eq.f32.partialorder %v3852_v24, %v3991_v21 }
 0x30d   : > { %v4005_v15 = vsel %vm1024_vm7, 4, %v3777_v31  ;;  %v4011_v29 = vsel %vm1024_vm7, -inf, %v3852_v24  ;;  %850 = vadd.xlane.f32.xlu2 %v849_v8  ;;  %v4039_v8 = vsel %vm1025_vm5, -inf, %v3822_v38 }
 0x30e   : > { %v1097_v13 = vsel %vm554_vm1, %v4011_v29, -inf }
 0x30f   : > { %1098 = vmax.xlane.f32.xlu0 %v1097_v13  ;;  %v855_v13 = vsel %vm554_vm1, %v841_v37, 0.0 }
 0x312   : > { %v4016_v34 = vpop.xlane.xlu2 %1019  ;;  %v4022_v31 = vpop.xlane.xlu0 %1010 }
 0x313   : > { %6028 = vst [vmem:[#allocation38_spill] sm:$0xff] %v4016_v34  ;;  %v4018_v16 = vpop.xlane.xlu1 %750  ;;  %vm5952_vm11 = vcmp.eq.f32.partialorder %v3899_v61, %v4016_v34  ;;  %vm5960_vm2 = vcmp.eq.f32.partialorder %v3886_v19, %v4022_v31 }
 0x314   : > { %6029 = vst [vmem:[#allocation39_spill] sm:$0xff] %v4018_v16  ;;  %v4031_v9 = vsel %vm5952_vm11, 4, %v990_v1  ;;  %v4045_v18 = vsel %vm5960_vm2, 4, %v3857_v26  ;;  %v4051_v1 = vsel %vm5952_vm11, -inf, %v3899_v61  ;;  %v1100_v16 = vsel %vm554_vm1, %v4039_v8, -inf  ;;  %v4064_v61 = vld [vmem:[#allocation3 + $0x30] sm:$0xff] }
 0x315   : > { %6030 = vst [vmem:[#allocation40_spill] sm:$0xff] %v4051_v1  ;;  %v1115_v45 = vsel %vm554_vm1, %v4051_v1, -inf  ;;  %856 = vadd.xlane.f32.xlu2 %v855_v13  ;;  %v4113_v5 = vsel %vm5960_vm2, -inf, %v3886_v19 }
 0x316   : > { %1116 = vmax.xlane.f32.xlu1 %v1115_v45  ;;  %v747_v45 = vsel %vm739_vm8, %v4064_v61, 0.0 }
 0x317   : > { %1101 = vmax.xlane.f32.xlu0 %v1100_v16  ;;  %v767_v16 = vsel %vm554_vm1, %v747_v45, 0.0 }
 0x31a   : > { %v4058_v48 = vpop.xlane.xlu2 %1016  ;;  %v4132_v32 = vpop.xlane.xlu0 %765 }
 0x31b   : > { %v4060_v26 = vpop.xlane.xlu1 %756  ;;  %vm5966_vm13 = vcmp.eq.f32.partialorder %v3914_v4, %v4058_v48  ;;  %6036 = vst [vmem:[#allocation44_spill] sm:$0xff] %v4132_v32 }
 0x31c   : > { %6031 = vst [vmem:[#allocation41_spill] sm:$0xff] %v4060_v26  ;;  %v4070_v37 = vsel %vm5966_vm13, 4, %v3874_v51  ;;  %v4079_v26 = vld [vmem:[#allocation3 + $0x38] sm:$0xff] }
 0x31d   : > { %6033 = vst [vmem:[#allocation43_spill] sm:$0xff] %v4079_v26  ;;  %v748_v34 = vsel %vm740_vm12, %v4079_v26, 0.0  ;;  %vm6035_vm12 = vcmp.eq.f32.partialorder %v3582_v17, %v3689_v47 }
 0x31e   : > { %v770_v51 = vsel %vm554_vm1, %v748_v34, 0.0 }
 0x31f   : > { %768 = vadd.xlane.f32.xlu0 %v767_v16  ;;  %v846_v16 = vsel %vm554_vm1, %v838_v63, 0.0  ;;  %v843_v63 = vsel %vm6034_vm9, %v3906_v49, 0.0 }
 0x320   : > { %v861_v10 = vsel %vm554_vm1, %v843_v63, 0.0 }
 0x323   : > { %v4077_v13 = vpop.xlane.xlu1 %762 }
 0x324   : > { %6032 = vst [vmem:[#allocation42_spill] sm:$0xff] %v4077_v13 }
 0x327   : > { %771 = vadd.xlane.f32.xlu0 %v770_v51  ;;  %v1106_v51 = vsel %vm554_vm1, %v4113_v5, -inf }
 0x32b   : > { %v4086_v38 = vpop.xlane.xlu1 %1013 }
 0x32c   : > { %vm5973_vm8 = vcmp.eq.f32.partialorder %v3939_v58, %v4086_v38 }
 0x32d   : > { %v4098_v45 = vsel %vm5973_vm8, 4, %v3862_v40  ;;  %v4104_v7 = vsel %vm5973_vm8, -inf, %v3939_v58  ;;  %v840_v40 = vsel %vm832_vm10, %v3908_v12, 0.0 }
 0x32e   : > { %v1109_v34 = vsel %vm554_vm1, %v4104_v7, -inf  ;;  %v852_v13 = vsel %vm554_vm1, %v840_v40, 0.0 }
 0x32f   : > { %1110 = vmax.xlane.f32.xlu2 %v1109_v34  ;;  %847 = vadd.xlane.f32.xlu0 %v846_v16  ;;  %v842_v34 = vsel %vm6035_vm12, %v3928_v14, 0.0 }
 0x330   : > { %v858_v16 = vsel %vm554_vm1, %v842_v34, 0.0 }
 0x337   : > { %1107 = vmax.xlane.f32.xlu2 %v1106_v51  ;;  %853 = vadd.xlane.f32.xlu0 %v852_v13 }
 0x33f   : > { %862 = vadd.xlane.f32.xlu2 %v861_v10  ;;  %859 = vadd.xlane.f32.xlu0 %v858_v16 }
 0x378   : > { %v4134_v40 = vpop.xlane.xlu2 %1104 }
 0x379   : > { %6037 = vst [vmem:[#allocation45_spill] sm:$0xff] %v4134_v40  ;;  %vm1123_vm10 = vcmp.eq.f32.partialorder %v3979_v43, %v4134_v40 }
 0x37a   : > { %v4138_v23 = vpop.xlane.xlu1 %1022  ;;  %v4160_v63 = vsel %vm1123_vm10, 5, %v3957_v0  ;;  %v4194_v47 = vsel %vm1123_vm10, -inf, %v3979_v43 }
 0x37b   : > { %6038 = vst [vmem:[#allocation46_spill] sm:$0xff] %v4138_v23  ;;  %vm5950_vm9 = vcmp.eq.f32.partialorder %v3987_v44, %v4138_v23  ;;  %v1200_v41 = vsel %vm554_vm1, %v4194_v47, -inf }
 0x37c   : > { %v4146_v17 = vsel %vm5950_vm9, 4, %v3967_v54  ;;  %v4152_v13 = vsel %vm5950_vm9, -inf, %v3987_v44  ;;  %v4170_v54 = vsel %vm5966_vm13, -inf, %v3914_v4  ;;  %v936_v44 = vsel %vm928_vm4, %v3763_v20, 0.0 }
 0x37d   : > { %6039 = vst [vmem:[#allocation47_spill] sm:$0xff] %v4152_v13  ;;  %v1118_v51 = vsel %vm554_vm1, %v4152_v13, -inf  ;;  %v946_v27 = vsel %vm554_vm1, %v936_v44, 0.0  ;;  %vm6044_vm4 = vcmp.eq.f32.partialorder %v3681_v42, %v3785_v36 }
 0x37e   : > { %1119 = vmax.xlane.f32.xlu1 %v1118_v51  ;;  %v1112_v51 = vsel %vm554_vm1, %v4170_v54, -inf }
 0x382   : > { %v4162_v34 = vpop.xlane.xlu0 %1098 }
 0x383   : > { %6040 = vst [vmem:[#allocation48_spill] sm:$0xff] %v4162_v34  ;;  %vm1121_vm12 = vcmp.eq.f32.partialorder %v4011_v29, %v4162_v34  ;;  %v707_v34 = vlaneseq }
 0x384   : > { %v4176_v10 = vsel %vm1121_vm12, -inf, %v4011_v29  ;;  %v4182_v0 = vsel %vm1121_vm12, 5, %v4005_v15 }
 0x385   : > { %v1194_v16 = vsel %vm554_vm1, %v4176_v10, -inf }
 0x386   : > { %1195 = vmax.xlane.f32.xlu2 %v1194_v16  ;;  %1113 = vmax.xlane.f32.xlu1 %v1112_v51 }
 0x389   : > { %v4188_v32 = vpop.xlane.xlu1 %1116 }
 0x38a   : > { %6041 = vst [vmem:[#allocation49_spill] sm:$0xff] %v4188_v32  ;;  %vm5959_vm9 = vcmp.eq.f32.partialorder %v4051_v1, %v4188_v32  ;;  %v4198_v15 = vpop.xlane.xlu0 %1101 }
 0x38b   : > { %6042 = vst [vmem:[#allocation50_spill] sm:$0xff] %v4198_v15  ;;  %vm1122_vm11 = vcmp.eq.f32.partialorder %v4039_v8, %v4198_v15  ;;  %v4210_v16 = vsel %vm5959_vm9, -inf, %v4051_v1  ;;  %v4216_v51 = vsel %vm5959_vm9, 5, %v4031_v9  ;;  %v4229_v1 = vpop.xlane.xlu2 %850  ;;  %v845_v9 = vsel %vm6044_vm4, %v4079_v26, 0.0 }
 0x38c   : > { %6043 = vst [vmem:[#allocation51_spill] sm:$0xff] %v4210_v16  ;;  %v1212_v60 = vsel %vm554_vm1, %v4210_v16, -inf  ;;  %v4226_v56 = vsel %vm1122_vm11, 5, %v3973_v46  ;;  %v4239_v23 = vsel %vm1122_vm11, -inf, %v4039_v8  ;;  %v867_v46 = vsel %vm554_vm1, %v845_v9, 0.0 }
 0x38d   : > { %1213 = vmax.xlane.f32.xlu0 %v1212_v60  ;;  %v1197_v60 = vsel %vm554_vm1, %v4239_v23, -inf  ;;  %vm6046_vm9 = vcmp.eq.f32.partialorder %v3614_v25, %v3744_v6  ;;  %vm6048_vm4 = vcmp.eq.f32.partialorder %v3633_v30, %v3770_v28  ;;  %v1033_v15 = vsel %vm1025_vm5, %v3763_v20, 0.0 }
 0x38e   : > { %1201 = vmax.xlane.f32.xlu2 %v1200_v41  ;;  %947 = vadd.xlane.f32.xlu1 %v946_v27  ;;  %v844_v42 = vsel %vm6046_vm9, %v4064_v61, 0.0  ;;  %v935_v9 = vsel %vm6048_vm4, %v3878_v52, 0.0  ;;  %vm6049_vm9 = vcmp.eq.f32.partialorder %v3667_v39, %v3779_v33 }
 0x38f   : > { %v864_v44 = vsel %vm554_vm1, %v844_v42, 0.0  ;;  %v943_v30 = vsel %vm554_vm1, %v935_v9, 0.0 }
 0x393   : > { %v4244_v27 = vpop.xlane.xlu2 %856 }
 0x394   : > { %6045 = vst [vmem:[#allocation52_spill] sm:$0xff] %v4244_v27 }
 0x395   : > { %868 = vadd.xlane.f32.xlu0 %v867_v46 }
 0x396   : > { %1198 = vmax.xlane.f32.xlu2 %v1197_v60 }
 0x39e   : > { %865 = vadd.xlane.f32.xlu2 %v864_v44  ;;  %v937_v44 = vsel %vm6049_vm9, %v3908_v12, 0.0 }
 0x39f   : > { %v949_v39 = vsel %vm554_vm1, %v937_v44, 0.0 }
 0x3a2   : > { %v4251_v41 = vpop.xlane.xlu2 %1110 }
 0x3a3   : > { %6047 = vst [vmem:[#allocation53_spill] sm:$0xff] %v4251_v41  ;;  %vm5965_vm2 = vcmp.eq.f32.partialorder %v4104_v7, %v4251_v41 }
 0x3a4   : > { %v4263_v46 = vsel %vm5965_vm2, -inf, %v4104_v7  ;;  %v4269_v25 = vsel %vm5965_vm2, 5, %v4098_v45 }
 0x3a5   : > { %v1206_v60 = vsel %vm554_vm1, %v4263_v46, -inf }
 0x3a6   : > { %1207 = vmax.xlane.f32.xlu1 %v1206_v60  ;;  %944 = vadd.xlane.f32.xlu2 %v943_v30  ;;  %v4297_v30 = vpop.xlane.xlu0 %768 }
 0x3a7   : > { %6050 = vst [vmem:[#allocation54_spill] sm:$0xff] %v4297_v30 }
 0x3aa   : > { %v4274_v42 = vpop.xlane.xlu2 %1107 }
 0x3ab   : > { %vm1124_vm4 = vcmp.eq.f32.partialorder %v4113_v5, %v4274_v42 }
 0x3ac   : > { %v4286_v45 = vsel %vm1124_vm4, -inf, %v4113_v5  ;;  %v4292_v9 = vsel %vm1124_vm4, 5, %v4045_v18 }
 0x3ad   : > { %v1203_v60 = vsel %vm554_vm1, %v4286_v45, -inf }
 0x3ae   : > { %1204 = vmax.xlane.f32.xlu1 %v1203_v60  ;;  %950 = vadd.xlane.f32.xlu2 %v949_v39  ;;  %v4299_v27 = vpop.xlane.xlu0 %771 }
 0x3af   : > { %6051 = vst [vmem:[#allocation55_spill] sm:$0xff] %v4299_v27 }
 0x3b2   : > { %v4305_v36 = vpop.xlane.xlu2 %862 }
 0x3b3   : > { %6053 = vst [vmem:[#allocation57_spill] sm:$0xff] %v4305_v36 }
 0x3b6   : > { %v4301_v33 = vpop.xlane.xlu0 %847 }
 0x3be   : > { %v4303_v28 = vpop.xlane.xlu0 %853 }
 0x3bf   : > { %6052 = vst [vmem:[#allocation56_spill] sm:$0xff] %v4303_v28 }
 0x3c6   : > { %v4325_v39 = vpop.xlane.xlu0 %859 }
 0x3c7   : > { %6056 = vst [vmem:[#allocation60_spill] sm:$0xff] %v4325_v39 }
 0x3f1   : > { %v4307_v35 = vpop.xlane.xlu1 %1119 }
 0x3f2   : > { %6054 = vst [vmem:[#allocation58_spill] sm:$0xff] %v4307_v35  ;;  %vm5972_vm9 = vcmp.eq.f32.partialorder %v4152_v13, %v4307_v35 }
 0x3f3   : > { %v4315_v18 = vsel %vm5972_vm9, -inf, %v4152_v13  ;;  %v4321_v44 = vsel %vm5972_vm9, 5, %v4146_v17 }
 0x3f4   : > { %6055 = vst [vmem:[#allocation59_spill] sm:$0xff] %v4315_v18  ;;  %v1215_v60 = vsel %vm554_vm1, %v4315_v18, -inf }
 0x3f5   : > { %1216 = vmax.xlane.f32.xlu0 %v1215_v60 }
 0x3f9   : > { %v4327_v27 = vpop.xlane.xlu2 %1195  ;;  %v4329_v30 = vpop.xlane.xlu1 %1113 }
 0x3fa   : > { %6057 = vst [vmem:[#allocation61_spill] sm:$0xff] %v4327_v27  ;;  %vm1218_vm2 = vcmp.eq.f32.partialorder %v4176_v10, %v4327_v27  ;;  %vm5990_vm13 = vcmp.eq.f32.partialorder %v4170_v54, %v4329_v30 }
 0x3fb   : > { %6058 = vst [vmem:[#allocation62_spill] sm:$0xff] %v4329_v30  ;;  %v4339_v17 = vsel %vm1218_vm2, -inf, %v4176_v10  ;;  %v4345_v60 = vsel %vm5990_vm13, -inf, %v4170_v54  ;;  %v4353_v39 = vsel %vm1218_vm2, 6, %v4182_v0  ;;  %v4361_v13 = vsel %vm5990_vm13, 5, %v4070_v37  ;;  %v6060_v30 = vld [vmem:[#allocation30_spill] sm:$0xff] }
 0x3fc   : > { %v1291_v36 = vsel %vm554_vm1, %v4339_v17, -inf  ;;  %v1209_v28 = vsel %vm554_vm1, %v4345_v60, -inf  ;;  %v938_v0 = vsel %vm930_vm14, %v3838_v11, 0.0  ;;  %v1043_v10 = vsel %vm554_vm1, %v1033_v15, 0.0 }
 0x3fd   : > { %1292 = vmax.xlane.f32.xlu2 %v1291_v36  ;;  %1210 = vmax.xlane.f32.xlu1 %v1209_v28  ;;  %v939_v28 = vsel %vm931_vm15, %v3928_v14, 0.0  ;;  %v952_v37 = vsel %vm554_vm1, %v938_v0, 0.0  ;;  %v940_v0 = vsel %vm932_vm6, %v3906_v49, 0.0 }
 0x400   : > { %v4365_v41 = vpop.xlane.xlu0 %1213 }
 0x401   : > { %v4363_v35 = vpop.xlane.xlu2 %1201  ;;  %vm5989_vm8 = vcmp.eq.f32.partialorder %v4210_v16, %v4365_v41  ;;  %v4421_v2 = vpop.xlane.xlu1 %947 }
 0x402   : > { %vm1220_vm9 = vcmp.eq.f32.partialorder %v4194_v47, %v4363_v35  ;;  %v4383_v36 = vsel %vm5989_vm8, 6, %v4216_v51  ;;  %v4389_v53 = vsel %vm5989_vm8, -inf, %v4210_v16  ;;  %v955_v51 = vsel %vm554_vm1, %v939_v28, 0.0 }
 0x403   : > { %v1309_v62 = vsel %vm554_vm1, %v4389_v53, -inf  ;;  %v4398_v55 = vsel %vm1220_vm9, 6, %v4160_v63  ;;  %v941_v63 = vsel %vm933_vm0, %v4064_v61, 0.0  ;;  %v958_v28 = vsel %vm554_vm1, %v940_v0, 0.0 }
 0x404   : > { %1310 = vmax.xlane.f32.xlu0 %v1309_v62  ;;  %v942_v16 = vsel %vm934_vm3, %v4079_v26, 0.0  ;;  %v4445_v50 = vsel %vm1220_vm9, -inf, %v4194_v47 }
 0x405   : > { %953 = vadd.xlane.f32.xlu2 %v952_v37  ;;  %956 = vadd.xlane.f32.xlu1 %v955_v51  ;;  %v961_v37 = vsel %vm554_vm1, %v941_v63, 0.0  ;;  %v1032_v51 = vsel %vm1024_vm7, %v3878_v52, 0.0 }
 0x406   : > { %v1040_v0 = vsel %vm554_vm1, %v1032_v51, 0.0  ;;  %v1297_v51 = vsel %vm554_vm1, %v4445_v50, -inf }
 0x408   : > { %v4507_v57 = vpop.xlane.xlu0 %868 }
 0x409   : > { %v4401_v3 = vpop.xlane.xlu2 %1198  ;;  %6065 = vst [vmem:[#allocation26_spill] sm:$0xff] %v4507_v57 }
 0x40a   : > { %vm1219_vm14 = vcmp.eq.f32.partialorder %v4239_v23, %v4401_v3 }
 0x40b   : > { %v4417_v62 = vsel %vm1219_vm14, 6, %v4226_v56  ;;  %v964_v56 = vsel %vm554_vm1, %v942_v16, 0.0 }
 0x40d   : > { %959 = vadd.xlane.f32.xlu2 %v958_v28  ;;  %962 = vadd.xlane.f32.xlu1 %v961_v37  ;;  %v1129_v28 = vsel %vm1121_vm12, %v3878_v52, 0.0 }
 0x40e   : > { %v1137_v37 = vsel %vm554_vm1, %v1129_v28, 0.0 }
 0x415   : > { %965 = vadd.xlane.f32.xlu2 %v964_v56  ;;  %1041 = vadd.xlane.f32.xlu1 %v1040_v0  ;;  %v1130_v0 = vsel %vm1122_vm11, %v3763_v20, 0.0 }
 0x419   : > { %v4433_v63 = vpop.xlane.xlu1 %1207 }
 0x41a   : > { %6061 = vst [vmem:[#allocation20_spill] sm:$0xff] %v4433_v63  ;;  %vm1222_vm0 = vcmp.eq.f32.partialorder %v4263_v46, %v4433_v63  ;;  %v6075_v63 = vld [vmem:[#allocation25_spill] sm:$0xff] }
 0x41b   : > { %v4451_v24 = vsel %vm1222_vm0, -inf, %v4263_v46  ;;  %v4457_v29 = vsel %vm1222_vm0, 6, %v4269_v25  ;;  %v4476_v25 = vsel %vm1219_vm14, -inf, %v4239_v23 }
 0x41c   : > { %v1303_v16 = vsel %vm554_vm1, %v4451_v24, -inf  ;;  %v1294_v8 = vsel %vm554_vm1, %v4476_v25, -inf }
 0x41d   : > { %1138 = vadd.xlane.f32.xlu2 %v1137_v37  ;;  %1304 = vmax.xlane.f32.xlu0 %v1303_v16  ;;  %v1140_v37 = vsel %vm554_vm1, %v1130_v0, 0.0  ;;  %v1226_v16 = vsel %vm1218_vm2, %v3878_v52, 0.0 }
 0x41e   : > { %1298 = vmax.xlane.f32.xlu1 %v1297_v51  ;;  %v1234_v51 = vsel %vm554_vm1, %v1226_v16, 0.0  ;;  %v4505_v16 = vpop.xlane.xlu2 %865 }
 0x41f   : > { %6064 = vst [vmem:[#allocation30_spill] sm:$0xff] %v4505_v16 }
 0x421   : > { %v4464_v56 = vpop.xlane.xlu1 %1204 }
 0x422   : > { %vm1221_vm15 = vcmp.eq.f32.partialorder %v4286_v45, %v4464_v56 }
 0x423   : > { %v4482_v28 = vsel %vm1221_vm15, 6, %v4292_v9  ;;  %v4496_v9 = vsel %vm1221_vm15, -inf, %v4286_v45 }
 0x424   : > { %v1300_v0 = vsel %vm554_vm1, %v4496_v9, -inf }
 0x425   : > { %1141 = vadd.xlane.f32.xlu2 %v1140_v37 }
 0x426   : > { %1295 = vmax.xlane.f32.xlu1 %v1294_v8 }
 0x42e   : > { %1235 = vadd.xlane.f32.xlu1 %v1234_v51  ;;  %v945_v51 = vpop.xlane.xlu2 %944 }
 0x436   : > { %1301 = vmax.xlane.f32.xlu1 %v1300_v0  ;;  %v4509_v27 = vpop.xlane.xlu2 %950 }
 0x437   : > { %6066 = vst [vmem:[#allocation63_spill] sm:$0xff] %v4509_v27 }
 0x43e   : > { %1044 = vadd.xlane.f32.xlu1 %v1043_v10  ;;  %v4529_v10 = vand.u32 127, %v707_v34 }
 0x440   : > { %vm773_vm2 = vcmp.eq.s32.totalorder %v4529_v10, 0  ;;  %vm870_vm3 = vcmp.eq.s32.totalorder %v4529_v10, 1  ;;  %vm967_vm11 = vcmp.eq.s32.totalorder %v4529_v10, 2  ;;  %vm1064_vm12 = vcmp.eq.s32.totalorder %v4529_v10, 3 }
 0x441   : > { %v780_v16 = vsel %vm773_vm2, %v3598_v22, 0.0  ;;  %vm5993_vm8 = vcmp.eq.s32.totalorder %v4529_v10, 6 }
 0x468   : > { %v4511_v21 = vpop.xlane.xlu0 %1216 }
 0x469   : > { %vm5988_vm6 = vcmp.eq.f32.partialorder %v4315_v18, %v4511_v21 }
 0x46a   : > { %v4519_v0 = vsel %vm5988_vm6, 6, %v4321_v44  ;;  %v4525_v15 = vsel %vm5988_vm6, -inf, %v4315_v18  ;;  %vm1258_vm6 = vcmp.eq.s32.totalorder %v4529_v10, 5 }
 0x46b   : > { %v1312_v37 = vsel %vm554_vm1, %v4525_v15, -inf }
 0x46c   : > { %1313 = vmax.xlane.f32.xlu2 %v1312_v37 }
 0x470   : > { %v4531_v57 = vpop.xlane.xlu2 %1292  ;;  %v4535_v44 = vpop.xlane.xlu1 %1210 }
 0x471   : > { %6067 = vst [vmem:[#allocation64_spill] sm:$0xff] %v4531_v57  ;;  %vm1315_vm5 = vcmp.eq.f32.partialorder %v4339_v17, %v4531_v57  ;;  %vm1223_vm7 = vcmp.eq.f32.partialorder %v4345_v60, %v4535_v44 }
 0x472   : > { %v4545_v34 = vsel %vm1315_vm5, -inf, %v4339_v17  ;;  %v1323_v37 = vsel %vm1315_vm5, %v3878_v52, 0.0  ;;  %v4555_v8 = vsel %vm1223_vm7, -inf, %v4345_v60  ;;  %v877_v17 = vsel %vm870_vm3, %v3744_v6, %v780_v16  ;;  %v6068_v6 = vld [vmem:[#allocation38_spill] sm:$0xff] }
 0x473   : > { %v1388_v27 = vsel %vm554_vm1, %v4545_v34, -inf  ;;  %v1331_v22 = vsel %vm554_vm1, %v1323_v37, 0.0  ;;  %v1306_v57 = vsel %vm554_vm1, %v4555_v8, -inf  ;;  %v4564_v18 = vsel %vm1315_vm5, 7, %v4353_v39 }
 0x474   : > { %1389 = vmax.xlane.f32.xlu1 %v1388_v27  ;;  %v4570_v26 = vsel %vm1223_vm7, 6, %v4361_v13  ;;  %v974_v37 = vsel %vm967_vm11, %v6060_v30, %v877_v17  ;;  %1307 = vmax.xlane.f32.xlu0 %v1306_v57  ;;  %vm1161_vm5 = vcmp.eq.s32.totalorder %v4529_v10, 4  ;;  %v1131_v17 = vsel %vm1123_vm10, %v3908_v12, 0.0 }
 0x475   : > { %1332 = vadd.xlane.f32.xlu2 %v1331_v22  ;;  %v1071_v27 = vsel %vm1064_vm12, %v6068_v6, %v974_v37 }
 0x476   : > { %v1168_v39 = vsel %vm1161_vm5, %v4188_v32, %v1071_v27  ;;  %v1143_v27 = vsel %vm554_vm1, %v1131_v17, 0.0  ;;  %v6074_v32 = vld [vmem:[#allocation39_spill] sm:$0xff] }
 0x477   : > { %v1265_v13 = vsel %vm1258_vm6, %v4365_v41, %v1168_v39  ;;  %v4590_v30 = vpop.xlane.xlu0 %1310  ;;  %v782_v43 = vsel %vm773_vm2, %v6074_v32, 0.0 }
 0x478   : > { %v4588_v57 = vpop.xlane.xlu2 %953  ;;  %v4592_v16 = vpop.xlane.xlu1 %956  ;;  %vm1321_vm13 = vcmp.eq.f32.partialorder %v4389_v53, %v4590_v30  ;;  %v4599_v22 = vsel %vm5993_vm8, %v4590_v30, %v1265_v13  ;;  %v879_v40 = vsel %vm870_vm3, %v4301_v33, %v782_v43 }
 0x479   : > { %6069 = vst [vmem:[#allocation38_spill] sm:$0xff] %v4588_v57  ;;  %v4609_v37 = vsel %vm1321_vm13, 7, %v4383_v36  ;;  %v976_v36 = vsel %vm967_vm11, %v945_v51, %v879_v40 }
 0x47a   : > { %6070 = vst [vmem:[#allocation65_spill] sm:$0xff] %v4592_v16 }
 0x47d   : > { %1144 = vadd.xlane.f32.xlu2 %v1143_v27 }
 0x480   : > { %v4612_v39 = vpop.xlane.xlu2 %959  ;;  %v4614_v16 = vpop.xlane.xlu1 %962 }
 0x481   : > { %6071 = vst [vmem:[#allocation66_spill] sm:$0xff] %v4612_v39 }
 0x482   : > { %6072 = vst [vmem:[#allocation67_spill] sm:$0xff] %v4614_v16 }
 0x488   : > { %v4616_v13 = vpop.xlane.xlu2 %965  ;;  %v1042_v57 = vpop.xlane.xlu1 %1041 }
 0x489   : > { %6073 = vst [vmem:[#allocation68_spill] sm:$0xff] %v4616_v13  ;;  %v1073_v17 = vsel %vm1064_vm12, %v1042_v57, %v976_v36  ;;  %v4666_v36 = vsel %vm1321_vm13, -inf, %v4389_v53  ;;  %v6099_v53 = vld [vmem:[#allocation49_spill] sm:$0xff] }
 0x490   : > { %v1139_v27 = vpop.xlane.xlu2 %1138  ;;  %v4628_v39 = vpop.xlane.xlu0 %1304 }
 0x491   : > { %v4630_v16 = vpop.xlane.xlu1 %1298  ;;  %v1170_v13 = vsel %vm1161_vm5, %v1139_v27, %v1073_v17  ;;  %vm1319_vm10 = vcmp.eq.f32.partialorder %v4451_v24, %v4628_v39 }
 0x492   : > { %vm1317_vm8 = vcmp.eq.f32.partialorder %v4445_v50, %v4630_v16  ;;  %v4652_v43 = vsel %vm1319_vm10, 7, %v4457_v29 }
 0x493   : > { %v4639_v32 = vsel %vm1317_vm8, -inf, %v4445_v50  ;;  %v1325_v33 = vsel %vm1317_vm8, %v3908_v12, 0.0  ;;  %v4643_v40 = vsel %vm1317_vm8, 7, %v4398_v55  ;;  %v1132_v55 = vsel %vm1124_vm4, %v3838_v11, 0.0 }
 0x494   : > { %v1394_v51 = vsel %vm554_vm1, %v4639_v32, -inf  ;;  %v1337_v57 = vsel %vm554_vm1, %v1325_v33, 0.0  ;;  %v1146_v27 = vsel %vm554_vm1, %v1132_v55, 0.0  ;;  %v1406_v33 = vsel %vm554_vm1, %v4666_v36, -inf }
 0x495   : > { %1395 = vmax.xlane.f32.xlu0 %v1394_v51  ;;  %1338 = vadd.xlane.f32.xlu2 %v1337_v57  ;;  %v1227_v57 = vsel %vm1219_vm14, %v3763_v20, 0.0 }
 0x499   : > { %v4654_v50 = vpop.xlane.xlu1 %1295 }
 0x49a   : > { %vm1316_vm8 = vcmp.eq.f32.partialorder %v4476_v25, %v4654_v50 }
 0x49b   : > { %v4672_v29 = vsel %vm1316_vm8, -inf, %v4476_v25  ;;  %v4678_v5 = vsel %vm1316_vm8, 7, %v4417_v62  ;;  %v1230_v62 = vsel %vm1222_vm0, %v3928_v14, 0.0  ;;  %v1324_v45 = vsel %vm1316_vm8, %v3763_v20, 0.0 }
 0x49c   : > { %v1391_v17 = vsel %vm554_vm1, %v4672_v29, -inf  ;;  %vm6078_vm0 = vcmp.eq.f32.partialorder %v3939_v58, %v4086_v38 }
 0x49d   : > { %1392 = vmax.xlane.f32.xlu1 %v1391_v17  ;;  %1147 = vadd.xlane.f32.xlu2 %v1146_v27  ;;  %v1229_v17 = vsel %vm1221_vm15, %v3838_v11, 0.0  ;;  %v1237_v27 = vsel %vm554_vm1, %v1227_v57, 0.0  ;;  %v1036_v57 = vsel %vm6078_vm0, %v3928_v14, 0.0  ;;  %vm6080_vm15 = vcmp.eq.f32.partialorder %v3914_v4, %v4058_v48 }
 0x49e   : > { %1407 = vmax.xlane.f32.xlu0 %v1406_v33  ;;  %v1246_v33 = vsel %vm554_vm1, %v1230_v62, 0.0  ;;  %v1243_v23 = vsel %vm554_vm1, %v1229_v17, 0.0  ;;  %v1334_v17 = vsel %vm554_vm1, %v1324_v45, 0.0  ;;  %v1052_v25 = vsel %vm554_vm1, %v1036_v57, 0.0  ;;  %v1142_v57 = vpop.xlane.xlu2 %1141 }
 0x49f   : > { %v1037_v45 = vsel %vm6080_vm15, %v3906_v49, 0.0 }
 0x4a1   : > { %v1236_v51 = vpop.xlane.xlu1 %1235 }
 0x4a2   : > { %v4695_v55 = vsel %vm1258_vm6, %v1236_v51, %v1170_v13  ;;  %v6076_v13 = vld [vmem:[#allocation33_spill] sm:$0xff] }
 0x4a3   : > { %vm6077_vm4 = vcmp.eq.f32.partialorder %v6075_v63, %v6076_v13 }
 0x4a4   : > { %v1034_v51 = vsel %vm6077_vm4, %v3908_v12, 0.0  ;;  %vm6088_vm4 = vcmp.eq.s32.totalorder %v4529_v10, 6 }
 0x4a5   : > { %1238 = vadd.xlane.f32.xlu1 %v1237_v27  ;;  %1247 = vadd.xlane.f32.xlu2 %v1246_v33  ;;  %v1046_v63 = vsel %vm554_vm1, %v1034_v51, 0.0  ;;  %v6079_v27 = vld [vmem:[#allocation32_spill] sm:$0xff]  ;;  %v1228_v51 = vsel %vm1220_vm9, %v3908_v12, 0.0  ;;  %vm6081_vm9 = vcmp.eq.f32.partialorder %v3886_v19, %v4022_v31 }
 0x4a6   : > { %1244 = vadd.xlane.f32.xlu0 %v1243_v23  ;;  %v783_v58 = vsel %vm773_vm2, %v6079_v27, 0.0  ;;  %v1240_v47 = vsel %vm554_vm1, %v1228_v51, 0.0 }
 0x4a7   : > { %v880_v33 = vsel %vm870_vm3, %v4229_v1, %v783_v58  ;;  %v4752_v1 = vsel %vm1319_vm10, -inf, %v4451_v24 }
 0x4a8   : > { %v1400_v4 = vsel %vm554_vm1, %v4752_v1, -inf }
 0x4a9   : > { %v4704_v46 = vpop.xlane.xlu1 %1301 }
 0x4aa   : > { %vm1318_vm14 = vcmp.eq.f32.partialorder %v4496_v9, %v4704_v46 }
 0x4ab   : > { %v4724_v62 = vsel %vm1318_vm14, 7, %v4482_v28  ;;  %v977_v28 = vsel %vm967_vm11, %v4421_v2, %v880_v33  ;;  %v4770_v27 = vsel %vm1318_vm14, -inf, %v4496_v9  ;;  %v1326_v51 = vsel %vm1318_vm14, %v3838_v11, 0.0 }
 0x4ac   : > { %v1397_v33 = vsel %vm554_vm1, %v4770_v27, -inf }
 0x4ad   : > { %1047 = vadd.xlane.f32.xlu1 %v1046_v63  ;;  %1335 = vadd.xlane.f32.xlu2 %v1334_v17  ;;  %v1055_v17 = vsel %vm554_vm1, %v1037_v45, 0.0  ;;  %v1340_v45 = vsel %vm554_vm1, %v1326_v51, 0.0 }
 0x4ae   : > { %1053 = vadd.xlane.f32.xlu0 %v1052_v25  ;;  %v1035_v25 = vsel %vm6081_vm9, %v3838_v11, 0.0 }
 0x4af   : > { %v1049_v58 = vsel %vm554_vm1, %v1035_v25, 0.0  ;;  %v6086_v25 = vld [vmem:[#allocation46_spill] sm:$0xff] }
 0x4b1   : > { %v1045_v23 = vpop.xlane.xlu1 %1044 }
 0x4b2   : > { %v1074_v63 = vsel %vm1064_vm12, %v1045_v23, %v977_v28  ;;  %v6082_v28 = vld [vmem:[#allocation53_spill] sm:$0xff] }
 0x4b3   : > { %v4756_v2 = vsel %vm1161_vm5, %v1142_v57, %v1074_v63  ;;  %vm6083_vm8 = vcmp.eq.f32.partialorder %v4104_v7, %v6082_v28  ;;  %v1231_v57 = vsel %vm1223_vm7, %v3906_v49, 0.0  ;;  %v6084_v7 = vld [vmem:[#allocation16_spill] sm:$0xff] }
 0x4b4   : > { %v1133_v23 = vsel %vm6083_vm8, %v3928_v14, 0.0  ;;  %v1249_v63 = vsel %vm554_vm1, %v1231_v57, 0.0  ;;  %vm1452_vm8 = vcmp.eq.s32.totalorder %v4529_v10, 7 }
 0x4b5   : > { %1241 = vadd.xlane.f32.xlu1 %v1240_v47  ;;  %1056 = vadd.xlane.f32.xlu2 %v1055_v17  ;;  %v1149_v19 = vsel %vm554_vm1, %v1133_v23, 0.0  ;;  %v781_v47 = vsel %vm773_vm2, %v6084_v7, 0.0  ;;  %v6085_v17 = vld [vmem:[#allocation24_spill] sm:$0xff] }
 0x4b6   : > { %1401 = vmax.xlane.f32.xlu0 %v1400_v4  ;;  %v878_v9 = vsel %vm870_vm3, %v6085_v17, %v781_v47 }
 0x4b7   : > { %v975_v4 = vsel %vm967_vm11, %v3949_v59, %v878_v9 }
 0x4b8   : > { %v1072_v60 = vsel %vm1064_vm12, %v6086_v25, %v975_v4 }
 0x4bd   : > { %1050 = vadd.xlane.f32.xlu1 %v1049_v58  ;;  %v6087_v58 = vld [vmem:[#allocation58_spill] sm:$0xff] }
 0x4be   : > { %1398 = vmax.xlane.f32.xlu0 %v1397_v33  ;;  %v1169_v33 = vsel %vm1161_vm5, %v6087_v58, %v1072_v60 }
 0x4bf   : > { %v1266_v23 = vsel %vm1258_vm6, %v4511_v21, %v1169_v33 }
 0x4c5   : > { %1150 = vadd.xlane.f32.xlu1 %v1149_v19 }
 0x4cd   : > { %1341 = vadd.xlane.f32.xlu1 %v1340_v45 }
 0x4d5   : > { %1250 = vadd.xlane.f32.xlu1 %v1249_v63 }
 0x4df   : > { %v4808_v19 = vpop.xlane.xlu2 %1313 }
 0x4e0   : > { %vm1322_vm7 = vcmp.eq.f32.partialorder %v4525_v15, %v4808_v19  ;;  %v4815_v59 = vsel %vm6088_vm4, %v4808_v19, %v1266_v23  ;;  %v6131_v19 = vld [vmem:[#allocation50_spill] sm:$0xff] }
 0x4e1   : > { %v4821_v51 = vsel %vm1322_vm7, -inf, %v4525_v15  ;;  %v4827_v45 = vsel %vm1322_vm7, 7, %v4519_v0 }
 0x4e2   : > { %v1409_v57 = vsel %vm554_vm1, %v4821_v51, -inf }
 0x4e3   : > { %1410 = vmax.xlane.f32.xlu0 %v1409_v57 }
 0x4e7   : > { %v4831_v63 = vpop.xlane.xlu1 %1389  ;;  %v4835_v7 = vpop.xlane.xlu0 %1307 }
 0x4e8   : > { %vm1412_vm14 = vcmp.eq.f32.partialorder %v4545_v34, %v4831_v63  ;;  %vm1320_vm0 = vcmp.eq.f32.partialorder %v4555_v8, %v4835_v7 }
 0x4e9   : > { %v4838_v47 = vsel %vm1412_vm14, 8, %v4564_v18  ;;  %v4846_v0 = vsel %vm1320_vm0, -inf, %v4555_v8  ;;  %v4854_v34 = vsel %vm1320_vm0, 7, %v4570_v26  ;;  %v1420_v18 = vsel %vm1412_vm14, %v3878_v52, 0.0 }
 0x4ea   : > { %v1403_v17 = vsel %vm554_vm1, %v4846_v0, -inf  ;;  %v1428_v9 = vsel %vm554_vm1, %v1420_v18, 0.0 }
 0x4eb   : > { %1404 = vmax.xlane.f32.xlu0 %v1403_v17 }
 0x4f3   : > { %1429 = vadd.xlane.f32.xlu0 %v1428_v9 }
 0x508   : > { %v4858_v4 = vpop.xlane.xlu0 %1395 }
 0x509   : > { %vm1414_vm15 = vcmp.eq.f32.partialorder %v4639_v32, %v4858_v4 }
 0x50a   : > { %v4863_v60 = vsel %vm1414_vm15, 8, %v4643_v40  ;;  %v1422_v33 = vsel %vm1414_vm15, %v3908_v12, 0.0 }
 0x50b   : > { %v1434_v23 = vsel %vm554_vm1, %v1422_v33, 0.0  ;;  %v6091_v33 = vld [vmem:[#allocation51_spill] sm:$0xff] }
 0x50c   : > { %1435 = vadd.xlane.f32.xlu0 %v1434_v23  ;;  %vm6092_vm15 = vcmp.eq.f32.partialorder %v6091_v33, %v4365_v41  ;;  %v6093_v41 = vld [vmem:[#allocation31_spill] sm:$0xff] }
 0x50d   : > { %v1232_v24 = vsel %vm6092_vm15, %v4064_v61, 0.0  ;;  %v6095_v33 = vld [vmem:[#allocation43_spill] sm:$0xff] }
 0x510   : > { %v4867_v26 = vpop.xlane.xlu1 %1392 }
 0x511   : > { %vm1413_vm9 = vcmp.eq.f32.partialorder %v4672_v29, %v4867_v26  ;;  %v1408_v52 = vpop.xlane.xlu0 %1407 }
 0x512   : > { %v4873_v57 = vsel %vm1413_vm9, 8, %v4678_v5  ;;  %vm1418_vm4 = vcmp.eq.f32.partialorder %v4666_v36, %v1408_v52  ;;  %v1421_v32 = vsel %vm1413_vm9, %v3763_v20, 0.0  ;;  %v4880_v12 = vsel %vm1452_vm8, %v1408_v52, %v4599_v22  ;;  %v6089_v22 = vld [vmem:[#allocation62_spill] sm:$0xff]  ;;  %v6105_v36 = vld [vmem:[#allocation21_spill] sm:$0xff]  ;;  %v1333_v52 = vpop.xlane.xlu2 %1332 }
 0x513   : > { %v4885_v40 = vsel %vm1418_vm4, 8, %v4609_v37  ;;  %v1431_v29 = vsel %vm554_vm1, %v1421_v32, 0.0  ;;  %v1327_v5 = vsel %vm1319_vm10, %v3928_v14, 0.0  ;;  %vm6090_vm14 = vcmp.eq.f32.partialorder %v4170_v54, %v6089_v22 }
 0x514   : > { %1432 = vadd.xlane.f32.xlu0 %v1431_v29  ;;  %v1343_v20 = vsel %vm554_vm1, %v1327_v5, 0.0  ;;  %v1134_v18 = vsel %vm6090_vm14, %v3906_v49, 0.0  ;;  %v1252_v54 = vsel %vm554_vm1, %v1232_v24, 0.0  ;;  %vm6094_vm9 = vcmp.eq.f32.partialorder %v6093_v41, %v6068_v6  ;;  %v6096_v24 = vld [vmem:[#allocation47_spill] sm:$0xff] }
 0x515   : > { %v1152_v9 = vsel %vm554_vm1, %v1134_v18, 0.0  ;;  %v1038_v18 = vsel %vm6094_vm9, %v4064_v61, 0.0  ;;  %v1329_v6 = vsel %vm1321_vm13, %v4064_v61, 0.0  ;;  %vm6097_vm15 = vcmp.eq.f32.partialorder %v6096_v24, %v6087_v58  ;;  %v1670_v41 = vld [vmem:[%s5913_s6] sm:$0xff]  ;;  %v6106_v24 = vld [vmem:[#allocation36_spill] sm:$0xff] }
 0x516   : > { %v1426_v58 = vsel %vm1418_vm4, %v4064_v61, 0.0  ;;  %1710 = vmatpush.msrb.mxu0 %v1670_v41  ;;  %2830 = vmatpush.msra.mxu1 %v1670_v41  ;;  %vm6112_vm4 = vcmp.eq.s32.totalorder %v4529_v10, 6  ;;  %vm1477_vm9 = vcmask 64512  }
 0x519   : > { %v4892_v17 = vpop.xlane.xlu0 %1244 }
 0x51c   : > { %1344 = vadd.xlane.f32.xlu0 %v1343_v20 }
 0x521   : > { %v4899_v37 = vpop.xlane.xlu0 %1053 }
 0x524   : > { %1153 = vadd.xlane.f32.xlu0 %v1152_v9 }
 0x529   : > { %v4906_v23 = vpop.xlane.xlu0 %1401 }
 0x52a   : > { %vm1416_vm10 = vcmp.eq.f32.partialorder %v4752_v1, %v4906_v23 }
 0x52b   : > { %v4911_v32 = vsel %vm1416_vm10, 8, %v4652_v43  ;;  %v1424_v29 = vsel %vm1416_vm10, %v3928_v14, 0.0  ;;  %v1058_v14 = vsel %vm554_vm1, %v1038_v18, 0.0  ;;  %v1446_v18 = vsel %vm554_vm1, %v1426_v58, 0.0  ;;  %v6110_v58 = vld [vmem:[#allocation14_spill] sm:$0xff] }
 0x52c   : > { %1253 = vadd.xlane.f32.xlu0 %v1252_v54  ;;  %v1440_v5 = vsel %vm554_vm1, %v1424_v29, 0.0  ;;  %v1136_v54 = vsel %vm6097_vm15, %v6095_v33, 0.0  ;;  %v6098_v29 = vld [vmem:[#allocation40_spill] sm:$0xff]  ;;  %vm6120_vm15 = vmmov %vm6112_vm4 }
 0x52d   : > { %1441 = vadd.xlane.f32.xlu1 %v1440_v5  ;;  %vm6100_vm13 = vcmp.eq.f32.partialorder %v6098_v29, %v6099_v53  ;;  %v1158_v5 = vsel %vm554_vm1, %v1136_v54, 0.0  ;;  %v6107_v54 = vld [vmem:[#allocation48_spill] sm:$0xff] }
 0x52e   : > { %v1135_v30 = vsel %vm6100_vm13, %v4064_v61, 0.0  ;;  %v6108_v53 = vld [vmem:[#allocation8_spill] sm:$0xff] }
 0x52f   : > { %v1155_v8 = vsel %vm554_vm1, %v1135_v30, 0.0  ;;  %v776_v30 = vsel %vm773_vm2, %v6108_v53, 0.0 }
 0x531   : > { %v4916_v20 = vpop.xlane.xlu0 %1398 }
 0x532   : > { %vm1415_vm14 = vcmp.eq.f32.partialorder %v4770_v27, %v4916_v20  ;;  %v1328_v27 = vsel %vm1320_vm0, %v3906_v49, 0.0 }
 0x533   : > { %v4925_v43 = vsel %vm1415_vm14, 8, %v4724_v62  ;;  %v1423_v1 = vsel %vm1415_vm14, %v3838_v11, 0.0  ;;  %v1349_v62 = vsel %vm554_vm1, %v1329_v6, 0.0  ;;  %v1346_v11 = vsel %vm554_vm1, %v1328_v27, 0.0  ;;  %v6104_v27 = vld [vmem:[#allocation13_spill] sm:$0xff]  ;;  %vm6118_vm14 = vmmov %vm6112_vm4 }
 0x534   : > { %v1437_v9 = vsel %vm554_vm1, %v1423_v1, 0.0  ;;  %v6101_v1 = vld [vmem:[#allocation59_spill] sm:$0xff] }
 0x535   : > { %1059 = vadd.xlane.f32.xlu1 %v1058_v14  ;;  %1438 = vadd.xlane.f32.xlu2 %v1437_v9  ;;  %vm6102_vm0 = vcmp.eq.f32.partialorder %v6101_v1, %v4511_v21  ;;  %v6103_v9 = vld [vmem:[#allocation7_spill] sm:$0xff]  ;;  %v6111_v1 = vld [vmem:[#allocation64_spill] sm:$0xff] }
 0x536   : > { %v1233_v14 = vsel %vm6102_vm0, %v6095_v33, 0.0  ;;  %v774_v6 = vsel %vm773_vm2, %v6103_v9, 0.0  ;;  %vm6123_vm0 = vmmov %vm6112_vm4 }
 0x53d   : > { %1350 = vadd.xlane.f32.xlu1 %v1349_v62  ;;  %1347 = vadd.xlane.f32.xlu2 %v1346_v11  ;;  %v871_v62 = vsel %vm870_vm3, %v6104_v27, %v774_v6  ;;  %v1255_v11 = vsel %vm554_vm1, %v1233_v14, 0.0 }
 0x53e   : > { %v968_v61 = vsel %vm967_vm11, %v6105_v36, %v871_v62  ;;  %v6113_v62 = vld [vmem:[#allocation11_spill] sm:$0xff] }
 0x53f   : > { %v1065_v21 = vsel %vm1064_vm12, %v6106_v24, %v968_v61  ;;  %v777_v36 = vsel %vm773_vm2, %v6113_v62, 0.0  ;;  %v6114_v61 = vld [vmem:[#allocation22_spill] sm:$0xff] }
 0x540   : > { %v1162_v29 = vsel %vm1161_vm5, %v6107_v54, %v1065_v21  ;;  %v6116_v21 = vld [vmem:[#allocation27_spill] sm:$0xff] }
 0x545   : > { %1159 = vadd.xlane.f32.xlu1 %v1158_v5  ;;  %1156 = vadd.xlane.f32.xlu2 %v1155_v8  ;;  %v6109_v5 = vld [vmem:[#allocation61_spill] sm:$0xff] }
 0x546   : > { %v1259_v8 = vsel %vm1258_vm6, %v6109_v5, %v1162_v29  ;;  %v6117_v29 = vld [vmem:[#allocation45_spill] sm:$0xff] }
 0x547   : > { %v1356_v14 = vsel %vm6112_vm4, %v6111_v1, %v1259_v8  ;;  %vm6124_vm4 = vmmov %vm6123_vm0 }
 0x548   : > { %v5000_v27 = vsel %vm1452_vm8, %v4831_v63, %v1356_v14  ;;  %v6119_v14 = vld [vmem:[#allocation12_spill] sm:$0xff] }
 0x54d   : > { %1447 = vadd.xlane.f32.xlu2 %v1446_v18  ;;  %v873_v18 = vsel %vm870_vm3, %v6110_v58, %v776_v30  ;;  %v1478_v30 = vsel %vm1477_vm9, %v5000_v27, -inf }
 0x555   : > { %1256 = vadd.xlane.f32.xlu2 %v1255_v11  ;;  %v970_v11 = vsel %vm967_vm11, %v6114_v61, %v873_v18  ;;  %v5035_v18 = vpop.xlane.xlu2 %1144  ;;  %v6122_v61 = vld [vmem:[#allocation29_spill] sm:$0xff] }
 0x556   : > { %v4983_v41 = vpop.xlane.xlu0 %1410  ;;  %v1067_v63 = vsel %vm1064_vm12, %v6076_v13, %v970_v11 }
 0x557   : > { %vm1419_vm10 = vcmp.eq.f32.partialorder %v4821_v51, %v4983_v41  ;;  %v1164_v53 = vsel %vm1161_vm5, %v6117_v29, %v1067_v63  ;;  %v1364_v63 = vsel %vm6124_vm4, %v1333_v52, %v4695_v55  ;;  %v1496_v52 = vsel %vm1477_vm9, %v4880_v12, -inf  ;;  %vm6149_vm4 = vmmov %vm6123_vm0 }
 0x558   : > { %v4994_v9 = vsel %vm1419_vm10, 8, %v4827_v45  ;;  %v1427_v6 = vsel %vm1419_vm10, %v6095_v33, 0.0  ;;  %v6115_v45 = vld [vmem:[#allocation17_spill] sm:$0xff]  ;;  %v1261_v13 = vsel %vm1258_vm6, %v4363_v35, %v1164_v53 }
 0x559   : > { %v1449_v51 = vsel %vm554_vm1, %v1427_v6, 0.0  ;;  %v874_v24 = vsel %vm870_vm3, %v6115_v45, %v777_v36  ;;  %v1358_v58 = vsel %vm6118_vm14, %v4630_v16, %v1261_v13  ;;  %v6121_v6 = vld [vmem:[#allocation19_spill] sm:$0xff]  ;;  %vm6137_vm14 = vmmov %vm6123_vm0 }
 0x55a   : > { %1450 = vadd.xlane.f32.xlu1 %v1449_v51  ;;  %v971_v54 = vsel %vm967_vm11, %v6116_v21, %v874_v24  ;;  %v5043_v35 = vsel %vm1452_vm8, %v4858_v4, %v1358_v58 }
 0x55b   : > { %v1068_v5 = vsel %vm1064_vm12, %v4022_v31, %v971_v54  ;;  %v6125_v54 = vld [vmem:[#allocation35_spill] sm:$0xff] }
 0x55c   : > { %v1165_v8 = vsel %vm1161_vm5, %v4274_v42, %v1068_v5  ;;  %v779_v42 = vsel %vm773_vm2, %v6119_v14, 0.0  ;;  %vm6126_vm10 = vcmp.eq.f32.partialorder %v6125_v54, %v6086_v25  ;;  %v1330_v25 = vsel %vm1322_vm7, %v6095_v33, 0.0  ;;  %vm6132_vm7 = vmmov %vm6123_vm0 }
 0x55d   : > { %1479 = vmax.xlane.f32.xlu2 %v1478_v30  ;;  %v1262_v1 = vsel %vm1258_vm6, %v4464_v56, %v1165_v8  ;;  %v876_v56 = vsel %vm870_vm3, %v6121_v6, %v779_v42  ;;  %v6127_v30 = vld [vmem:[#allocation9_spill] sm:$0xff]  ;;  %v6128_v8 = vld [vmem:[#allocation15_spill] sm:$0xff]  ;;  %v1352_v14 = vsel %vm554_vm1, %v1330_v25, 0.0  ;;  %v6130_v42 = vld [vmem:[#allocation34_spill] sm:$0xff] }
 0x55e   : > { %v1405_v31 = vpop.xlane.xlu0 %1404  ;;  %v1359_v16 = vsel %vm6120_vm15, %v4704_v46, %v1262_v1  ;;  %v973_v46 = vsel %vm967_vm11, %v6122_v61, %v876_v56  ;;  %v775_v5 = vsel %vm773_vm2, %v6127_v30, 0.0  ;;  %v6129_v1 = vld [vmem:[#allocation23_spill] sm:$0xff]  ;;  %vm6141_vm15 = vmmov %vm6123_vm0 }
 0x55f   : > { %vm1417_vm13 = vcmp.eq.f32.partialorder %v4846_v0, %v1405_v31  ;;  %v5062_v36 = vsel %vm1452_vm8, %v4916_v20, %v1359_v16  ;;  %v1484_v0 = vsel %vm1477_vm9, %v5043_v35, -inf  ;;  %v1239_v20 = vpop.xlane.xlu1 %1238  ;;  %v872_v58 = vsel %vm870_vm3, %v6128_v8, %v775_v5 }
 0x560   : > { %v5056_v62 = vsel %vm1417_vm13, 8, %v4854_v34  ;;  %v1425_v4 = vsel %vm1417_vm13, %v3906_v49, 0.0  ;;  %v1070_v34 = vsel %vm1064_vm12, %v4058_v48, %v973_v46  ;;  %v1487_v51 = vsel %vm1477_vm9, %v5062_v36, -inf  ;;  %v1339_v48 = vpop.xlane.xlu2 %1338  ;;  %vm6142_vm13 = vmmov %vm6123_vm0 }
 0x561   : > { %v1443_v11 = vsel %vm554_vm1, %v1425_v4, 0.0  ;;  %v1167_v49 = vsel %vm1161_vm5, %v6089_v22, %v1070_v34  ;;  %v6133_v4 = vld [vmem:[#allocation10_spill] sm:$0xff]  ;;  %v6135_v34 = vld [vmem:[#allocation28_spill] sm:$0xff]  ;;  %v5182_v8 = vsel %vm1452_vm8, %v4983_v41, %v4815_v59 }
 0x562   : > { %1485 = vmax.xlane.f32.xlu1 %v1484_v0  ;;  %1444 = vadd.xlane.f32.xlu0 %v1443_v11  ;;  %v1264_v45 = vsel %vm1258_vm6, %v4535_v44, %v1167_v49  ;;  %v1039_v44 = vsel %vm6126_vm10, %v6095_v33, 0.0  ;;  %v778_v61 = vsel %vm773_vm2, %v6133_v4, 0.0  ;;  %v6134_v0 = vld [vmem:[#allocation18_spill] sm:$0xff]  ;;  %vm6156_vm10 = vmmov %vm6123_vm0 }
 0x563   : > { %v1361_v24 = vsel %vm6123_vm0, %v4835_v7, %v1264_v45  ;;  %v1061_v55 = vsel %vm554_vm1, %v1039_v44, 0.0  ;;  %v875_v11 = vsel %vm870_vm3, %v6134_v0, %v778_v61  ;;  %v6136_v45 = vld [vmem:[#allocation20_spill] sm:$0xff]  ;;  %v6146_v0 = vld [vmem:[#allocation42_spill] sm:$0xff] }
 0x564   : > { %v5089_v22 = vsel %vm1452_vm8, %v1405_v31, %v1361_v24  ;;  %v969_v31 = vsel %vm967_vm11, %v6129_v1, %v872_v58 }
 0x565   : > { %1488 = vmax.xlane.f32.xlu2 %v1487_v51  ;;  %v1493_v7 = vsel %vm1477_vm9, %v5089_v22, -inf  ;;  %v1066_v15 = vsel %vm1064_vm12, %v6130_v42, %v969_v31  ;;  %v6143_v42 = vld [vmem:[#allocation37_spill] sm:$0xff] }
 0x566   : > { %v1430_v21 = vpop.xlane.xlu0 %1429  ;;  %v1163_v33 = vsel %vm1161_vm5, %v6131_v19, %v1066_v15  ;;  %v785_v15 = vsel %vm773_vm2, %v6143_v42, 0.0  ;;  %v6144_v19 = vld [vmem:[#allocation52_spill] sm:$0xff] }
 0x567   : > { %v1461_v29 = vsel %vm1452_vm8, %v1430_v21, %v1364_v63  ;;  %v1048_v53 = vpop.xlane.xlu1 %1047  ;;  %v1260_v16 = vsel %vm1258_vm6, %v4401_v3, %v1163_v33  ;;  %v972_v3 = vsel %vm967_vm11, %v6135_v34, %v875_v11  ;;  %v6145_v33 = vld [vmem:[#allocation38_spill] sm:$0xff]  ;;  %v786_v11 = vsel %vm773_vm2, %v6146_v0, 0.0 }
 0x568   : > { %2792 = vmatmul.msk.f32.vlgmr.msrb.gmra.mxu0 %vm1477_vm9, %v1461_v29  ;;  %v1148_v13 = vpop.xlane.xlu2 %1147  ;;  %v1357_v6 = vsel %vm6132_vm7, %v4654_v50, %v1260_v16  ;;  %v6138_v29 = vld [vmem:[#allocation41_spill] sm:$0xff]  ;;  %vm6159_vm7 = vmmov %vm6123_vm0 }
 0x569   : > { %v5132_v56 = vsel %vm1452_vm8, %v4867_v26, %v1357_v6  ;;  %v1069_v26 = vsel %vm1064_vm12, %v4086_v38, %v972_v3 }
 0x56a   : > { %1494 = vmax.xlane.f32.xlu1 %v1493_v7  ;;  %1062 = vadd.xlane.f32.xlu0 %v1061_v55  ;;  %v1481_v50 = vsel %vm1477_vm9, %v5132_v56, -inf  ;;  %v1166_v51 = vsel %vm1161_vm5, %v6082_v28, %v1069_v26  ;;  %v784_v7 = vsel %vm773_vm2, %v6138_v29, 0.0  ;;  %v6139_v55 = vld [vmem:[#allocation56_spill] sm:$0xff] }
 0x56b   : > { %v1263_v24 = vsel %vm1258_vm6, %v6136_v45, %v1166_v51  ;;  %v6147_v26 = vld [vmem:[#allocation60_spill] sm:$0xff]  ;;  %v6148_v45 = vld [vmem:[#allocation65_spill] sm:$0xff] }
 0x56c   : > { %v1360_v63 = vsel %vm6137_vm14, %v4628_v39, %v1263_v24  ;;  %v881_v39 = vsel %vm870_vm3, %v6139_v55, %v784_v7  ;;  %v883_v51 = vsel %vm870_vm3, %v6147_v26, %v786_v11  ;;  %vm1939_vm14 = vcmask 195584  }
 0x56d   : > { %1497 = vmax.xlane.f32.xlu2 %v1496_v52  ;;  %v5160_v54 = vsel %vm1452_vm8, %v4906_v23, %v1360_v63  ;;  %v1268_v52 = vsel %vm1258_vm6, %v1239_v20, %v4756_v2  ;;  %v6140_v23 = vld [vmem:[#allocation63_spill] sm:$0xff]  ;;  %v1499_v20 = vsel %vm1477_vm9, %v5182_v8, -inf }
 0x56e   : > { %v1490_v44 = vsel %vm1477_vm9, %v5160_v54, -inf  ;;  %v978_v25 = vsel %vm967_vm11, %v6140_v23, %v881_v39 }
 0x56f   : > { %v1242_v46 = vpop.xlane.xlu1 %1241  ;;  %v1075_v58 = vsel %vm1064_vm12, %v1048_v53, %v978_v25 }
 0x570   : > { %v1248_v49 = vpop.xlane.xlu2 %1247  ;;  %v1172_v1 = vsel %vm1161_vm5, %v5035_v18, %v1075_v58  ;;  %v882_v18 = vsel %vm870_vm3, %v6144_v19, %v785_v15  ;;  %v6153_v15 = vld [vmem:[#allocation54_spill] sm:$0xff] }
 0x571   : > { %v1269_v59 = vsel %vm1258_vm6, %v1242_v46, %v1172_v1  ;;  %v979_v16 = vsel %vm967_vm11, %v6145_v33, %v882_v18  ;;  %v6152_v1 = vld [vmem:[#allocation66_spill] sm:$0xff]  ;;  %v788_v19 = vsel %vm773_vm2, %v6153_v15, 0.0 }
 0x572   : > { %1353 = vadd.xlane.f32.xlu0 %v1352_v14  ;;  %v1366_v53 = vsel %vm6142_vm13, %v1339_v48, %v1269_v59  ;;  %v6154_v18 = vld [vmem:[#allocation30_spill] sm:$0xff] }
 0x573   : > { %v885_v33 = vsel %vm870_vm3, %v6154_v18, %v788_v19 }
 0x577   : > { %v1051_v38 = vpop.xlane.xlu1 %1050 }
 0x578   : > { %v1336_v28 = vpop.xlane.xlu2 %1335  ;;  %v1076_v4 = vsel %vm1064_vm12, %v1051_v38, %v979_v16 }
 0x579   : > { %v1365_v30 = vsel %vm6141_vm15, %v1336_v28, %v1268_v52  ;;  %v1173_v61 = vsel %vm1161_vm5, %v1148_v13, %v1076_v4  ;;  %v6155_v4 = vld [vmem:[#allocation67_spill] sm:$0xff] }
 0x57a   : > { %1482 = vmax.xlane.f32.xlu0 %v1481_v50  ;;  %v1270_v46 = vsel %vm1258_vm6, %v4892_v17, %v1173_v61  ;;  %v980_v17 = vsel %vm967_vm11, %v6148_v45, %v883_v51 }
 0x57b   : > { %v1077_v24 = vsel %vm1064_vm12, %v4899_v37, %v980_v17  ;;  %v6158_v17 = vld [vmem:[#allocation26_spill] sm:$0xff] }
 0x57f   : > { %v1436_v21 = vpop.xlane.xlu0 %1435  ;;  %v1151_v41 = vpop.xlane.xlu1 %1150 }
 0x580   : > { %v1463_v31 = vsel %vm1452_vm8, %v1436_v21, %v1366_v53  ;;  %v1057_v6 = vpop.xlane.xlu2 %1056  ;;  %v1174_v63 = vsel %vm1161_vm5, %v1151_v41, %v1077_v24 }
 0x581   : > { %v1271_v38 = vsel %vm1258_vm6, %v1248_v49, %v1174_v63 }
 0x582   : > { %1491 = vmax.xlane.f32.xlu0 %v1490_v44 }
 0x587   : > { %v1433_v5 = vpop.xlane.xlu0 %1432  ;;  %v1342_v14 = vpop.xlane.xlu1 %1341 }
 0x588   : > { %v1462_v2 = vsel %vm1452_vm8, %v1433_v5, %v1365_v30  ;;  %v1367_v34 = vsel %vm6123_vm0, %v1342_v14, %v1270_v46  ;;  %v6150_v30 = vld [vmem:[#allocation44_spill] sm:$0xff] }
 0x589   : > { %2793 = vmatmul.msk.f32.vlgmr.msra.gmra.mxu1 %vm1477_vm9, %v1462_v2  ;;  %v787_v49 = vsel %vm773_vm2, %v6150_v30, 0.0  ;;  %v6151_v2 = vld [vmem:[#allocation57_spill] sm:$0xff] }
 0x58a   : > { %1500 = vmax.xlane.f32.xlu0 %v1499_v20  ;;  %v884_v20 = vsel %vm870_vm3, %v6151_v2, %v787_v49 }
 0x58b   : > { %v981_v59 = vsel %vm967_vm11, %v6152_v1, %v884_v20 }
 0x58c   : > { %v1078_v53 = vsel %vm1064_vm12, %v1057_v6, %v981_v59 }
 0x58f   : > { %v1251_v48 = vpop.xlane.xlu1 %1250  ;;  %v1345_v21 = vpop.xlane.xlu0 %1344 }
 0x590   : > { %v1368_v44 = vsel %vm6149_vm4, %v1345_v21, %v1271_v38 }
 0x591   : > { %2794 = vmatmul.msk.f32.gmra.mxu1 %vm1477_vm9, %v1463_v31 }
 0x597   : > { %v1154_v52 = vpop.xlane.xlu0 %1153 }
 0x598   : > { %v1175_v14 = vsel %vm1161_vm5, %v1154_v52, %v1078_v53 }
 0x599   : > { %v1272_v16 = vsel %vm1258_vm6, %v1251_v48, %v1175_v14 }
 0x59f   : > { %v1254_v5 = vpop.xlane.xlu0 %1253 }
 0x5a0   : > { %v1442_v3 = vpop.xlane.xlu1 %1441 }
 0x5a1   : > { %v1465_v29 = vsel %vm1452_vm8, %v1442_v3, %v1368_v44  ;;  %v6160_v44 = vld [vmem:[#allocation68_spill] sm:$0xff] }
 0x5a8   : > { %v1439_v50 = vpop.xlane.xlu2 %1438  ;;  %v1060_v7 = vpop.xlane.xlu1 %1059 }
 0x5a9   : > { %v1464_v13 = vsel %vm1452_vm8, %v1439_v50, %v1367_v34 }
 0x5aa   : > { %2795 = vmatmul.msk.f32.gmra.mxu1 %vm1477_vm9, %v1464_v13 }
 0x5b0   : > { %v1348_v28 = vpop.xlane.xlu2 %1347  ;;  %v1351_v39 = vpop.xlane.xlu1 %1350 }
 0x5b1   : > { %v1369_v6 = vsel %vm6156_vm10, %v1348_v28, %v1272_v16 }
 0x5b2   : > { %2796 = vmatmul.msk.f32.gmra.mxu1 %vm1477_vm9, %v1465_v29 }
 0x5b8   : > { %v1157_v55 = vpop.xlane.xlu2 %1156  ;;  %v1160_v23 = vpop.xlane.xlu1 %1159 }
 0x5c0   : > { %v1448_v37 = vpop.xlane.xlu2 %1447 }
 0x5c8   : > { %v1257_v25 = vpop.xlane.xlu2 %1256 }
 0x5cd   : > { %v1451_v58 = vpop.xlane.xlu1 %1450 }
 0x5d0   : > { %v1480_v41 = vpop.xlane.xlu2 %1479 }
 0x5d1   : > { %v1502_v31 = vsub.f32 %v5000_v27, %v1480_v41  ;;  %v982_v27 = vsel %vm967_vm11, %v6155_v4, %v885_v33 }
 0x5d2   : > { %v1079_v0 = vsel %vm1064_vm12, %v1060_v7, %v982_v27 }
 0x5d3   : > { %v1510_v42 = vmul.f32 1.442695, %v1502_v31  ;;  %v1176_v48 = vsel %vm1161_vm5, %v1157_v55, %v1079_v0 }
 0x5d4   : > { %v1273_v51 = vsel %vm1258_vm6, %v1254_v5, %v1176_v48 }
 0x5d5   : > { %2946 = vpow2.f32 %v1510_v42  ;;  %v1486_v61 = vpop.xlane.xlu1 %1485  ;;  %v1445_v46 = vpop.xlane.xlu0 %1444  ;;  %v1370_v38 = vsel %vm6159_vm7, %v1351_v39, %v1273_v51 }
 0x5d6   : > { %v1504_v11 = vsub.f32 %v5043_v35, %v1486_v61  ;;  %v1466_v34 = vsel %vm1452_vm8, %v1445_v46, %v1369_v6  ;;  %v6157_v35 = vld [vmem:[#allocation55_spill] sm:$0xff]  ;;  %v1467_v7 = vsel %vm1452_vm8, %v1448_v37, %v1370_v38 }
 0x5d7   : > { %2797 = vmatmul.msk.f32.gmra.mxu1 %vm1477_vm9, %v1466_v34  ;;  %v789_v45 = vsel %vm773_vm2, %v6157_v35, 0.0  ;;  %vm6161_vm2 = vmmov %vm6123_vm0  ;;  %v1936_v38 = vld [vmem:[%s5914_s7] sm:$0xff] }
 0x5d8   : > { %v1489_v3 = vpop.xlane.xlu2 %1488  ;;  %v1514_v50 = vmul.f32 1.442695, %v1504_v11  ;;  %v886_v24 = vsel %vm870_vm3, %v6158_v17, %v789_v45 }
 0x5d9   : > { %v983_v28 = vsel %vm967_vm11, %v6160_v44, %v886_v24  ;;  %v1505_v2 = vsub.f32 %v5062_v36, %v1489_v3  ;;  %v1938_v24 = vld [vmem:[%s5914_s7 + $0x10] sm:$0xff] }
 0x5da   : > { %2948 = vpow2.f32 %v1514_v50  ;;  %1977 = vmatpush.msra.mxu2 %v1938_v24  ;;  %2831 = vmatpush.msra.mxu3 %v1938_v24 }
 0x5db   : > { %v5278_v26 = vpop.eup %2946  ;;  %v1516_v59 = vmul.f32 1.442695, %v1505_v2 }
 0x5dc   : > { %v1526_v13 = vsel %vm1477_vm9, %v5278_v26, 0.0 }
 0x5dd   : > { %1527 = vadd.xlane.f32.xlu1 %v1526_v13  ;;  %v1495_v63 = vpop.xlane.xlu1 %1494  ;;  %v1063_v21 = vpop.xlane.xlu0 %1062 }
 0x5de   : > { %v1507_v29 = vsub.f32 %v5089_v22, %v1495_v63  ;;  %v1080_v55 = vsel %vm1064_vm12, %v1063_v21, %v983_v28  ;;  %v1937_v63 = vld [vmem:[%s5914_s7 + $0x8] sm:$0xff] }
 0x5df   : > { %2798 = vmatmul.msk.f32.gmra.mxu1 %vm1477_vm9, %v1467_v7  ;;  %v1177_v22 = vsel %vm1161_vm5, %v1160_v23, %v1080_v55  ;;  %1978 = vmatpush.msra.mxu2 %v1937_v63 }
 0x5e0   : > { %v1498_v52 = vpop.xlane.xlu2 %1497  ;;  %v5301_v30 = vpop.eup %2948  ;;  %v1520_v49 = vmul.f32 1.442695, %v1507_v29  ;;  %v1274_v20 = vsel %vm1258_vm6, %v1257_v25, %v1177_v22  ;;  %2832 = vmatpush.msra.mxu3 %v1937_v63 }
 0x5e1   : > { %v1508_v39 = vsub.f32 %v4880_v12, %v1498_v52  ;;  %v1532_v5 = vsel %vm1477_vm9, %v5301_v30, 0.0  ;;  %1979 = vmatpush.msra.mxu2 %v1936_v38 }
 0x5e2   : > { %2950 = vpow2.f32 %v1520_v49  ;;  %1533 = vadd.xlane.f32.xlu0 %v1532_v5  ;;  %2833 = vmatpush.msra.mxu3 %v1936_v38 }
 0x5e3   : > { %v1522_v37 = vmul.f32 1.442695, %v1508_v39 }
 0x5e5   : > { %2952 = vpow2.f32 %v1522_v37  ;;  %v1354_v1 = vpop.xlane.xlu0 %1353 }
 0x5e6   : > { %v1371_v12 = vsel %vm6161_vm2, %v1354_v1, %v1274_v20  ;;  %2954 = vpow2.f32 %v1516_v59 }
 0x5e7   : > { %v1468_v41 = vsel %vm1452_vm8, %v1451_v58, %v1371_v12 }
 0x5e8   : > { %v5315_v53 = vpop.eup %2950  ;;  %2799 = vmatmul.msk.f32.gmra.mxu1 %vm1477_vm9, %v1468_v41 }
 0x5e9   : > { %v1541_v36 = vsel %vm1477_vm9, %v5315_v53, 0.0 }
 0x5ea   : > { %1542 = vadd.xlane.f32.xlu0 %v1541_v36 }
 0x5eb   : > { %v5320_v23 = vpop.eup %2952 }
 0x5ec   : > { %v1544_v25 = vsel %vm1477_vm9, %v5320_v23, 0.0  ;;  %v5325_v10 = vpop.eup %2954 }
 0x5ed   : > { %1545 = vadd.xlane.f32.xlu1 %v1544_v25  ;;  %v1483_v31 = vpop.xlane.xlu0 %1482  ;;  %v1535_v42 = vsel %vm1477_vm9, %v5325_v10, 0.0 }
 0x5ee   : > { %v1503_v14 = vsub.f32 %v5132_v56, %v1483_v31 }
 0x5f0   : > { %v1512_v58 = vmul.f32 1.442695, %v1503_v14 }
 0x5f2   : > { %2956 = vpow2.f32 %v1512_v58 }
 0x5f5   : > { %1536 = vadd.xlane.f32.xlu1 %v1535_v42  ;;  %v1492_v15 = vpop.xlane.xlu0 %1491 }
 0x5f6   : > { %v1506_v19 = vsub.f32 %v5160_v54, %v1492_v15 }
 0x5f8   : > { %v5330_v18 = vpop.eup %2956  ;;  %v1518_v33 = vmul.f32 1.442695, %v1506_v19 }
 0x5f9   : > { %v1529_v16 = vsel %vm1477_vm9, %v5330_v18, 0.0 }
 0x5fa   : > { %2958 = vpow2.f32 %v1518_v33  ;;  %1530 = vadd.xlane.f32.xlu2 %v1529_v16 }
 0x5fd   : > { %v1501_v56 = vpop.xlane.xlu0 %1500 }
 0x5fe   : > { %v1509_v4 = vsub.f32 %v5182_v8, %v1501_v56  ;;  %v5347_v8 = vpop.f32.mrf.mxu0 }
 0x5ff   : > { %v2800_v3 = vmul.f32 -1.442695, %v5347_v8 }
 0x600   : > { %v5335_v27 = vpop.eup %2958  ;;  %v1524_v6 = vmul.f32 1.442695, %v1509_v4 }
 0x601   : > { %v1538_v61 = vsel %vm1477_vm9, %v5335_v27, 0.0 }
 0x602   : > { %2960 = vpow2.f32 %v1524_v6  ;;  %1539 = vadd.xlane.f32.xlu2 %v1538_v61 }
 0x603   : > { %2962 = vpow2.f32 %v2800_v3 }
 0x606   : > { %v5339_v54 = vpop.f32.mrf.mxu1 }
 0x607   : > { %1906 = vrot.lane.b32.xlu0 %v5339_v54, %s3085_s30  ;;  %v2801_v50 = vmul.f32 -1.442695, %v5339_v54 }
 0x608   : > { %v5343_v46 = vpop.eup %2960 }
 0x609   : > { %v1547_v0 = vsel %vm1477_vm9, %v5343_v46, 0.0  ;;  %v2963_v13 = vpop.eup %2962  ;;  %2964 = vpow2.f32 %v2801_v50 }
 0x60a   : > { %1548 = vadd.xlane.f32.xlu1 %v1547_v0  ;;  %v1760_v35 = vadd.f32 1.0, %v2963_v13 }
 0x60c   : > { %2966 = vrcp.f32 %v1760_v35  ;;  %v1779_v41 = vand.u32 2147483648, %v1760_v35  ;;  %vm1773_vm3 = vweird.f32 %v1760_v35  ;;  %v1777_v25 = vand.u32 2147483647, %v1760_v35 }
 0x60e   : > { %v5351_v11 = vpop.f32.mrf.mxu1  ;;  %v1780_v15 = vor.u32 1.1754944e-38, %v1779_v41  ;;  %vm1778_vm12 = vcmp.eq.f32.partialorder %v1777_v25, 8.507059e+37 }
 0x60f   : > { %v2965_v17 = vpop.eup %2964  ;;  %v2802_v28 = vmul.f32 -1.442695, %v5351_v11 }
 0x610   : > { %v1761_v21 = vadd.f32 1.0, %v2965_v17 }
 0x612   : > { %v2967_v44 = vpop.eup %2966  ;;  %2968 = vrcp.f32 %v1761_v21  ;;  %v1794_v61 = vand.u32 2147483648, %v1761_v21  ;;  %vm1788_vm8 = vweird.f32 %v1761_v21  ;;  %v1792_v0 = vand.u32 2147483647, %v1761_v21 }
 0x613   : > { %v1769_v7 = vmul.f32 %v2967_v44, %v1760_v35  ;;  %2970 = vpow2.f32 %v2802_v28  ;;  %vm1774_vm6 = vweird.f32 %v2967_v44 }
 0x614   : > { %vm1775_vm11 = vmor %vm1773_vm3, %vm1774_vm6  ;;  %v1795_v38 = vor.u32 1.1754944e-38, %v1794_v61  ;;  %vm1793_vm15 = vcmp.eq.f32.partialorder %v1792_v0, 8.507059e+37 }
 0x615   : > { %v1770_v55 = vsub.f32 1.0, %v1769_v7 }
 0x617   : > { %v1771_v22 = vmul.f32 %v2967_v44, %v1770_v55 }
 0x618   : > { %v2969_v52 = vpop.eup %2968 }
 0x619   : > { %v2971_v5 = vpop.eup %2970  ;;  %v1784_v2 = vmul.f32 %v2969_v52, %v1761_v21  ;;  %v1772_v59 = vadd.f32 %v2967_v44, %v1771_v22  ;;  %vm1789_vm5 = vweird.f32 %v2969_v52 }
 0x61a   : > { %1904 = vrot.lane.b32.xlu2 %v5347_v8, %s3085_s30  ;;  %v5390_v37 = vadd.f32 1.0, %v2971_v5  ;;  %vm1790_vm9 = vmor %vm1788_vm8, %vm1789_vm5 }
 0x61b   : > { %v1785_v1 = vsub.f32 1.0, %v1784_v2  ;;  %v1776_v42 = vsel %vm1775_vm11, %v2967_v44, %v1772_v59 }
 0x61c   : > { %v1781_v33 = vsel %vm1778_vm12, %v1780_v15, %v1776_v42  ;;  %v1809_v25 = vand.u32 2147483648, %v5390_v37  ;;  %vm1803_vm0 = vweird.f32 %v5390_v37 }
 0x61d   : > { %v1786_v58 = vmul.f32 %v2969_v52, %v1785_v1  ;;  %v1888_v3 = vmul.f32 %v1781_v33, %v5347_v8 }
 0x61f   : > { %v1787_v16 = vadd.f32 %v2969_v52, %v1786_v58 }
 0x621   : > { %v1791_v17 = vsel %vm1790_vm9, %v2969_v52, %v1787_v16  ;;  %v1810_v16 = vor.u32 1.1754944e-38, %v1809_v25 }
 0x622   : > { %v1796_v21 = vsel %vm1793_vm15, %v1795_v38, %v1791_v17 }
 0x623   : > { %1908 = vrot.lane.b32.xlu1 %v5351_v11, %s3085_s30  ;;  %v1889_v55 = vmul.f32 %v1796_v21, %v5339_v54  ;;  %v1807_v54 = vand.u32 2147483647, %v5390_v37 }
 0x625   : > { %vm1808_vm10 = vcmp.eq.f32.partialorder %v1807_v54, 8.507059e+37 }
 0x627   : > { %v5355_v34 = vpop.f32.mrf.mxu1 }
 0x628   : > { %1910 = vrot.lane.b32.xlu2 %v5355_v34, %s3085_s30  ;;  %v2803_v49 = vmul.f32 -1.442695, %v5355_v34 }
 0x62a   : > { %2972 = vpow2.f32 %v2803_v49 }
 0x62b   : > { %2974 = vrcp.f32 %v5390_v37 }
 0x62f   : > { %v5359_v48 = vpop.f32.mrf.mxu1 }
 0x630   : > { %1912 = vrot.lane.b32.xlu0 %v5359_v48, %s3085_s30  ;;  %v2804_v36 = vmul.f32 -1.442695, %v5359_v48  ;;  %v2973_v14 = vpop.eup %2972 }
 0x631   : > { %v5400_v19 = vadd.f32 1.0, %v2973_v14  ;;  %v2975_v56 = vpop.eup %2974 }
 0x632   : > { %2976 = vpow2.f32 %v2804_v36  ;;  %v1799_v63 = vmul.f32 %v2975_v56, %v5390_v37  ;;  %vm1804_vm13 = vweird.f32 %v2975_v56 }
 0x633   : > { %2978 = vrcp.f32 %v5400_v19  ;;  %vm1805_vm4 = vmor %vm1803_vm0, %vm1804_vm13  ;;  %v1824_v37 = vand.u32 2147483648, %v5400_v19  ;;  %vm1818_vm2 = vweird.f32 %v5400_v19 }
 0x634   : > { %v1800_v8 = vsub.f32 1.0, %v1799_v63 }
 0x635   : > { %v1825_v38 = vor.u32 1.1754944e-38, %v1824_v37 }
 0x636   : > { %v1801_v2 = vmul.f32 %v2975_v56, %v1800_v8 }
 0x638   : > { %v2977_v13 = vpop.eup %2976  ;;  %v1802_v59 = vadd.f32 %v2975_v56, %v1801_v2 }
 0x639   : > { %v5411_v44 = vadd.f32 1.0, %v2977_v13  ;;  %v2979_v28 = vpop.eup %2978 }
 0x63a   : > { %v1814_v5 = vmul.f32 %v2979_v28, %v5400_v19  ;;  %v1806_v42 = vsel %vm1805_vm4, %v2975_v56, %v1802_v59  ;;  %vm1819_vm7 = vweird.f32 %v2979_v28 }
 0x63b   : > { %v1811_v61 = vsel %vm1808_vm10, %v1810_v16, %v1806_v42  ;;  %vm1820_vm6 = vmor %vm1818_vm2, %vm1819_vm7  ;;  %vm1833_vm12 = vweird.f32 %v5411_v44 }
 0x63c   : > { %v1815_v1 = vsub.f32 1.0, %v1814_v5  ;;  %v1890_v56 = vmul.f32 %v1811_v61, %v5351_v11  ;;  %v1839_v11 = vand.u32 2147483648, %v5411_v44  ;;  %v1837_v5 = vand.u32 2147483647, %v5411_v44 }
 0x63e   : > { %v1816_v58 = vmul.f32 %v2979_v28, %v1815_v1  ;;  %v1840_v25 = vor.u32 1.1754944e-38, %v1839_v11  ;;  %vm1838_vm8 = vcmp.eq.f32.partialorder %v1837_v5, 8.507059e+37 }
 0x640   : > { %v1817_v0 = vadd.f32 %v2979_v28, %v1816_v58 }
 0x642   : > { %v1821_v17 = vsel %vm1820_vm6, %v2979_v28, %v1817_v0 }
 0x650   : > { %v5394_v12 = vpop.xlane.xlu1 %1527 }
 0x654   : > { %v5365_v51 = vpop.f32.mrf.mxu1 }
 0x655   : > { %1914 = vrot.lane.b32.xlu2 %v5365_v51, %s3085_s30  ;;  %v5392_v20 = vpop.xlane.xlu0 %1533  ;;  %v2805_v35 = vmul.f32 -1.442695, %v5365_v51 }
 0x657   : > { %2980 = vpow2.f32 %v2805_v35 }
 0x658   : > { %2982 = vrcp.f32 %v5411_v44 }
 0x65c   : > { %v5369_v45 = vpop.f32.mrf.mxu1 }
 0x65d   : > { %1916 = vrot.lane.b32.xlu0 %v5369_v45, %s3085_s30  ;;  %v5402_v4 = vpop.xlane.xlu0 %1542  ;;  %v2981_v22 = vpop.eup %2980 }
 0x65e   : > { %v2983_v41 = vpop.eup %2982  ;;  %v5419_v36 = vadd.f32 1.0, %v2981_v22  ;;  %v2806_v22 = vmul.f32 -1.442695, %v5369_v45 }
 0x65f   : > { %v1829_v15 = vmul.f32 %v2983_v41, %v5411_v44  ;;  %vm1834_vm11 = vweird.f32 %v2983_v41 }
 0x660   : > { %v5404_v6 = vpop.xlane.xlu1 %1545  ;;  %2984 = vrcp.f32 %v5419_v36  ;;  %vm1835_vm5 = vmor %vm1833_vm12, %vm1834_vm11  ;;  %v1854_v44 = vand.u32 2147483648, %v5419_v36  ;;  %vm1848_vm15 = vweird.f32 %v5419_v36 }
 0x662   : > { %v1855_v37 = vor.u32 1.1754944e-38, %v1854_v44 }
 0x665   : > { %v5383_v29 = vpop.f32.mrf.mxu1 }
 0x666   : > { %1918 = vrot.lane.b32.xlu2 %v5383_v29, %s3085_s30  ;;  %v2807_v33 = vmul.f32 -1.442695, %v5383_v29  ;;  %v2985_v13 = vpop.eup %2984 }
 0x667   : > { %v1844_v21 = vmul.f32 %v2985_v13, %v5419_v36  ;;  %vm1849_vm9 = vweird.f32 %v2985_v13 }
 0x668   : > { %v5415_v49 = vpop.xlane.xlu1 %1536  ;;  %2986 = vpow2.f32 %v2807_v33  ;;  %vm1850_vm13 = vmor %vm1848_vm15, %vm1849_vm9 }
 0x669   : > { %v1845_v2 = vsub.f32 1.0, %v1844_v21 }
 0x66b   : > { %v1846_v54 = vmul.f32 %v2985_v13, %v1845_v2 }
 0x66d   : > { %v5388_v39 = vpop.xlane.xlu2 %1530 }
 0x66e   : > { %v2987_v8 = vpop.eup %2986 }
 0x675   : > { %v5398_v31 = vpop.xlane.xlu2 %1539 }
 0x679   : > { %v1907_v7 = vpop.permute.xlu0 %1906 }
 0x67a   : > { %v1929_v52 = vmul.f32 %v1907_v7, %v1889_v55 }
 0x67d   : > { %v1905_v50 = vpop.permute.xlu2 %1904  ;;  %v5424_v14 = vpop.xlane.xlu1 %1548 }
 0x67e   : > { %v1928_v24 = vmul.f32 %v1905_v50, %v1888_v3  ;;  %v1830_v3 = vsub.f32 1.0, %v1829_v15  ;;  %v1822_v50 = vand.u32 2147483647, %v5400_v19  ;;  %v1767_v19 = vadd.f32 1.0, %v2987_v8 }
 0x680   : > { %2808 = vmatmul.msk.f32.vlgmr.msra.gmra.mxu2 %vm1939_vm14, %v1928_v24  ;;  %v1831_v63 = vmul.f32 %v2983_v41, %v1830_v3  ;;  %vm1823_vm3 = vcmp.eq.f32.partialorder %v1822_v50, 8.507059e+37  ;;  %2988 = vrcp.f32 %v1767_v19  ;;  %v1884_v21 = vand.u32 2147483648, %v1767_v19 }
 0x681   : > { %v1826_v7 = vsel %vm1823_vm3, %v1825_v38, %v1821_v17  ;;  %2990 = vpow2.f32 %v2806_v22  ;;  %vm1878_vm10 = vweird.f32 %v1767_v19 }
 0x682   : > { %v1832_v55 = vadd.f32 %v2983_v41, %v1831_v63  ;;  %v1891_v28 = vmul.f32 %v1826_v7, %v5355_v34  ;;  %v1847_v34 = vadd.f32 %v2985_v13, %v1846_v54 }
 0x684   : > { %v1836_v59 = vsel %vm1835_vm5, %v2983_v41, %v1832_v55  ;;  %v1852_v41 = vand.u32 2147483647, %v5419_v36  ;;  %v1851_v0 = vsel %vm1850_vm13, %v2985_v13, %v1847_v34  ;;  %v1882_v13 = vand.u32 2147483647, %v1767_v19 }
 0x685   : > { %v1841_v58 = vsel %vm1838_vm8, %v1840_v25, %v1836_v59  ;;  %v1885_v55 = vor.u32 1.1754944e-38, %v1884_v21  ;;  %v3087_v34 = vmov 4   ;;  %vm1555_vm5 = vweird.f32 %v5394_v12 }
 0x686   : > { %v1892_v15 = vmul.f32 %v1841_v58, %v5359_v48  ;;  %v2989_v33 = vpop.eup %2988  ;;  %vm1853_vm0 = vcmp.eq.f32.partialorder %v1852_v41, 8.507059e+37  ;;  %vm1883_vm2 = vcmp.eq.f32.partialorder %v1882_v13, 8.507059e+37  ;;  %2888 = vset.pattern.permute.xlu0 %v3087_v34  ;;  %vm1570_vm13 = vweird.f32 %v5388_v39 }
 0x687   : > { %v2991_v61 = vpop.eup %2990  ;;  %v1874_v3 = vmul.f32 %v2989_v33, %v1767_v19  ;;  %v1856_v48 = vsel %vm1853_vm0, %v1855_v37, %v1851_v0  ;;  %vm1879_vm4 = vweird.f32 %v2989_v33  ;;  %v1561_v37 = vand.u32 2147483648, %v5394_v12 }
 0x688   : > { %2809 = vmatmul.msk.f32.gmra.mxu2 %vm1939_vm14, %v1929_v52  ;;  %v1911_v52 = vpop.permute.xlu2 %1910  ;;  %v1766_v50 = vadd.f32 1.0, %v2991_v61  ;;  %vm1880_vm7 = vmor %vm1878_vm10, %vm1879_vm4 }
 0x689   : > { %v1931_v1 = vmul.f32 %v1911_v52, %v1891_v28 }
 0x68a   : > { %2992 = vrcp.f32 %v1766_v50  ;;  %vm1863_vm3 = vweird.f32 %v1766_v50  ;;  %v1867_v59 = vand.u32 2147483647, %v1766_v50 }
 0x68b   : > { %2994 = vrcp.f32 %v5394_v12 }
 0x68c   : > { %vm1868_vm12 = vcmp.eq.f32.partialorder %v1867_v59, 8.507059e+37  ;;  %2996 = vrcp.f32 %v5388_v39  ;;  %v1589_v59 = vand.u32 2147483647, %v5392_v20 }
 0x68d   : > { %2998 = vrcp.f32 %v5392_v20 }
 0x68e   : > { %3000 = vrcp.f32 %v5402_v4 }
 0x68f   : > { %3002 = vrcp.f32 %v5415_v49 }
 0x690   : > { %v2993_v36 = vpop.eup %2992  ;;  %3004 = vrcp.f32 %v5404_v6 }
 0x691   : > { %v1859_v8 = vmul.f32 %v2993_v36, %v1766_v50  ;;  %vm1864_vm6 = vweird.f32 %v2993_v36  ;;  %v2995_v44 = vpop.eup %2994  ;;  %3006 = vrcp.f32 %v5398_v31 }
 0x692   : > { %vm1865_vm11 = vmor %vm1863_vm3, %vm1864_vm6  ;;  %v2997_v41 = vpop.eup %2996  ;;  %vm1590_vm6 = vcmp.eq.f32.partialorder %v1589_v59, 8.507059e+37  ;;  %v1649_v59 = vand.u32 2147483647, %v5404_v6  ;;  %3008 = vrcp.f32 %v5424_v14 }
 0x693   : > { %v1860_v11 = vsub.f32 1.0, %v1859_v8  ;;  %v1566_v61 = vmul.f32 %v2997_v41, %v5388_v39  ;;  %vm1571_vm15 = vweird.f32 %v2997_v41 }
 0x694   : > { %vm1572_vm0 = vmor %vm1570_vm13, %vm1571_vm15 }
 0x695   : > { %v1909_v35 = vpop.permute.xlu1 %1908  ;;  %v1861_v5 = vmul.f32 %v2993_v36, %v1860_v11  ;;  %v1567_v0 = vsub.f32 1.0, %v1566_v61 }
 0x696   : > { %v1930_v24 = vmul.f32 %v1909_v35, %v1890_v56  ;;  %v1875_v56 = vsub.f32 1.0, %v1874_v3  ;;  %v1893_v35 = vmul.f32 %v1856_v48, %v5365_v51 }
 0x697   : > { %v1862_v22 = vadd.f32 %v2993_v36, %v1861_v5  ;;  %v1568_v48 = vmul.f32 %v2997_v41, %v1567_v0  ;;  %v3088_v5 = vmov 1  }
 0x698   : > { %2810 = vmatmul.msk.f32.gmra.mxu2 %vm1939_vm14, %v1930_v24  ;;  %v1876_v63 = vmul.f32 %v2989_v33, %v1875_v56 }
 0x699   : > { %v1866_v19 = vsel %vm1865_vm11, %v2993_v36, %v1862_v22  ;;  %vm1630_vm11 = vweird.f32 %v5402_v4 }
 0x69a   : > { %v1877_v38 = vadd.f32 %v2989_v33, %v1876_v63  ;;  %v1576_v63 = vand.u32 2147483648, %v5388_v39 }
 0x69c   : > { %v1881_v7 = vsel %vm1880_vm7, %v2989_v33, %v1877_v38  ;;  %v1551_v33 = vmul.f32 %v2995_v44, %v5394_v12  ;;  %v1574_v38 = vand.u32 2147483647, %v5388_v39  ;;  %v1577_v8 = vor.u32 1.1754944e-38, %v1576_v63 }
 0x69d   : > { %v1886_v52 = vsel %vm1883_vm2, %v1885_v55, %v1881_v7  ;;  %v2999_v7 = vpop.eup %2998  ;;  %vm1585_vm7 = vweird.f32 %v5392_v20 }
 0x69e   : > { %v1895_v51 = vmul.f32 %v1886_v52, %v5383_v29  ;;  %v3086_v29 = vmov 6   ;;  %vm1575_vm4 = vcmp.eq.f32.partialorder %v1574_v38, 8.507059e+37  ;;  %v1581_v52 = vmul.f32 %v2999_v7, %v5392_v20 }
 0x69f   : > { %2890 = vset.pattern.permute.xlu2 %v3086_v29  ;;  %vm1586_vm10 = vweird.f32 %v2999_v7 }
 0x6a0   : > { %2811 = vmatmul.msk.f32.gmra.mxu2 %vm1939_vm14, %v1931_v1  ;;  %v1869_v1 = vand.u32 2147483648, %v1766_v50  ;;  %v1559_v50 = vand.u32 2147483647, %v5394_v12  ;;  %vm1587_vm2 = vmor %vm1585_vm7, %vm1586_vm10  ;;  %vm1650_vm10 = vcmp.eq.f32.partialorder %v1649_v59, 8.507059e+37 }
 0x6a2   : > { %v1913_v42 = vpop.permute.xlu0 %1912  ;;  %v1870_v25 = vor.u32 1.1754944e-38, %v1869_v1  ;;  %vm1560_vm9 = vcmp.eq.f32.partialorder %v1559_v50, 8.507059e+37  ;;  %v3089_v1 = vmov 7  }
 0x6a3   : > { %v1932_v16 = vmul.f32 %v1913_v42, %v1892_v15 }
 0x6a4   : > { %v1871_v54 = vsel %vm1868_vm12, %v1870_v25, %v1866_v19  ;;  %v3090_v19 = vmov 2  }
 0x6a5   : > { %v1894_v58 = vmul.f32 %v1871_v54, %v5369_v45 }
 0x6a8   : > { %2812 = vmatmul.msk.f32.gmra.mxu2 %vm1939_vm14, %v1932_v16  ;;  %v1552_v16 = vsub.f32 1.0, %v1551_v33  ;;  %v3092_v33 = vmov 5  }
 0x6aa   : > { %v1553_v45 = vmul.f32 %v2995_v44, %v1552_v16 }
 0x6ac   : > { %v1554_v3 = vadd.f32 %v2995_v44, %v1553_v45 }
 0x6af   : > { %v1915_v17 = vpop.permute.xlu2 %1914 }
 0x6b0   : > { %v1933_v24 = vmul.f32 %v1915_v17, %v1893_v35  ;;  %v1562_v35 = vor.u32 1.1754944e-38, %v1561_v37 }
 0x6b2   : > { %2813 = vmatmul.msk.f32.gmra.mxu2 %vm1939_vm14, %v1933_v24  ;;  %v1569_v24 = vadd.f32 %v2997_v41, %v1568_v48 }
 0x6b4   : > { %v1573_v13 = vsel %vm1572_vm0, %v2997_v41, %v1569_v24  ;;  %vm1645_vm0 = vweird.f32 %v5404_v6 }
 0x6b5   : > { %v1578_v55 = vsel %vm1575_vm4, %v1577_v8, %v1573_v13  ;;  %v1606_v8 = vand.u32 2147483648, %v5415_v49 }
 0x6c0   : > { %v1919_v28 = vpop.permute.xlu2 %1918 }
 0x6c1   : > { %v1935_v2 = vmul.f32 %v1919_v28, %v1895_v51  ;;  %v1582_v51 = vsub.f32 1.0, %v1581_v52  ;;  %v6162_v28 = vmov 0   ;;  %v1604_v52 = vand.u32 2147483647, %v5415_v49 }
 0x6c3   : > { %2815 = vmatmul.msk.f32.vlgmr.msra.gmra.mxu3 %vm1939_vm14, %v1935_v2  ;;  %v1583_v2 = vmul.f32 %v2999_v7, %v1582_v51  ;;  %vm1605_vm15 = vcmp.eq.f32.partialorder %v1604_v52, 8.507059e+37 }
 0x6c5   : > { %v1584_v22 = vadd.f32 %v2999_v7, %v1583_v2  ;;  %v1607_v2 = vor.u32 1.1754944e-38, %v1606_v8  ;;  %v1664_v8 = vand.u32 2147483647, %v5424_v14 }
 0x6c7   : > { %v1588_v25 = vsel %vm1587_vm2, %v2999_v7, %v1584_v22  ;;  %vm1615_vm2 = vweird.f32 %v5398_v31 }
 0x6cf   : > { %v1917_v42 = vpop.permute.xlu0 %1916 }
 0x6d0   : > { %v1934_v15 = vmul.f32 %v1917_v42, %v1894_v58 }
 0x6d2   : > { %2814 = vmatmul.msk.f32.gmra.mxu2 %vm1939_vm14, %v1934_v15  ;;  %vm1556_vm14 = vweird.f32 %v2995_v44 }
 0x6d3   : > { %vm1557_vm8 = vmor %vm1555_vm5, %vm1556_vm14 }
 0x6d4   : > { %v1558_v56 = vsel %vm1557_vm8, %v2995_v44, %v1554_v3  ;;  %v3091_v44 = vmov 3   ;;  %vm1600_vm8 = vweird.f32 %v5415_v49 }
 0x6d5   : > { %v1563_v17 = vsel %vm1560_vm9, %v1562_v35, %v1558_v56  ;;  %v1636_v35 = vand.u32 2147483648, %v5402_v4 }
 0x6d6   : > { %v1564_v36 = vmul.f32 %v5278_v26, %v1563_v17  ;;  %v1579_v26 = vmul.f32 %v5330_v18, %v1578_v55  ;;  %v1591_v18 = vand.u32 2147483648, %v5392_v20  ;;  %v1634_v17 = vand.u32 2147483647, %v5402_v4 }
 0x6d7   : > { %v1637_v38 = vor.u32 1.1754944e-38, %v1636_v35 }
 0x6d8   : > { %v1592_v54 = vor.u32 1.1754944e-38, %v1591_v18  ;;  %vm1635_vm14 = vcmp.eq.f32.partialorder %v1634_v17, 8.507059e+37  ;;  %v1651_v18 = vand.u32 2147483648, %v5404_v6 }
 0x6da   : > { %v1593_v58 = vsel %vm1590_vm6, %v1592_v54, %v1588_v25 }
 0x6db   : > { %v1594_v15 = vmul.f32 %v5301_v30, %v1593_v58  ;;  %v3001_v30 = vpop.eup %3000  ;;  %v1652_v58 = vor.u32 1.1754944e-38, %v1651_v18 }
 0x6dc   : > { %v1626_v16 = vmul.f32 %v3001_v30, %v5402_v4  ;;  %v3003_v61 = vpop.eup %3002  ;;  %vm1631_vm3 = vweird.f32 %v3001_v30 }
 0x6dd   : > { %v1596_v3 = vmul.f32 %v3003_v61, %v5415_v49  ;;  %v3005_v37 = vpop.eup %3004  ;;  %vm1632_vm12 = vmor %vm1630_vm11, %vm1631_vm3  ;;  %vm1601_vm5 = vweird.f32 %v3003_v61  ;;  %vm2357_vm11 = vcmp.eq.s32.totalorder %v4838_v47, 7 }
 0x6de   : > { %v1627_v45 = vsub.f32 1.0, %v1626_v16  ;;  %v1641_v24 = vmul.f32 %v3005_v37, %v5404_v6  ;;  %vm1602_vm9 = vmor %vm1600_vm8, %vm1601_vm5  ;;  %vm1646_vm13 = vweird.f32 %v3005_v37  ;;  %vm6163_vm5 = vcmask 261120  }
 0x6df   : > { %v1597_v48 = vsub.f32 1.0, %v1596_v3  ;;  %vm1647_vm4 = vmor %vm1645_vm0, %vm1646_vm13  ;;  %vm1660_vm8 = vweird.f32 %v5424_v14  ;;  %vm1665_vm13 = vcmp.eq.f32.partialorder %v1664_v8, 8.507059e+37 }
 0x6e0   : > { %v1628_v0 = vmul.f32 %v3001_v30, %v1627_v45  ;;  %v1642_v4 = vsub.f32 1.0, %v1641_v24  ;;  %vm6164_vm0 = vmmov %vm6163_vm5 }
 0x6e2   : > { %v1629_v50 = vadd.f32 %v3001_v30, %v1628_v0  ;;  %v1643_v55 = vmul.f32 %v3005_v37, %v1642_v4  ;;  %v2483_v4 = vld [vmem:[%s5915_s8] sm:$0xff] }
 0x6e4   : > { %v1633_v63 = vsel %vm1632_vm12, %v3001_v30, %v1629_v50  ;;  %v1644_v49 = vadd.f32 %v3005_v37, %v1643_v55  ;;  %vm2246_vm12 = vcmp.eq.s32.totalorder %v4873_v57, 5 }
 0x6e6   : > { %v1648_v54 = vsel %vm1647_vm4, %v3005_v37, %v1644_v49  ;;  %vm2245_vm4 = vcmp.eq.s32.totalorder %v4838_v47, 5 }
 0x703   : > { %v1981_v21 = vpop.f32.mrf.mxu2 }
 0x704   : > { %v5466_v12 = vmul.f32 %v1981_v21, %v1564_v36  ;;  %v1598_v36 = vmul.f32 %v3003_v61, %v1597_v48  ;;  %v1638_v21 = vsel %vm1635_vm14, %v1637_v38, %v1633_v63 }
 0x705   : > { %v1639_v7 = vmul.f32 %v5315_v53, %v1638_v21 }
 0x706   : > { %2366 = vperm.xlu2 %2890, %v5466_v12   ;;  %2254 = vperm.xlu0 %2888, %v5466_v12  }
 0x707   : > { %2023 = vperm.xlu1 %2884, %v5466_v12  }
 0x70b   : > { %v1984_v39 = vpop.f32.mrf.mxu2 }
 0x70c   : > { %v5473_v11 = vmul.f32 %v1984_v39, %v1579_v26  ;;  %v3007_v26 = vpop.eup %3006 }
 0x70d   : > { %v1611_v53 = vmul.f32 %v3007_v26, %v5398_v31  ;;  %vm1616_vm7 = vweird.f32 %v3007_v26  ;;  %v3009_v3 = vpop.eup %3008 }
 0x70e   : > { %2896 = vset.pattern.permute.xlu2 %v3087_v34  ;;  %2892 = vset.pattern.permute.xlu0 %v6162_v28  ;;  %vm1617_vm6 = vmor %vm1615_vm2, %vm1616_vm7  ;;  %v1656_v35 = vmul.f32 %v3009_v3, %v5424_v14  ;;  %vm1661_vm14 = vweird.f32 %v3009_v3  ;;  %vm2015_vm7 = vcmp.eq.s32.totalorder %v4863_v60, 1  ;;  %vm2077_vm2 = vcmp.eq.s32.totalorder %v4838_v47, 2 }
 0x70f   : > { %2885 = vset.pattern.permute.xlu1 %v3088_v5  ;;  %2258 = vperm.xlu2 %2896, %v5473_v11   ;;  %v1612_v25 = vsub.f32 1.0, %v1611_v53 }
 0x710   : > { %2086 = vperm.xlu1 %2885, %v5466_v12   ;;  %2028 = vperm.xlu0 %2892, %v5473_v11   ;;  %v1657_v24 = vsub.f32 1.0, %v1656_v35  ;;  %v2484_v35 = vld [vmem:[%s5915_s8 + $0x8] sm:$0xff] }
 0x711   : > { %v1613_v30 = vmul.f32 %v3007_v26, %v1612_v25 }
 0x717   : > { %2899 = vset.pattern.permute.xlu2 %v3089_v1 }
 0x718   : > { %2886 = vset.pattern.permute.xlu1 %v3090_v19  ;;  %2893 = vset.pattern.permute.xlu0 %v3088_v5 }
 0x719   : > { %2142 = vperm.xlu1 %2886, %v5466_v12   ;;  %2426 = vperm.xlu2 %2899, %v5473_v11  }
 0x71a   : > { %2090 = vperm.xlu0 %2893, %v5473_v11  }
 0x71b   : > { %v1987_v42 = vpop.f32.mrf.mxu2 }
 0x71c   : > { %v5491_v20 = vmul.f32 %v1987_v42, %v1594_v15  ;;  %v1653_v15 = vsel %vm1650_vm10, %v1652_v58, %v1648_v54  ;;  %vm2013_vm10 = vcmp.eq.s32.totalorder %v4838_v47, 1 }
 0x71d   : > { %v1654_v6 = vmul.f32 %v5320_v23, %v1653_v15 }
 0x721   : > { %2887 = vset.pattern.permute.xlu1 %v3091_v44  ;;  %2900 = vset.pattern.permute.xlu2 %v6162_v28 }
 0x722   : > { %2894 = vset.pattern.permute.xlu0 %v3090_v19  ;;  %2198 = vperm.xlu1 %2887, %v5466_v12  }
 0x723   : > { %2146 = vperm.xlu0 %2894, %v5473_v11   ;;  %2033 = vperm.xlu2 %2900, %v5491_v20   ;;  %v5508_v41 = vpop.f32.mrf.mxu2 }
 0x72a   : > { %2889 = vset.pattern.permute.xlu1 %v3092_v33 }
 0x72b   : > { %2895 = vset.pattern.permute.xlu0 %v3091_v44  ;;  %2901 = vset.pattern.permute.xlu2 %v3088_v5  ;;  %v5518_v56 = vpop.f32.mrf.mxu2 }
 0x72c   : > { %2310 = vperm.xlu1 %2889, %v5466_v12   ;;  %2202 = vperm.xlu0 %2895, %v5473_v11  }
 0x72d   : > { %2094 = vperm.xlu2 %2901, %v5491_v20  }
 0x734   : > { %2891 = vset.pattern.permute.xlu1 %v3089_v1  ;;  %2905 = vset.pattern.permute.xlu0 %v3092_v33 }
 0x735   : > { %2902 = vset.pattern.permute.xlu2 %v3090_v19  ;;  %2422 = vperm.xlu1 %2891, %v5466_v12   ;;  %v1599_v12 = vadd.f32 %v3003_v61, %v1598_v36  ;;  %v1996_v13 = vpop.f32.mrf.mxu2  ;;  %v1658_v36 = vmul.f32 %v3009_v3, %v1657_v24 }
 0x736   : > { %2318 = vperm.xlu0 %2905, %v5491_v20   ;;  %2150 = vperm.xlu2 %2902, %v5491_v20   ;;  %v5535_v39 = vmul.f32 %v1996_v13, %v1639_v7  ;;  %v1666_v13 = vand.u32 2147483648, %v5424_v14  ;;  %v5620_v14 = vld [vmem:[%s3241_s21 + $0x8] sm:$0xff] }
 0x737   : > { %v1603_v51 = vsel %vm1602_vm9, %v3003_v61, %v1599_v12  ;;  %v1659_v21 = vadd.f32 %v3009_v3, %v1658_v36  ;;  %v5603_v12 = vld [vmem:[%s3241_s21] sm:$0xff]  ;;  %vm1662_vm9 = vmor %vm1660_vm8, %vm1661_vm14  ;;  %vm2135_vm14 = vcmp.eq.s32.totalorder %v4863_v60, 3  ;;  %vm2189_vm8 = vcmp.eq.s32.totalorder %v4838_v47, 4  ;;  %s3034_s21 = sshra.s32 %s2665_s20, 4  ;;  %s3035_s21 = int_to_ptr.hbm [resolvable:$true] %s3034_s21 }
 0x738   : > { %v1608_v22 = vsel %vm1605_vm15, %v1607_v2, %v1603_v51  ;;  %v1667_v55 = vor.u32 1.1754944e-38, %v1666_v13  ;;  %vm2414_vm15 = vcmp.eq.s32.totalorder %v4873_v57, 8  ;;  %s3036_s27 = scalar_lea.hbm %s3035_s21, 16  ;;  %p3041_p0 = scmp.lt.s32.totalorder %s3035_s21, %s5917_s10 }
 0x739   : > { %v1663_v7 = vsel %vm1662_vm9, %v3009_v3, %v1659_v21  ;;  %vm2134_vm9 = vcmp.eq.s32.totalorder %v4873_v57, 3  ;;  %p3037_p11 = scmp.ne.s32.totalorder %s3035_s21, %s3036_s27  ;;  %p3042_p1 = scmp.lt.s32.totalorder %s3040_s11, %s3036_s27 }
 0x73a   : > { %v1668_v51 = vsel %vm1665_vm13, %v1667_v55, %v1663_v7  ;;  %vm6166_vm13 = vmmov %vm6164_vm0 }
 0x73b   : > { %v1669_v53 = vmul.f32 %v5343_v46, %v1668_v51  ;;  %p3038_p12 = pnand %p3037_p11, %p3188_p5  ;;  %p3043_p2 = por %p3042_p1, %p3041_p0 }
 0x73d   : > { %2897 = vset.pattern.permute.xlu1 %v3092_v33  ;;  %p3039_p13 = pneg %p3038_p12 }
 0x73e   : > { %2906 = vset.pattern.permute.xlu0 %v3089_v1  ;;  %2903 = vset.pattern.permute.xlu2 %v3091_v44 }
 0x73f   : > { %2314 = vperm.xlu1 %2897, %v5473_v11   ;;  %2430 = vperm.xlu0 %2906, %v5491_v20   ;;  %p3044_p3 = pnand %p3043_p2, %p3039_p13 }
 0x740   : > { %2206 = vperm.xlu2 %2903, %v5491_v20  }
 0x746   : > { %v2002_v2 = vpop.f32.mrf.mxu3 }
 0x747   : > { %2898 = vset.pattern.permute.xlu1 %v3086_v29  ;;  %2929 = vset.pattern.permute.xlu0 %v3086_v29  ;;  %v5629_v59 = vmul.f32 %v2002_v2, %v1669_v53 }
 0x748   : > { %2904 = vset.pattern.permute.xlu2 %v3087_v34  ;;  %2370 = vperm.xlu1 %2898, %v5473_v11   ;;  %v1609_v11 = vmul.f32 %v5325_v10, %v1608_v22  ;;  %v1614_v10 = vadd.f32 %v3007_v26, %v1613_v30 }
 0x749   : > { %2262 = vperm.xlu2 %2904, %v5491_v20   ;;  %2386 = vperm.xlu0 %2929, %v5535_v39  }
 0x74a   : > { %v5549_v42 = vmul.f32 %v5508_v41, %v1609_v11  ;;  %v1621_v41 = vand.u32 2147483648, %v5398_v31  ;;  %v1618_v23 = vsel %vm1617_vm6, %v3007_v26, %v1614_v10  ;;  %vm2014_vm6 = vcmp.eq.s32.totalorder %v4873_v57, 1 }
 0x74c   : > { %v1622_v61 = vor.u32 1.1754944e-38, %v1621_v41 }
 0x750   : > { %2374 = vperm.xlu1 %2898, %v5491_v20   ;;  %v1619_v20 = vand.u32 2147483647, %v5398_v31  ;;  %v2489_v31 = vld [vmem:[%s5915_s8 + $0x30] sm:$0xff] }
 0x751   : > { %2912 = vset.pattern.permute.xlu2 %v3092_v33  ;;  %2930 = vset.pattern.permute.xlu0 %v6162_v28 }
 0x752   : > { %2322 = vperm.xlu2 %2912, %v5549_v42   ;;  %vm1620_vm3 = vcmp.eq.f32.partialorder %v1619_v20, 8.507059e+37  ;;  %2503 = vmatpush.msrb.mxu3 %v2489_v31 }
 0x753   : > { %v1623_v0 = vsel %vm1620_vm3, %v1622_v61, %v1618_v23  ;;  %vm2079_vm3 = vcmp.eq.s32.totalorder %v4863_v60, 2  ;;  %v2488_v23 = vld [vmem:[%s5915_s8 + $0x28] sm:$0xff] }
 0x754   : > { %v1624_v37 = vmul.f32 %v5335_v27, %v1623_v0  ;;  %v2487_v27 = vld [vmem:[%s5915_s8 + $0x20] sm:$0xff] }
 0x755   : > { %v1999_v16 = vpop.f32.mrf.mxu2  ;;  %2504 = vmatpush.msrb.mxu3 %v2487_v27 }
 0x756   : > { %v5556_v45 = vmul.f32 %v1999_v16, %v1654_v6  ;;  %v5579_v17 = vmul.f32 %v5518_v56, %v1624_v37  ;;  %v2485_v56 = vld [vmem:[%s5915_s8 + $0x10] sm:$0xff]  ;;  %v2490_v16 = vld [vmem:[%s5915_s8 + $0x38] sm:$0xff] }
 0x757   : > { %2505 = vmatpush.msrb.mxu3 %v2485_v56  ;;  %2526 = vmatpush.msra.mxu0 %v2490_v16  ;;  %v2486_v37 = vld [vmem:[%s5915_s8 + $0x18] sm:$0xff] }
 0x758   : > { %2907 = vset.pattern.permute.xlu1 %v6162_v28  ;;  %2053 = vperm.xlu0 %2930, %v5556_v45  }
 0x759   : > { %2038 = vperm.xlu1 %2907, %v5549_v42   ;;  %2506 = vmatpush.msrb.mxu3 %v2483_v4 }
 0x75a   : > { %2913 = vset.pattern.permute.xlu2 %v3086_v29  ;;  %2816 = vmatmul.msk.f32.vlgmr.msrb.gmra.mxu3 %vm6163_vm5, %v5603_v12  ;;  %vm6165_vm5 = vmmov %vm6164_vm0 }
 0x75b   : > { %2378 = vperm.xlu2 %2913, %v5549_v42   ;;  %2527 = vmatpush.msra.mxu0 %v2488_v23 }
 0x75d   : > { %2528 = vmatpush.msra.mxu0 %v2486_v37 }
 0x75f   : > { %2529 = vmatpush.msra.mxu0 %v2484_v35 }
 0x760   : > { %v2367_v50 = vpop.permute.xlu2 %2366  ;;  %2931 = vset.pattern.permute.xlu0 %v3088_v5  ;;  %2818 = vmatmul.msk.f32.vlgmr.msra.gmra.mxu0 %vm6165_vm5, %v5603_v12  ;;  %vm2359_vm5 = vcmp.eq.s32.totalorder %v4863_v60, 7 }
 0x761   : > { %2908 = vset.pattern.permute.xlu1 %v3088_v5  ;;  %v5574_v48 = vsel %vm2357_vm11, %v2367_v50, 0.0  ;;  %2110 = vperm.xlu0 %2931, %v5556_v45   ;;  %vm2133_vm11 = vcmp.eq.s32.totalorder %v4838_v47, 3 }
 0x762   : > { %2098 = vperm.xlu1 %2908, %v5549_v42   ;;  %2817 = vmatmul.msk.f32.gmra.mxu3 %vm6164_vm0, %v5620_v14  ;;  %vm2301_vm0 = vcmp.eq.s32.totalorder %v4838_v47, 6 }
 0x763   : > { %2915 = vset.pattern.permute.xlu2 %v6162_v28 }
 0x764   : > { %2043 = vperm.xlu2 %2915, %v5579_v17  }
 0x768   : > { %2819 = vmatmul.msk.f32.gmra.mxu0 %vm6166_vm13, %v5620_v14  ;;  %vm2137_vm13 = vcmp.eq.s32.totalorder %v4911_v32, 3 }
 0x769   : > { %v2259_v63 = vpop.permute.xlu2 %2258  ;;  %2932 = vset.pattern.permute.xlu0 %v3090_v19 }
 0x76a   : > { %2909 = vset.pattern.permute.xlu1 %v3090_v19  ;;  %v5593_v38 = vsel %vm2246_vm12, %v2259_v63, 0.0  ;;  %2166 = vperm.xlu0 %2932, %v5556_v45   ;;  %vm2078_vm12 = vcmp.eq.s32.totalorder %v4873_v57, 2 }
 0x76b   : > { %2154 = vperm.xlu1 %2909, %v5549_v42  }
 0x76c   : > { %2916 = vset.pattern.permute.xlu2 %v3088_v5 }
 0x76d   : > { %2102 = vperm.xlu2 %2916, %v5579_v17  }
 0x772   : > { %2934 = vset.pattern.permute.xlu0 %v3092_v33 }
 0x773   : > { %2910 = vset.pattern.permute.xlu1 %v3091_v44  ;;  %v2427_v52 = vpop.permute.xlu2 %2426  ;;  %2334 = vperm.xlu0 %2934, %v5556_v45  }
 0x774   : > { %2210 = vperm.xlu1 %2910, %v5549_v42   ;;  %v5615_v26 = vsel %vm2414_vm15, %v2427_v52, 0.0  ;;  %vm2191_vm15 = vcmp.eq.s32.totalorder %v4863_v60, 4 }
 0x775   : > { %2917 = vset.pattern.permute.xlu2 %v3090_v19 }
 0x776   : > { %2158 = vperm.xlu2 %2917, %v5579_v17  }
 0x778   : > { %v2255_v49 = vpop.permute.xlu0 %2254 }
 0x779   : > { %v2024_v22 = vpop.permute.xlu1 %2023  ;;  %v5627_v18 = vsel %vm2245_vm4, %v2255_v49, 0.0  ;;  %vm2190_vm4 = vcmp.eq.s32.totalorder %v4873_v57, 4 }
 0x77a   : > { %v2061_v25 = vsel %vm2013_vm10, %v2024_v22, 0.0  ;;  %vm2247_vm10 = vcmp.eq.s32.totalorder %v4863_v60, 5 }
 0x77b   : > { %2940 = vset.pattern.permute.xlu0 %v3091_v44 }
 0x77c   : > { %2911 = vset.pattern.permute.xlu1 %v3087_v34  ;;  %2226 = vperm.xlu0 %2940, %v5629_v59  }
 0x77d   : > { %2266 = vperm.xlu1 %2911, %v5549_v42   ;;  %v2034_v46 = vpop.permute.xlu2 %2033 }
 0x77e   : > { %2918 = vset.pattern.permute.xlu2 %v3091_v44  ;;  %v2063_v11 = vsel %vm2015_vm7, %v2034_v46, 0.0  ;;  %vm2413_vm7 = vcmp.eq.s32.totalorder %v4838_v47, 8 }
 0x77f   : > { %2214 = vperm.xlu2 %2918, %v5579_v17  }
 0x782   : > { %v2087_v54 = vpop.permute.xlu1 %2086  ;;  %v2029_v58 = vpop.permute.xlu0 %2028 }
 0x783   : > { %v2117_v15 = vsel %vm2077_vm2, %v2087_v54, 0.0  ;;  %v2062_v30 = vsel %vm2014_vm6, %v2029_v58, 0.0  ;;  %vm2303_vm2 = vcmp.eq.s32.totalorder %v4863_v60, 6  ;;  %vm2304_vm6 = vcmp.eq.s32.totalorder %v4925_v43, 6 }
 0x784   : > { %v2125_v6 = vadd.f32 %v2117_v15, %v2061_v25  ;;  %2941 = vset.pattern.permute.xlu0 %v3087_v34 }
 0x785   : > { %2914 = vset.pattern.permute.xlu1 %v3089_v1  ;;  %2282 = vperm.xlu0 %2941, %v5629_v59  }
 0x786   : > { %2434 = vperm.xlu1 %2914, %v5549_v42  }
 0x787   : > { %2919 = vset.pattern.permute.xlu2 %v3087_v34  ;;  %v2095_v10 = vpop.permute.xlu2 %2094 }
 0x788   : > { %v2119_v41 = vsel %vm2079_vm3, %v2095_v10, 0.0  ;;  %2270 = vperm.xlu2 %2919, %v5579_v17   ;;  %vm2302_vm3 = vcmp.eq.s32.totalorder %v4873_v57, 6 }
 0x789   : > { %v2127_v20 = vadd.f32 %v2119_v41, %v2063_v11 }
 0x78b   : > { %v2143_v61 = vpop.permute.xlu1 %2142 }
 0x78c   : > { %v2173_v0 = vsel %vm2133_vm11, %v2143_v61, 0.0  ;;  %v2091_v42 = vpop.permute.xlu0 %2090  ;;  %vm2360_vm11 = vcmp.eq.s32.totalorder %v4925_v43, 7 }
 0x78d   : > { %v2181_v3 = vadd.f32 %v2173_v0, %v2125_v6  ;;  %v2118_v31 = vsel %vm2078_vm12, %v2091_v42, 0.0  ;;  %2945 = vset.pattern.permute.xlu0 %v3089_v1  ;;  %vm2358_vm12 = vcmp.eq.s32.totalorder %v4873_v57, 7 }
 0x78e   : > { %v2126_v50 = vadd.f32 %v2118_v31, %v2062_v30  ;;  %2920 = vset.pattern.permute.xlu1 %v3092_v33  ;;  %2450 = vperm.xlu0 %2945, %v5629_v59  }
 0x78f   : > { %2326 = vperm.xlu1 %2920, %v5579_v17  }
 0x790   : > { %2921 = vset.pattern.permute.xlu2 %v3086_v29  ;;  %v2151_v27 = vpop.permute.xlu2 %2150 }
 0x791   : > { %v2175_v24 = vsel %vm2135_vm14, %v2151_v27, 0.0  ;;  %2382 = vperm.xlu2 %2921, %v5579_v17   ;;  %vm2017_vm14 = vcmp.eq.s32.totalorder %v4911_v32, 1 }
 0x792   : > { %v2183_v63 = vadd.f32 %v2175_v24, %v2127_v20 }
 0x794   : > { %v2199_v56 = vpop.permute.xlu1 %2198 }
 0x795   : > { %v2229_v36 = vsel %vm2189_vm8, %v2199_v56, 0.0  ;;  %v2147_v4 = vpop.permute.xlu0 %2146  ;;  %vm2415_vm8 = vcmp.eq.s32.totalorder %v4863_v60, 8 }
 0x796   : > { %v2237_v21 = vadd.f32 %v2229_v36, %v2181_v3  ;;  %v2174_v13 = vsel %vm2134_vm9, %v2147_v4, 0.0  ;;  %vm2081_vm9 = vcmp.eq.s32.totalorder %v4911_v32, 2 }
 0x797   : > { %v2182_v8 = vadd.f32 %v2174_v13, %v2126_v50  ;;  %2922 = vset.pattern.permute.xlu1 %v3089_v1 }
 0x798   : > { %2438 = vperm.xlu1 %2922, %v5579_v17   ;;  %v2293_v7 = vadd.f32 %v5627_v18, %v2237_v21 }
 0x799   : > { %2927 = vset.pattern.permute.xlu2 %v3087_v34 }
 0x79a   : > { %v2207_v12 = vpop.permute.xlu2 %2206  ;;  %2274 = vperm.xlu2 %2927, %v5535_v39  }
 0x79b   : > { %v2231_v55 = vsel %vm2191_vm15, %v2207_v12, 0.0  ;;  %vm2016_vm15 = vcmp.eq.s32.totalorder %v4925_v43, 1 }
 0x79c   : > { %v2239_v52 = vadd.f32 %v2231_v55, %v2183_v63 }
 0x79e   : > { %v2311_v51 = vpop.permute.xlu1 %2310  ;;  %v2203_v17 = vpop.permute.xlu0 %2202 }
 0x79f   : > { %v2341_v2 = vsel %vm2301_vm0, %v2311_v51, 0.0  ;;  %v2230_v53 = vsel %vm2190_vm4, %v2203_v17, 0.0  ;;  %vm2080_vm0 = vcmp.eq.s32.totalorder %v4925_v43, 2  ;;  %vm2193_vm4 = vcmp.eq.s32.totalorder %v4911_v32, 4 }
 0x7a0   : > { %v2349_v49 = vadd.f32 %v2341_v2, %v2293_v7  ;;  %v2238_v22 = vadd.f32 %v2230_v53, %v2182_v8  ;;  %2923 = vset.pattern.permute.xlu1 %v6162_v28 }
 0x7a1   : > { %2048 = vperm.xlu1 %2923, %v5535_v39  }
 0x7a2   : > { %2928 = vset.pattern.permute.xlu2 %v3092_v33  ;;  %v2405_v14 = vadd.f32 %v5574_v48, %v2349_v49  ;;  %v2294_v18 = vadd.f32 %v5593_v38, %v2238_v22 }
 0x7a3   : > { %v2263_v25 = vpop.permute.xlu2 %2262  ;;  %2330 = vperm.xlu2 %2928, %v5535_v39  }
 0x7a4   : > { %v2287_v46 = vsel %vm2247_vm10, %v2263_v25, 0.0  ;;  %vm2136_vm10 = vcmp.eq.s32.totalorder %v4925_v43, 3 }
 0x7a5   : > { %v2295_v11 = vadd.f32 %v2287_v46, %v2239_v52  ;;  %v2592_v46 = vld [vmem:[%s5916_s9 + $0x68] sm:$0xff] }
 0x7a7   : > { %v2423_v54 = vpop.permute.xlu1 %2422 }
 0x7a8   : > { %v2453_v58 = vsel %vm2413_vm7, %v2423_v54, 0.0  ;;  %v2319_v15 = vpop.permute.xlu0 %2318  ;;  %vm2249_vm7 = vcmp.eq.s32.totalorder %v4911_v32, 5  ;;  %v2591_v54 = vld [vmem:[%s5916_s9 + $0x60] sm:$0xff] }
 0x7a9   : > { %v2461_v30 = vadd.f32 %v2453_v58, %v2405_v14  ;;  %v2343_v6 = vsel %vm2303_vm2, %v2319_v15, 0.0  ;;  %2924 = vset.pattern.permute.xlu1 %v3088_v5  ;;  %vm2192_vm2 = vcmp.eq.s32.totalorder %v4925_v43, 4 }
 0x7aa   : > { %v2351_v48 = vadd.f32 %v2343_v6, %v2295_v11  ;;  %2106 = vperm.xlu1 %2924, %v5535_v39  }
 0x7ab   : > { %2933 = vset.pattern.permute.xlu2 %v3087_v34 }
 0x7ac   : > { %v2323_v38 = vpop.permute.xlu2 %2322  ;;  %2278 = vperm.xlu2 %2933, %v5556_v45  }
 0x7ad   : > { %v5696_v47 = vsel %vm2304_vm6, %v2323_v38, 0.0  ;;  %vm2248_vm6 = vcmp.eq.s32.totalorder %v4925_v43, 5  ;;  %v2589_v38 = vld [vmem:[%s5916_s9 + $0x50] sm:$0xff] }
 0x7b1   : > { %v2315_v16 = vpop.permute.xlu1 %2314  ;;  %v2431_v37 = vpop.permute.xlu0 %2430 }
 0x7b2   : > { %v2342_v10 = vsel %vm2302_vm3, %v2315_v16, 0.0  ;;  %2925 = vset.pattern.permute.xlu1 %v3090_v19  ;;  %vm2416_vm3 = vcmp.eq.s32.totalorder %v4925_v43, 8  ;;  %v2588_v43 = vld [vmem:[%s5916_s9 + $0x48] sm:$0xff] }
 0x7b3   : > { %v2350_v41 = vadd.f32 %v2342_v10, %v2294_v18  ;;  %2162 = vperm.xlu1 %2925, %v5535_v39  }
 0x7b4   : > { %2935 = vset.pattern.permute.xlu2 %v3086_v29 }
 0x7b5   : > { %v2379_v34 = vpop.permute.xlu2 %2378  ;;  %2390 = vperm.xlu2 %2935, %v5556_v45  }
 0x7b6   : > { %v5704_v20 = vsel %vm2360_vm11, %v2379_v34, 0.0  ;;  %vm2305_vm11 = vcmp.eq.s32.totalorder %v4911_v32, 6 }
 0x7ba   : > { %v2371_v23 = vpop.permute.xlu1 %2370 }
 0x7bb   : > { %v2398_v61 = vsel %vm2358_vm12, %v2371_v23, 0.0  ;;  %2926 = vset.pattern.permute.xlu1 %v3091_v44  ;;  %v2586_v23 = vld [vmem:[%s5916_s9 + $0x38] sm:$0xff]  ;;  %vm2361_vm12 = vcmp.eq.s32.totalorder %v4911_v32, 7 }
 0x7bc   : > { %v2406_v0 = vadd.f32 %v2398_v61, %v2350_v41  ;;  %2218 = vperm.xlu1 %2926, %v5535_v39  }
 0x7bd   : > { %2937 = vset.pattern.permute.xlu2 %v6162_v28  ;;  %v2455_v28 = vsel %vm2415_vm8, %v2431_v37, 0.0 }
 0x7be   : > { %v5711_v42 = vadd.f32 %v5615_v26, %v2406_v0  ;;  %v2044_v3 = vpop.permute.xlu2 %2043  ;;  %2058 = vperm.xlu2 %2937, %v5629_v59  }
 0x7bf   : > { %v2065_v31 = vsel %vm2017_vm14, %v2044_v3, 0.0 }
 0x7c2   : > { %v2375_v57 = vpop.permute.xlu1 %2374 }
 0x7c3   : > { %v2399_v50 = vsel %vm2359_vm5, %v2375_v57, 0.0 }
 0x7c4   : > { %v2407_v44 = vadd.f32 %v2399_v50, %v2351_v48  ;;  %2222 = vperm.xlu1 %2926, %v5556_v45   ;;  %v2590_v48 = vld [vmem:[%s5916_s9 + $0x58] sm:$0xff]  ;;  %v2585_v50 = vld [vmem:[%s5916_s9 + $0x30] sm:$0xff] }
 0x7c6   : > { %v2463_v35 = vadd.f32 %v2455_v28, %v2407_v44  ;;  %2938 = vset.pattern.permute.xlu2 %v3088_v5  ;;  %v2584_v44 = vld [vmem:[%s5916_s9 + $0x28] sm:$0xff] }
 0x7c7   : > { %v2103_v26 = vpop.permute.xlu2 %2102  ;;  %2114 = vperm.xlu2 %2938, %v5629_v59  }
 0x7c8   : > { %v2121_v27 = vsel %vm2081_vm9, %v2103_v26, 0.0  ;;  %v5721_v24 = vadd.f32 %v2463_v35, %v2461_v30  ;;  %vm2417_vm9 = vcmp.eq.s32.totalorder %v4911_v32, 8 }
 0x7c9   : > { %v2129_v63 = vadd.f32 %v2121_v27, %v2065_v31 }
 0x7cb   : > { %v2039_v56 = vpop.permute.xlu1 %2038 }
 0x7cc   : > { %v2064_v60 = vsel %vm2016_vm15, %v2039_v56, 0.0  ;;  %2936 = vset.pattern.permute.xlu1 %v3089_v1 }
 0x7cd   : > { %2446 = vperm.xlu1 %2936, %v5556_v45  }
 0x7cf   : > { %2939 = vset.pattern.permute.xlu2 %v3090_v19 }
 0x7d0   : > { %v2159_v5 = vpop.permute.xlu2 %2158  ;;  %2170 = vperm.xlu2 %2939, %v5629_v59  }
 0x7d1   : > { %v2177_v36 = vsel %vm2137_vm13, %v2159_v5, 0.0  ;;  %v2582_v5 = vld [vmem:[%s5916_s9 + $0x18] sm:$0xff] }
 0x7d2   : > { %v2185_v4 = vadd.f32 %v2177_v36, %v2129_v63 }
 0x7d4   : > { %v2099_v21 = vpop.permute.xlu1 %2098 }
 0x7d5   : > { %v2120_v13 = vsel %vm2080_vm0, %v2099_v21, 0.0  ;;  %2942 = vset.pattern.permute.xlu1 %v3092_v33 }
 0x7d6   : > { %v2128_v8 = vadd.f32 %v2120_v13, %v2064_v60  ;;  %2338 = vperm.xlu1 %2942, %v5629_v59   ;;  %v2583_v60 = vld [vmem:[%s5916_s9 + $0x20] sm:$0xff] }
 0x7d8   : > { %2943 = vset.pattern.permute.xlu2 %v3086_v29 }
 0x7d9   : > { %v2215_v19 = vpop.permute.xlu2 %2214  ;;  %2394 = vperm.xlu2 %2943, %v5629_v59  }
 0x7da   : > { %v2233_v45 = vsel %vm2193_vm4, %v2215_v19, 0.0 }
 0x7db   : > { %v2241_v7 = vadd.f32 %v2233_v45, %v2185_v4 }
 0x7dd   : > { %v2155_v12 = vpop.permute.xlu1 %2154  ;;  %v5747_v14 = vpop.f32.mrf.mxu3 }
 0x7de   : > { %v2176_v55 = vsel %vm2136_vm10, %v2155_v12, 0.0  ;;  %2944 = vset.pattern.permute.xlu1 %v3089_v1  ;;  %v2594_v1 = vld [vmem:[%s5916_s9 + $0x78] sm:$0xff]  ;;  %v2820_v18 = vmul.f32 -1.442695, %v5747_v14 }
 0x7df   : > { %v2184_v52 = vadd.f32 %v2176_v55, %v2128_v8  ;;  %2442 = vperm.xlu1 %2944, %v5535_v39   ;;  %v2593_v39 = vld [vmem:[%s5916_s9 + $0x70] sm:$0xff]  ;;  %2595 = vmatpush.msra.mxu3 %v2594_v1 }
 0x7e0   : > { %3010 = vpow2.f32 %v2820_v18 }
 0x7e1   : > { %2596 = vmatpush.msra.mxu3 %v2593_v39 }
 0x7e2   : > { %v2271_v33 = vpop.permute.xlu2 %2270 }
 0x7e3   : > { %v2289_v29 = vsel %vm2249_vm7, %v2271_v33, 0.0  ;;  %2597 = vmatpush.msra.mxu3 %v2592_v46  ;;  %v2482_v46 = vld [vmem:[%s5912_s5 + $0x38] sm:$0xff]  ;;  %vm2083_vm7 = vcmp.eq.s32.totalorder %v4885_v40, 2 }
 0x7e4   : > { %v2297_v51 = vadd.f32 %v2289_v29, %v2241_v7  ;;  %2632 = vmatpush.msrb.mxu0 %v2482_v46 }
 0x7e5   : > { %2598 = vmatpush.msra.mxu3 %v2591_v54  ;;  %v5759_v6 = vpop.f32.mrf.mxu3 }
 0x7e6   : > { %v2211_v17 = vpop.permute.xlu1 %2210  ;;  %v2821_v10 = vmul.f32 -1.442695, %v5759_v6 }
 0x7e7   : > { %v2232_v59 = vsel %vm2192_vm2, %v2211_v17, 0.0  ;;  %2599 = vmatpush.msra.mxu3 %v2590_v48  ;;  %vm2019_vm2 = vcmp.eq.s32.totalorder %v4885_v40, 1 }
 0x7e8   : > { %v2240_v2 = vadd.f32 %v2232_v59, %v2184_v52  ;;  %3012 = vpow2.f32 %v2821_v10  ;;  %v5799_v52 = vpop.permute.xlu0 %2386  ;;  %v2479_v10 = vld [vmem:[%s5912_s5 + $0x20] sm:$0xff] }
 0x7e9   : > { %2600 = vmatpush.msra.mxu3 %v2589_v38  ;;  %v2481_v38 = vld [vmem:[%s5912_s5 + $0x30] sm:$0xff] }
 0x7ea   : > { %2633 = vmatpush.msrb.mxu0 %v2481_v38 }
 0x7eb   : > { %v2383_v58 = vpop.permute.xlu2 %2382  ;;  %2601 = vmatpush.msra.mxu3 %v2588_v43 }
 0x7ec   : > { %v2401_v28 = vsel %vm2361_vm12, %v2383_v58, 0.0  ;;  %vm2307_vm12 = vcmp.eq.s32.totalorder %v4885_v40, 6 }
 0x7ef   : > { %v2267_v53 = vpop.permute.xlu1 %2266 }
 0x7f0   : > { %v2288_v49 = vsel %vm2248_vm6, %v2267_v53, 0.0  ;;  %v2580_v53 = vld [vmem:[%s5916_s9 + $0x8] sm:$0xff]  ;;  %vm2139_vm6 = vcmp.eq.s32.totalorder %v4885_v40, 3 }
 0x7f1   : > { %v2296_v22 = vadd.f32 %v2288_v49, %v2240_v2  ;;  %v2581_v2 = vld [vmem:[%s5916_s9 + $0x10] sm:$0xff]  ;;  %v2531_v49 = vpop.f32.mrf.mxu0 }
 0x7f3   : > { %v2352_v25 = vadd.f32 %v5696_v47, %v2296_v22  ;;  %v3011_v47 = vpop.eup %3010 }
 0x7f4   : > { %v2543_v41 = vadd.f32 1.0, %v3011_v47  ;;  %v5780_v61 = vpop.permute.xlu2 %2274  ;;  %v2480_v47 = vld [vmem:[%s5912_s5 + $0x28] sm:$0xff] }
 0x7f5   : > { %v2408_v11 = vadd.f32 %v5704_v20, %v2352_v25  ;;  %v2587_v20 = vld [vmem:[%s5916_s9 + $0x40] sm:$0xff]  ;;  %2634 = vmatpush.msrb.mxu0 %v2480_v47 }
 0x7f6   : > { %3014 = vrcp.f32 %v2543_v41  ;;  %2602 = vmatpush.msra.mxu3 %v2587_v20  ;;  %v2556_v27 = vand.u32 2147483648, %v2543_v41  ;;  %vm2550_vm14 = vweird.f32 %v2543_v41  ;;  %v2554_v56 = vand.u32 2147483647, %v2543_v41  ;;  %v2477_v20 = vld [vmem:[%s5912_s5 + $0x10] sm:$0xff] }
 0x7f7   : > { %2635 = vmatpush.msrb.mxu0 %v2479_v10 }
 0x7f8   : > { %v2435_v15 = vpop.permute.xlu1 %2434  ;;  %2603 = vmatpush.msra.mxu3 %v2586_v23  ;;  %v2557_v4 = vor.u32 1.1754944e-38, %v2556_v27  ;;  %vm2555_vm15 = vcmp.eq.f32.partialorder %v2554_v56, 8.507059e+37  ;;  %v2476_v23 = vld [vmem:[%s5912_s5 + $0x8] sm:$0xff] }
 0x7f9   : > { %v2456_v30 = vsel %vm2416_vm3, %v2435_v15, 0.0  ;;  %vm2195_vm3 = vcmp.eq.s32.totalorder %v4885_v40, 4 }
 0x7fa   : > { %v2464_v16 = vadd.f32 %v2456_v30, %v2408_v11  ;;  %2604 = vmatpush.msra.mxu3 %v2585_v50  ;;  %v2054_v11 = vpop.permute.xlu0 %2053  ;;  %v2534_v30 = vpop.f32.mrf.mxu0 }
 0x7fb   : > { %v2067_v50 = vsel %vm2019_vm2, %v2054_v11, 0.0  ;;  %vm2250_vm2 = vcmp.eq.s32.totalorder %v5056_v62, 5 }
 0x7fc   : > { %v5772_v34 = vadd.f32 %v2464_v16, %v5711_v42  ;;  %v3013_v42 = vpop.eup %3012  ;;  %2605 = vmatpush.msra.mxu3 %v2584_v44  ;;  %v2290_v11 = vsel %vm2250_vm2, %v5780_v61, 0.0 }
 0x7fd   : > { %v3015_v31 = vpop.eup %3014  ;;  %v2544_v57 = vadd.f32 1.0, %v3013_v42  ;;  %v5797_v19 = vpop.permute.xlu2 %2330  ;;  %v2475_v42 = vld [vmem:[%s5912_s5] sm:$0xff] }
 0x7fe   : > { %v2546_v35 = vmul.f32 %v3015_v31, %v2543_v41  ;;  %vm2551_vm5 = vweird.f32 %v3015_v31  ;;  %2606 = vmatpush.msra.mxu3 %v2583_v60 }
 0x7ff   : > { %3016 = vrcp.f32 %v2544_v57  ;;  %vm2552_vm8 = vmor %vm2550_vm14, %vm2551_vm5  ;;  %vm2565_vm13 = vweird.f32 %v2544_v57  ;;  %v2569_v29 = vand.u32 2147483647, %v2544_v57  ;;  %vm2363_vm14 = vcmp.eq.s32.totalorder %v4885_v40, 7 }
 0x800   : > { %v2547_v63 = vsub.f32 1.0, %v2546_v35  ;;  %2607 = vmatpush.msra.mxu3 %v2582_v5  ;;  %vm2082_vm5 = vcmp.eq.s32.totalorder %v5056_v62, 2 }
 0x801   : > { %v2327_v0 = vpop.permute.xlu1 %2326  ;;  %vm2570_vm10 = vcmp.eq.f32.partialorder %v2569_v29, 8.507059e+37 }
 0x802   : > { %v2345_v3 = vsel %vm2305_vm11, %v2327_v0, 0.0  ;;  %v2548_v36 = vmul.f32 %v3015_v31, %v2547_v63  ;;  %2608 = vmatpush.msra.mxu3 %v2581_v2  ;;  %v2111_v41 = vpop.permute.xlu0 %2110  ;;  %vm2251_vm11 = vcmp.eq.s32.totalorder %v4885_v40, 5 }
 0x803   : > { %v2353_v37 = vadd.f32 %v2345_v3, %v2297_v51  ;;  %v2571_v51 = vand.u32 2147483648, %v2544_v57 }
 0x804   : > { %v2549_v13 = vadd.f32 %v3015_v31, %v2548_v36  ;;  %2609 = vmatpush.msra.mxu3 %v2580_v53 }
 0x805   : > { %v2409_v26 = vadd.f32 %v2401_v28, %v2353_v37  ;;  %v3017_v8 = vpop.eup %3016  ;;  %v2572_v22 = vor.u32 1.1754944e-38, %v2571_v51 }
 0x806   : > { %v2553_v12 = vsel %vm2552_vm8, %v3015_v31, %v2549_v13  ;;  %v2561_v55 = vmul.f32 %v3017_v8, %v2544_v57  ;;  %vm2566_vm0 = vweird.f32 %v3017_v8  ;;  %v2279_v54 = vpop.permute.xlu2 %2278  ;;  %v2123_v57 = vsel %vm2083_vm7, %v2111_v41, 0.0 }
 0x807   : > { %v2558_v33 = vsel %vm2555_vm15, %v2557_v4, %v2553_v12  ;;  %vm2567_vm4 = vmor %vm2565_vm13, %vm2566_vm0  ;;  %v2291_v5 = vsel %vm2251_vm11, %v2279_v54, 0.0  ;;  %vm2084_vm8 = vcmp.eq.s32.totalorder %v4994_v9, 2  ;;  %vm2018_vm15 = vcmp.eq.s32.totalorder %v5056_v62, 1 }
 0x808   : > { %v2575_v32 = vmul.f32 %v2558_v33, %v5747_v14  ;;  %v2562_v59 = vsub.f32 1.0, %v2561_v55  ;;  %vm2020_vm13 = vcmp.eq.s32.totalorder %v4994_v9, 1  ;;  %vm2138_vm0 = vcmp.eq.s32.totalorder %v5056_v62, 3 }
 0x809   : > { %vm2196_vm7 = vcmp.eq.s32.totalorder %v4994_v9, 4  ;;  %vm2306_vm11 = vcmp.eq.s32.totalorder %v5056_v62, 6 }
 0x80a   : > { %v2439_v21 = vpop.permute.xlu1 %2438  ;;  %v2563_v1 = vmul.f32 %v3017_v8, %v2562_v59  ;;  %v2577_v39 = vmul.f32 %v2575_v32, %v2531_v49  ;;  %v2167_v3 = vpop.permute.xlu0 %2166 }
 0x80b   : > { %v2457_v45 = vsel %vm2417_vm9, %v2439_v21, 0.0  ;;  %v2179_v44 = vsel %vm2139_vm6, %v2167_v3, 0.0  ;;  %vm2419_vm9 = vcmp.eq.s32.totalorder %v4885_v40, 8  ;;  %vm2252_vm6 = vcmp.eq.s32.totalorder %v4994_v9, 5 }
 0x80c   : > { %v2465_v7 = vadd.f32 %v2457_v45, %v2409_v26  ;;  %v2564_v14 = vadd.f32 %v3017_v8, %v2563_v1  ;;  %v2131_v26 = vadd.f32 %v2123_v57, %v2067_v50 }
 0x80e   : > { %v5802_v17 = vadd.f32 %v5721_v24, %v2465_v7  ;;  %v2579_v24 = vld [vmem:[%s5916_s9] sm:$0xff]  ;;  %v2568_v25 = vsel %vm2567_vm4, %v3017_v8, %v2564_v14  ;;  %v2187_v27 = vadd.f32 %v2179_v44, %v2131_v26  ;;  %vm2140_vm4 = vcmp.eq.s32.totalorder %v4994_v9, 3 }
 0x80f   : > { %2610 = vmatpush.msra.mxu3 %v2579_v24  ;;  %v2573_v58 = vsel %vm2570_vm10, %v2572_v22, %v2568_v25  ;;  %v2391_v43 = vpop.permute.xlu2 %2390  ;;  %vm2194_vm10 = vcmp.eq.s32.totalorder %v5056_v62, 4 }
 0x810   : > { %2611 = vmatmul.f32.vlgmr.msra.gmra.mxu3 %v2577_v39  ;;  %v2576_v15 = vmul.f32 %v2573_v58, %v5759_v6  ;;  %v2478_v6 = vld [vmem:[%s5912_s5 + $0x18] sm:$0xff]  ;;  %v2403_v8 = vsel %vm2363_vm14, %v2391_v43, 0.0  ;;  %vm2364_vm14 = vcmp.eq.s32.totalorder %v4994_v9, 7 }
 0x811   : > { %2636 = vmatpush.msrb.mxu0 %v2478_v6 }
 0x812   : > { %v2578_v48 = vmul.f32 %v2576_v15, %v2534_v30  ;;  %v2335_v28 = vpop.permute.xlu0 %2334 }
 0x813   : > { %v5814_v18 = vpop.permute.xlu1 %2048  ;;  %2637 = vmatpush.msrb.mxu0 %v2477_v20  ;;  %v2347_v4 = vsel %vm2307_vm12, %v2335_v28, 0.0  ;;  %vm2362_vm12 = vcmp.eq.s32.totalorder %v5056_v62, 7 }
 0x814   : > { %v2066_v33 = vsel %vm2018_vm15, %v5814_v18, 0.0  ;;  %v2402_v61 = vsel %vm2362_vm12, %v5799_v52, 0.0 }
 0x815   : > { %2638 = vmatpush.msrb.mxu0 %v2476_v23 }
 0x817   : > { %2639 = vmatpush.msrb.mxu0 %v2475_v42 }
 0x818   : > { %2614 = vmatmul.f32.gmra.mxu3 %v2578_v48  ;;  %v2059_v31 = vpop.permute.xlu2 %2058  ;;  %v2346_v48 = vsel %vm2306_vm11, %v5797_v19, 0.0 }
 0x819   : > { %v2068_v51 = vsel %vm2020_vm13, %v2059_v31, 0.0 }
 0x81a   : > { %v2227_v13 = vpop.permute.xlu0 %2226 }
 0x81b   : > { %v2236_v18 = vsel %vm2196_vm7, %v2227_v13, 0.0 }
 0x81c   : > { %v2107_v16 = vpop.permute.xlu1 %2106 }
 0x81d   : > { %v2122_v7 = vsel %vm2082_vm5, %v2107_v16, 0.0  ;;  %vm2418_vm5 = vcmp.eq.s32.totalorder %v5056_v62, 8 }
 0x81e   : > { %v2130_v53 = vadd.f32 %v2122_v7, %v2066_v33 }
 0x821   : > { %v2115_v35 = vpop.permute.xlu2 %2114 }
 0x822   : > { %v2124_v12 = vsel %vm2084_vm8, %v2115_v35, 0.0  ;;  %v2283_v25 = vpop.permute.xlu0 %2282  ;;  %vm2420_vm8 = vcmp.eq.s32.totalorder %v4994_v9, 8 }
 0x823   : > { %v2132_v40 = vadd.f32 %v2124_v12, %v2068_v51  ;;  %v2292_v15 = vsel %vm2252_vm6, %v2283_v25, 0.0 }
 0x825   : > { %v2163_v0 = vpop.permute.xlu1 %2162 }
 0x826   : > { %v2178_v32 = vsel %vm2138_vm0, %v2163_v0, 0.0 }
 0x827   : > { %v2186_v39 = vadd.f32 %v2178_v32, %v2130_v53 }
 0x82a   : > { %v2171_v45 = vpop.permute.xlu2 %2170  ;;  %v2451_v6 = vpop.permute.xlu0 %2450 }
 0x82b   : > { %v2180_v59 = vsel %vm2140_vm4, %v2171_v45, 0.0  ;;  %v2460_v0 = vsel %vm2420_vm8, %v2451_v6, 0.0 }
 0x82c   : > { %v2188_v24 = vadd.f32 %v2180_v59, %v2132_v40 }
 0x82e   : > { %v2219_v37 = vpop.permute.xlu1 %2218  ;;  %v2244_v46 = vadd.f32 %v2236_v18, %v2188_v24 }
 0x82f   : > { %v2234_v1 = vsel %vm2194_vm10, %v2219_v37, 0.0 }
 0x830   : > { %v2242_v14 = vadd.f32 %v2234_v1, %v2186_v39  ;;  %v2300_v30 = vadd.f32 %v2292_v15, %v2244_v46 }
 0x832   : > { %v2298_v58 = vadd.f32 %v2290_v11, %v2242_v14 }
 0x833   : > { %v2395_v38 = vpop.permute.xlu2 %2394 }
 0x834   : > { %v2354_v16 = vadd.f32 %v2346_v48, %v2298_v58  ;;  %v2404_v10 = vsel %vm2364_vm14, %v2395_v38, 0.0 }
 0x836   : > { %v2223_v63 = vpop.permute.xlu1 %2222  ;;  %v2410_v20 = vadd.f32 %v2402_v61, %v2354_v16 }
 0x837   : > { %v2235_v56 = vsel %vm2195_vm3, %v2223_v63, 0.0  ;;  %vm2308_vm3 = vcmp.eq.s32.totalorder %v4994_v9, 6 }
 0x838   : > { %v2243_v60 = vadd.f32 %v2235_v56, %v2187_v27 }
 0x83a   : > { %v2299_v36 = vadd.f32 %v2291_v5, %v2243_v60 }
 0x83c   : > { %v2355_v21 = vadd.f32 %v2347_v4, %v2299_v36 }
 0x83e   : > { %v2411_v55 = vadd.f32 %v2403_v8, %v2355_v21 }
 0x83f   : > { %v2447_v29 = vpop.permute.xlu1 %2446 }
 0x840   : > { %v2459_v2 = vsel %vm2419_vm9, %v2447_v29, 0.0  ;;  %vm6167_vm9 = vcmask 261120  }
 0x841   : > { %v2467_v49 = vadd.f32 %v2459_v2, %v2411_v55 }
 0x843   : > { %v2473_v22 = vadd.f32 %v5802_v17, %v2467_v49 }
 0x845   : > { %2822 = vmatmul.msk.f32.vlgmr.msrb.gmra.mxu0 %vm554_vm1, %v2473_v22 }
 0x848   : > { %v2339_v54 = vpop.permute.xlu1 %2338 }
 0x849   : > { %v2348_v17 = vsel %vm2308_vm3, %v2339_v54, 0.0 }
 0x84a   : > { %v2356_v47 = vadd.f32 %v2348_v17, %v2300_v30 }
 0x84c   : > { %v2412_v41 = vadd.f32 %v2404_v10, %v2356_v47 }
 0x84e   : > { %v2468_v42 = vadd.f32 %v2460_v0, %v2412_v41 }
 0x851   : > { %v2443_v43 = vpop.permute.xlu1 %2442 }
 0x852   : > { %v2458_v23 = vsel %vm2418_vm5, %v2443_v43, 0.0 }
 0x853   : > { %v2466_v19 = vadd.f32 %v2458_v23, %v2410_v20 }
 0x855   : > { %v2472_v3 = vadd.f32 %v5772_v34, %v2466_v19 }
 0x857   : > { %v2474_v31 = vadd.f32 %v2472_v3, %v2468_v42 }
 0x859   : > { %2823 = vmatmul.msk.f32.gmra.mxu0 %vm554_vm1, %v2474_v31  ;;  %vm6168_vm1 = vmmov %vm6167_vm9 }
 0x893   : > { %v2612_v52 = vpop.f32.mrf.mxu3 }
 0x89b   : > { %v2615_v9 = vpop.f32.mrf.mxu3 }
 0x8c2   : > { %v2641_v37 = vpop.f32.mrf.mxu0 }
 0x8c3   : > { %v2642_v57 = vadd.f32 %v2641_v37, %v2612_v52 }
 0x8c5   : > { %2647 = vst.msk [vmem:[%s353_s28] sm:$0xff] %vm6167_vm9, %v2642_v57 }
 0x8d6   : > { %v2644_v62 = vpop.f32.mrf.mxu0 }
 0x8d7   : > { %v2645_v34 = vadd.f32 %v2644_v62, %v2615_v9 }
 0x8d9   : > { %2648 = vst.msk [vmem:[%s353_s28 + $0x8] sm:$0xff] %vm6168_vm1, %v2645_v34 }
 0x8da   : > { %3047 = shalt.err (!%p3044_p3)
}
 0x8db   : > { %s3093_s26 = smov 128   ;;  %s3094_s28 = smov 8  }
 0x8dc   : > { %2834 = dma.vmem_to_hbm [thread:$0]  (%p3188_p5), %s2663_s18, 256, %s2665_s20, %s2650_s25, %s3093_s26, %s3093_s26, %s3094_s28  }
 0x8dd PF: > { %p2840_p4 = scmp.ge.s32.totalorder %s3082_s16, 2  ;;  %s2679_s17 = sand.u32 1, %s3070_s13  }
 0x8de   : > { %s2680_s29 = scalar_lea.sflag [#allocation5], %s2679_s17 }
 0x8df   : > { %p2837_p7 = pnand %p2840_p4, %p3192_p6 }
 0x8e1   : > { %p2838_p8 = pneg %p2837_p7 }
 0x8e3   : > { %3065 = dma.done.wait (%p2838_p8), %s2680_s29, 256  }
 0x8e4   : > { %3067 = vsyncadd (%p2838_p8), %s2680_s29, 4294967040  ;;  %p20_p9 = scmp.ge.s32.totalorder %s3175_s19, 4   ;;  %s6169_s13 = smov %s3074_s14 }
 0x8e5   : > { %s6170_s14 = smov %s3078_s15  ;;  %s6171_s15 = smov %s3186_s22 }
 0x8e6   : > { %s6172_s16 = smov %s3175_s19  ;;  %22 = sbr.rel (!%p20_p9) target bundleno = 3 (0x3), region = 98 }
 0x8eb   :  { %2686 = vsyncpa [#allocation5], 1 }
 0x8ec   :  { %2688 = vsyncpa [#allocation5 + $0x1], 1 }

</bundles_post_ra>
